<compile_context>
chip_gen: v7x
topology: tpu7x:2x2x1
jax: 0.10.0
libtpu: 0.0.40
codegen_flags: <defaults>
</compile_context>

<pallas_src>
import functools

import numpy as np
import jax
import jax.numpy as jnp
from jax.experimental import pallas as pl
from jax.experimental.pallas import tpu as pltpu


def _quantlinear_kernel(x_ref, qw_ref, s_ref, xs_ref, zs_ref, b_ref,
                        o_ref, acc_ref, qbuf_ref, *,
                        group_size, groups_per_tile, acc_in_regs, x_k_resident):
    """One (tm, tn) output tile; grid axis 2 sweeps K in tiles of `groups_per_tile` groups.

    x_ref   : (G or gpt, tm, gs) bf16   per-group activation slabs
    qw_ref  : (tk//8, tn)  int32        packed nibbles (kernel layout, see repack_qweight_for_tpu)
    s_ref   : (gpt, tn)    f32          per-group scales
    xs_ref  : (tm, G)      f32          per-group row sums of x (hoisted zero correction)
    zs_ref  : (G, tn)      f32          zeros * scales
    b_ref   : (1, tn)      f32          bias
    acc_ref : (tm, tn)     f32          accumulator scratch (resident across K steps)
    qbuf_ref: (2*gs, tn)   bf16         double-buffered dequant staging buffer
    """
    k = pl.program_id(2)
    gs = group_size
    rows = gs // 8                                   # packed int32 rows per quantization group

    @pl.when(k == 0)
    def _init():
        # Fold the bias into the accumulator init.
        acc_ref[...] = jnp.broadcast_to(b_ref[...], acc_ref.shape)

    # With a K-resident x block the group index is global (k * gpt + gi); otherwise local.
    x_base = k * groups_per_tile if x_k_resident else 0

    def group_product(gi):
        slot = gi & 1                                # alternate staging slots -> unpack/dot overlap
        packed = qw_ref[gi * rows:(gi + 1) * rows, :]                     # (gs//8, tn) int32
        # Unpack 8 nibbles; convert each chunk to bf16 *before* staging (values 0..15 are exact).
        for b in range(8):
            nib = (packed >> (4 * b)) & 0xF
            qbuf_ref[slot * gs + b * rows: slot * gs + (b + 1) * rows, :] = (
                nib.astype(jnp.bfloat16))
        x_g = x_ref[x_base + gi]                                          # (tm, gs) bf16
        # Raw-nibble matmul on the MXU, f32 accumulation; per-group scale applied columnwise.
        p = jnp.dot(x_g, qbuf_ref[slot * gs:(slot + 1) * gs, :],
                    preferred_element_type=jnp.float32)                   # (tm, tn) f32
        return p * s_ref[gi:gi + 1, :]

    if acc_in_regs:
        # Small (decode) tiles: keep the accumulator in vregs across the unrolled group loop.
        acc = acc_ref[...]
        for gi in range(groups_per_tile):
            acc = acc + group_product(gi)
        acc_ref[...] = acc
    else:
        # Large (prefill) tiles: accumulate into VMEM scratch per group to avoid spills.
        for gi in range(groups_per_tile):
            acc_ref[...] += group_product(gi)

    @pl.when(k == pl.num_programs(2) - 1)
    def _finalize():
        # Hoisted zero-point correction:  y = sum_g (x_g@q_g)*s_g - xsum @ (z*s) + bias.
        corr = jnp.dot(xs_ref[...], zs_ref[...], preferred_element_type=jnp.float32)
        o_ref[...] = (acc_ref[...] - corr).astype(o_ref.dtype)


def quantlinear_forward(x, qweight_tpu, zeros, scales, bias, *, group_size,
                        tm=None, tn=None, tk=None, out_dtype=jnp.bfloat16):
    """x: (M, K) float; qweight_tpu: (K//8, N) int32 in the kernel nibble layout
    (see repack_qweight_for_tpu); zeros, scales: (G, N); bias: (N,)/(1, N) or None.
    Returns (M, N) `out_dtype` (default bf16, the TPU stand-in for the module's f16)."""
    M, K = x.shape
    N = qweight_tpu.shape[1]
    gs = group_size
    assert gs % 8 == 0 and K % gs == 0
    G = K // gs
    assert scales.shape == (G, N) and zeros.shape == (G, N)

    # ---------------- tile selection ----------------
    if tm is None:
        if M <= 256:
            tm = M
        else:
            tm = next((c for c in (256, 128, 64, 32, 16, 8) if M % c == 0), M)
    if tn is None:
        # Largest lane-dense tile that keeps >=2 column tiles (v7x two-TC sharding);
        # fall back to a single full-width tile for small N.
        tn = next((c for c in (1024, 512, 256, 128) if N % c == 0 and N // c >= 2), None)
        if tn is None:
            tn = next((c for c in (1024, 512, 256, 128) if N % c == 0), N)
    if tk is None:
        if G <= 8:
            gpt = G
        elif G % 16 == 0:
            gpt = 16
        elif G % 8 == 0:
            gpt = 8
        else:
            gpt = G
        tk = gpt * gs
    gpt = tk // gs

    assert M % tm == 0 and (tm % 8 == 0 or tm == M)
    assert N % tn == 0 and (tn % 128 == 0 or tn == N)
    assert tk % gs == 0 and K % tk == 0
    # (8,128)/full-dim rule for the per-group scales block (and clean qweight sublane blocks).
    assert gpt % 8 == 0 or gpt == G, "tk must span a multiple of 8 groups or all groups"
    num_k = K // tk

    # ---------------- wrapper-side preparation ----------------
    # bf16 activations feed the MXU; the per-group row sums are computed from the SAME
    # bf16-rounded x so the zero-point cancellation stays exact.
    x_bf = x.astype(jnp.bfloat16)
    x3 = jnp.transpose(x_bf.reshape(M, G, gs), (1, 0, 2))               # (G, M, gs) bf16
    xs = x_bf.astype(jnp.float32).reshape(M, G, gs).sum(axis=-1)        # (M, G) f32
    scales_f = scales.astype(jnp.float32)
    zs = zeros.astype(jnp.float32) * scales_f                           # (G, N) f32
    if bias is None:
        bias2 = jnp.zeros((1, N), jnp.float32)
    else:
        bias2 = jnp.asarray(bias, jnp.float32).reshape(1, N)

    # x residency: keep the whole (G, tm, gs) activation slab in VMEM across j/k (DMA'd once
    # per row tile) unless it is too large, in which case deliver (gpt, tm, gs) per K step.
    x_k_resident = (G * tm * gs * 2) <= (4 * 1024 * 1024)
    if x_k_resident:
        x_spec = pl.BlockSpec((G, tm, gs), lambda i, j, k: (0, i, 0))
    else:
        x_spec = pl.BlockSpec((gpt, tm, gs), lambda i, j, k: (k, i, 0))

    # Small tiles keep the f32 accumulator register-resident; large tiles go through scratch.
    acc_in_regs = (tm * tn * 4) <= (64 * 1024)

    kernel = functools.partial(_quantlinear_kernel, group_size=gs,
                               groups_per_tile=gpt, acc_in_regs=acc_in_regs,
                               x_k_resident=x_k_resident)

    return pl.pallas_call(
        kernel,
        out_shape=jax.ShapeDtypeStruct((M, N), out_dtype),
        grid_spec=pltpu.PrefetchScalarGridSpec(
            num_scalar_prefetch=0,
            grid=(M // tm, N // tn, num_k),
            in_specs=[
                x_spec,                                                       # x slabs (bf16)
                pl.BlockSpec((tk // 8, tn), lambda i, j, k: (k, j)),          # packed qweight
                pl.BlockSpec((gpt, tn), lambda i, j, k: (k, j)),              # scales
                pl.BlockSpec((tm, G), lambda i, j, k: (i, 0)),                # per-group rowsums
                pl.BlockSpec((G, tn), lambda i, j, k: (0, j)),                # zeros * scales
                pl.BlockSpec((1, tn), lambda i, j, k: (0, j)),                # bias
            ],
            out_specs=pl.BlockSpec((tm, tn), lambda i, j, k: (i, j)),
            scratch_shapes=[pltpu.VMEM((tm, tn), jnp.float32),                # accumulator
                            pltpu.VMEM((2 * gs, tn), jnp.bfloat16)],          # dequant staging
        ),
        compiler_params=pltpu.CompilerParams(
            dimension_semantics=("parallel", "parallel", "arbitrary"),
            vmem_limit_bytes=32 * 1024 * 1024),
    )(x3, qweight_tpu, scales_f, xs, zs, bias2)


# ---------------- host-side packing glue (mirrors QuantLinear.pack) ----------------

def pack_qweight(w_int, bits=4):
    """w_int: (K, N) ints in [0, 2^bits) -> module-layout packed int32 (K*bits//32, N)."""
    K, N = w_int.shape
    per = 32 // bits
    w = np.asarray(w_int, dtype=np.uint32).reshape(K // per, per, N)
    packed = np.zeros((K // per, N), dtype=np.uint32)
    for b in range(per):
        packed |= w[:, b, :] << (bits * b)
    return packed.view(np.int32)


def pack_qzeros(zeros_int, bits=4):
    """zeros_int: (G, N) ints in [0, 2^bits) -> module-layout packed int32 (G, N*bits//32)."""
    G, N = zeros_int.shape
    per = 32 // bits
    z = np.asarray(zeros_int, dtype=np.uint32).reshape(G, N // per, per)
    packed = np.zeros((G, N // per), dtype=np.uint32)
    for b in range(per):
        packed |= z[:, :, b] << (bits * b)
    return packed.view(np.int32)


def unpack_qweight(qweight, bits=4):
    """Module-layout qweight (K//8, N) -> (K, N) int32 in original K order."""
    per = 32 // bits
    qw = np.asarray(qweight).view(np.uint32)
    nib = [((qw >> (bits * b)) & ((1 << bits) - 1)) for b in range(per)]
    return np.stack(nib, axis=1).reshape(qw.shape[0] * per, qw.shape[1]).astype(np.int32)


def unpack_qzeros(qzeros, bits=4):
    """Module-layout qzeros (G, N//8) -> (G, N) int32."""
    per = 32 // bits
    qz = np.asarray(qzeros).view(np.uint32)
    cols = [((qz >> (bits * b)) & ((1 << bits) - 1)) for b in range(per)]
    return np.stack(cols, axis=-1).reshape(qz.shape[0], -1).astype(np.int32)


def repack_qweight_for_tpu(qweight, group_size, bits=4):
    """Repack module-layout qweight into the kernel nibble layout: within each quantization
    group, nibble b of packed row r holds the weight at K index b*(group_size//8)+r, so the
    in-kernel unpack is a contiguous, sublane-aligned placement along K (no interleave)."""
    per = 32 // bits
    w_int = unpack_qweight(qweight, bits)               # (K, N), original K order
    K, N = w_int.shape
    gs = group_size
    assert K % gs == 0 and gs % per == 0
    rows = gs // per
    w = w_int.reshape(K // gs, per, rows, N).astype(np.uint32)   # [g, b, r, n]
    packed = np.zeros((K // gs, rows, N), dtype=np.uint32)
    for b in range(per):
        packed |= (w[:, b, :, :] & ((1 << bits) - 1)) << (bits * b)
    return packed.reshape(K // per, N).view(np.int32)


def prepare_quantlinear_params(qweight, qzeros, scales, bias, group_size, g_idx=None):
    """One-time parameter setup: kernel nibble layout for qweight, unpacked f32 zero points,
    f32 scales/bias (TPU stand-in for float16).  Only the default contiguous g_idx is supported."""
    K = np.asarray(qweight).shape[0] * 8
    if g_idx is not None:
        expected = np.arange(K, dtype=np.int64) // group_size
        if not np.array_equal(np.asarray(g_idx, dtype=np.int64), expected):
            raise NotImplementedError("Only the default g_idx = i // group_size is supported.")
    qweight_tpu = jnp.asarray(repack_qweight_for_tpu(np.asarray(qweight), group_size))
    zeros = jnp.asarray(unpack_qzeros(np.asarray(qzeros)).astype(np.float32))
    scales = jnp.asarray(np.asarray(scales, dtype=np.float32))
    bias = None if bias is None else jnp.asarray(np.asarray(bias, np.float32).reshape(1, -1))
    return qweight_tpu, zeros, scales, bias


if __name__ == "__main__":
    # Small QuantLinear config: bits=4, infeatures=1024, outfeatures=512, group_size=64
    BITS = 4
    M, K, N = 8, 1024, 512
    GROUP_SIZE = 64
    G = K // GROUP_SIZE

    key = jax.random.PRNGKey(0)
    k1, k2, k3, k4, k5 = jax.random.split(key, 5)

    # Deterministic synthetic quantized parameters (what `pack` would have produced).
    w_int = jax.random.randint(k1, (K, N), 0, 2 ** BITS, dtype=jnp.int32)      # int4 weights
    zeros_int = jax.random.randint(k2, (G, N), 0, 2 ** BITS, dtype=jnp.int32)  # int4 zero points
    scales = jax.random.uniform(k3, (G, N), jnp.float32) * 0.05 + 0.01
    bias = jax.random.normal(k4, (N,), jnp.float32)
    x = jax.random.normal(k5, (M, K), jnp.float32)

    # Module buffer formats, then the one-time kernel-side preparation.
    qweight = pack_qweight(np.asarray(w_int), BITS)                      # (K//8, N) int32
    qzeros = pack_qzeros(np.asarray(zeros_int), BITS)                    # (G, N//8) int32
    g_idx = np.arange(K, dtype=np.int32) // GROUP_SIZE
    qweight_tpu, zeros_f, scales_f, bias_f = prepare_quantlinear_params(
        qweight, qzeros, np.asarray(scales), np.asarray(bias), GROUP_SIZE, g_idx=g_idx)

    # tk=512 -> 8 groups per K tile and 2 K-steps (exercises the unrolled group loop, the
    # staging double-buffer and the cross-step accumulator); default tn=256 -> 2 column tiles.
    out = quantlinear_forward(x, qweight_tpu, zeros_f, scales_f, bias_f,
                              group_size=GROUP_SIZE, tk=512)
    out = jax.block_until_ready(out)

    # Pure-JAX f32 reference: dequantize full weight and matmul.
    g_idx_j = jnp.arange(K, dtype=jnp.int32) // GROUP_SIZE
    w_deq = (w_int - zeros_int[g_idx_j]).astype(jnp.float32) * scales[g_idx_j]
    ref = x @ w_deq + bias[None, :]

    # bf16 activations on the MXU + bf16 output -> relaxed tolerance vs the f32 reference.
    np.testing.assert_allclose(np.asarray(out, dtype=np.float32), np.asarray(ref),
                               rtol=2e-2, atol=8e-2)
    print("KERNEL_OK")
</pallas_src>

<mosaic_0001>
module attributes {stable_mosaic.version = 11 : i64} {
  func.func @_quantlinear_kernel(%arg0: i32, %arg1: i32, %arg2: i32, %arg3: memref<16x8x64xbf16, #tpu.memory_space<vmem>>, %arg4: memref<64x256xi32, #tpu.memory_space<vmem>>, %arg5: memref<8x256xf32, #tpu.memory_space<vmem>>, %arg6: memref<8x16xf32, #tpu.memory_space<vmem>>, %arg7: memref<16x256xf32, #tpu.memory_space<vmem>>, %arg8: memref<1x256xf32, #tpu.memory_space<vmem>>, %arg9: memref<8x256xbf16, #tpu.memory_space<vmem>>, %arg10: memref<8x256xf32, #tpu.memory_space<vmem>>, %arg11: memref<128x256xbf16, #tpu.memory_space<vmem>>) attributes {dimension_semantics = [#tpu.dimension_semantics<parallel>, #tpu.dimension_semantics<parallel>, #tpu.dimension_semantics<arbitrary>], iteration_bounds = array<i64: 1, 2, 2>, scalar_prefetch = 0 : i64, scratch_operands = 2 : i64, tpu.core_type = #tpu.core_type<tc>, window_params = [{transform_indices = @transform_0, window_bounds = array<i64: 16, 8, 64>}, {transform_indices = @transform_1, window_bounds = array<i64: 64, 256>}, {transform_indices = @transform_2, window_bounds = array<i64: 8, 256>}, {transform_indices = @transform_3, window_bounds = array<i64: 8, 16>}, {transform_indices = @transform_4, window_bounds = array<i64: 16, 256>}, {transform_indices = @transform_5, window_bounds = array<i64: 1, 256>}, {transform_indices = @transform_6, window_bounds = array<i64: 8, 256>}]} {
    %c0_i32 = arith.constant 0 : i32
    %0 = arith.cmpi eq, %arg2, %c0_i32 : i32
    %1 = arith.extui %0 : i1 to i32
    %c0_i32_0 = arith.constant 0 : i32
    %2 = arith.cmpi ne, %1, %c0_i32_0 : i32
    scf.if %2 {
      %c0_306 = arith.constant 0 : index
      %c0_307 = arith.constant 0 : index
      %481 = vector.load %arg8[%c0_306, %c0_307] : memref<1x256xf32, #tpu.memory_space<vmem>>, vector<1x256xf32>
      %482 = vector.shape_cast %481 : vector<1x256xf32> to vector<1x256xf32>
      %483 = vector.broadcast %482 : vector<1x256xf32> to vector<8x256xf32>
      %c0_308 = arith.constant 0 : index
      %c0_309 = arith.constant 0 : index
      %484 = vector.load %arg10[%c0_308, %c0_309] : memref<8x256xf32, #tpu.memory_space<vmem>>, vector<8x256xf32>
      tpu.vector_store %arg10[%c0_308, %c0_309], %483 {strides = array<i32>} : memref<8x256xf32, #tpu.memory_space<vmem>>, vector<8x256xf32>,
    } else {
    }
    %c8_i32 = arith.constant 8 : i32
    %3 = arith.muli %arg2, %c8_i32 : i32
    %c0 = arith.constant 0 : index
    %c0_1 = arith.constant 0 : index
    %4 = vector.load %arg10[%c0, %c0_1] : memref<8x256xf32, #tpu.memory_space<vmem>>, vector<8x256xf32>
    %c0_2 = arith.constant 0 : index
    %c0_3 = arith.constant 0 : index
    %5 = vector.load %arg4[%c0_2, %c0_3] : memref<64x256xi32, #tpu.memory_space<vmem>>, vector<8x256xi32>
    %c0_i32_4 = arith.constant 0 : i32
    %6 = vector.broadcast %c0_i32_4 : i32 to vector<8x256xi32>
    %7 = arith.shrsi %5, %6 : vector<8x256xi32>
    %c15_i32 = arith.constant 15 : i32
    %8 = vector.broadcast %c15_i32 : i32 to vector<8x256xi32>
    %9 = arith.andi %7, %8 : vector<8x256xi32>
    %10 = arith.sitofp %9 : vector<8x256xi32> to vector<8x256xbf16>
    %c0_5 = arith.constant 0 : index
    %c0_6 = arith.constant 0 : index
    %11 = vector.load %arg11[%c0_5, %c0_6] : memref<128x256xbf16, #tpu.memory_space<vmem>>, vector<8x256xbf16>
    tpu.vector_store %arg11[%c0_5, %c0_6], %10 {strides = array<i32>} : memref<128x256xbf16, #tpu.memory_space<vmem>>, vector<8x256xbf16>,
    %c4_i32 = arith.constant 4 : i32
    %12 = vector.broadcast %c4_i32 : i32 to vector<8x256xi32>
    %13 = arith.shrsi %5, %12 : vector<8x256xi32>
    %c15_i32_7 = arith.constant 15 : i32
    %14 = vector.broadcast %c15_i32_7 : i32 to vector<8x256xi32>
    %15 = arith.andi %13, %14 : vector<8x256xi32>
    %16 = arith.sitofp %15 : vector<8x256xi32> to vector<8x256xbf16>
    %c8 = arith.constant 8 : index
    %c0_8 = arith.constant 0 : index
    %17 = vector.load %arg11[%c8, %c0_8] : memref<128x256xbf16, #tpu.memory_space<vmem>>, vector<8x256xbf16>
    tpu.vector_store %arg11[%c8, %c0_8], %16 {strides = array<i32>} : memref<128x256xbf16, #tpu.memory_space<vmem>>, vector<8x256xbf16>,
    %c8_i32_9 = arith.constant 8 : i32
    %18 = vector.broadcast %c8_i32_9 : i32 to vector<8x256xi32>
    %19 = arith.shrsi %5, %18 : vector<8x256xi32>
    %c15_i32_10 = arith.constant 15 : i32
    %20 = vector.broadcast %c15_i32_10 : i32 to vector<8x256xi32>
    %21 = arith.andi %19, %20 : vector<8x256xi32>
    %22 = arith.sitofp %21 : vector<8x256xi32> to vector<8x256xbf16>
    %c16 = arith.constant 16 : index
    %c0_11 = arith.constant 0 : index
    %23 = vector.load %arg11[%c16, %c0_11] : memref<128x256xbf16, #tpu.memory_space<vmem>>, vector<8x256xbf16>
    tpu.vector_store %arg11[%c16, %c0_11], %22 {strides = array<i32>} : memref<128x256xbf16, #tpu.memory_space<vmem>>, vector<8x256xbf16>,
    %c12_i32 = arith.constant 12 : i32
    %24 = vector.broadcast %c12_i32 : i32 to vector<8x256xi32>
    %25 = arith.shrsi %5, %24 : vector<8x256xi32>
    %c15_i32_12 = arith.constant 15 : i32
    %26 = vector.broadcast %c15_i32_12 : i32 to vector<8x256xi32>
    %27 = arith.andi %25, %26 : vector<8x256xi32>
    %28 = arith.sitofp %27 : vector<8x256xi32> to vector<8x256xbf16>
    %c24 = arith.constant 24 : index
    %c0_13 = arith.constant 0 : index
    %29 = vector.load %arg11[%c24, %c0_13] : memref<128x256xbf16, #tpu.memory_space<vmem>>, vector<8x256xbf16>
    tpu.vector_store %arg11[%c24, %c0_13], %28 {strides = array<i32>} : memref<128x256xbf16, #tpu.memory_space<vmem>>, vector<8x256xbf16>,
    %c16_i32 = arith.constant 16 : i32
    %30 = vector.broadcast %c16_i32 : i32 to vector<8x256xi32>
    %31 = arith.shrsi %5, %30 : vector<8x256xi32>
    %c15_i32_14 = arith.constant 15 : i32
    %32 = vector.broadcast %c15_i32_14 : i32 to vector<8x256xi32>
    %33 = arith.andi %31, %32 : vector<8x256xi32>
    %34 = arith.sitofp %33 : vector<8x256xi32> to vector<8x256xbf16>
    %c32 = arith.constant 32 : index
    %c0_15 = arith.constant 0 : index
    %35 = vector.load %arg11[%c32, %c0_15] : memref<128x256xbf16, #tpu.memory_space<vmem>>, vector<8x256xbf16>
    tpu.vector_store %arg11[%c32, %c0_15], %34 {strides = array<i32>} : memref<128x256xbf16, #tpu.memory_space<vmem>>, vector<8x256xbf16>,
    %c20_i32 = arith.constant 20 : i32
    %36 = vector.broadcast %c20_i32 : i32 to vector<8x256xi32>
    %37 = arith.shrsi %5, %36 : vector<8x256xi32>
    %c15_i32_16 = arith.constant 15 : i32
    %38 = vector.broadcast %c15_i32_16 : i32 to vector<8x256xi32>
    %39 = arith.andi %37, %38 : vector<8x256xi32>
    %40 = arith.sitofp %39 : vector<8x256xi32> to vector<8x256xbf16>
    %c40 = arith.constant 40 : index
    %c0_17 = arith.constant 0 : index
    %41 = vector.load %arg11[%c40, %c0_17] : memref<128x256xbf16, #tpu.memory_space<vmem>>, vector<8x256xbf16>
    tpu.vector_store %arg11[%c40, %c0_17], %40 {strides = array<i32>} : memref<128x256xbf16, #tpu.memory_space<vmem>>, vector<8x256xbf16>,
    %c24_i32 = arith.constant 24 : i32
    %42 = vector.broadcast %c24_i32 : i32 to vector<8x256xi32>
    %43 = arith.shrsi %5, %42 : vector<8x256xi32>
    %c15_i32_18 = arith.constant 15 : i32
    %44 = vector.broadcast %c15_i32_18 : i32 to vector<8x256xi32>
    %45 = arith.andi %43, %44 : vector<8x256xi32>
    %46 = arith.sitofp %45 : vector<8x256xi32> to vector<8x256xbf16>
    %c48 = arith.constant 48 : index
    %c0_19 = arith.constant 0 : index
    %47 = vector.load %arg11[%c48, %c0_19] : memref<128x256xbf16, #tpu.memory_space<vmem>>, vector<8x256xbf16>
    tpu.vector_store %arg11[%c48, %c0_19], %46 {strides = array<i32>} : memref<128x256xbf16, #tpu.memory_space<vmem>>, vector<8x256xbf16>,
    %c28_i32 = arith.constant 28 : i32
    %48 = vector.broadcast %c28_i32 : i32 to vector<8x256xi32>
    %49 = arith.shrsi %5, %48 : vector<8x256xi32>
    %c15_i32_20 = arith.constant 15 : i32
    %50 = vector.broadcast %c15_i32_20 : i32 to vector<8x256xi32>
    %51 = arith.andi %49, %50 : vector<8x256xi32>
    %52 = arith.sitofp %51 : vector<8x256xi32> to vector<8x256xbf16>
    %c56 = arith.constant 56 : index
    %c0_21 = arith.constant 0 : index
    %53 = vector.load %arg11[%c56, %c0_21] : memref<128x256xbf16, #tpu.memory_space<vmem>>, vector<8x256xbf16>
    tpu.vector_store %arg11[%c56, %c0_21], %52 {strides = array<i32>} : memref<128x256xbf16, #tpu.memory_space<vmem>>, vector<8x256xbf16>,
    %c0_i32_22 = arith.constant 0 : i32
    %54 = arith.addi %3, %c0_i32_22 : i32
    %55 = arith.index_cast %54 : i32 to index
    %c0_23 = arith.constant 0 : index
    %c0_24 = arith.constant 0 : index
    %56 = vector.load %arg3[%55, %c0_23, %c0_24] : memref<16x8x64xbf16, #tpu.memory_space<vmem>>, vector<1x8x64xbf16>
    %57 = vector.shape_cast %56 : vector<1x8x64xbf16> to vector<8x64xbf16>
    %c0_25 = arith.constant 0 : index
    %c0_26 = arith.constant 0 : index
    %58 = vector.load %arg11[%c0_25, %c0_26] : memref<128x256xbf16, #tpu.memory_space<vmem>>, vector<64x256xbf16>
    %cst = arith.constant dense<0.000000e+00> : vector<8x256xf32>
    %59 = tpu.matmul %57, %58, %cst {dimension_numbers = #tpu.dot_dimension_numbers<[1], [0], [0], [1], [0, 0, 1, 1], [], []>} : vector<8x64xbf16>, vector<64x256xbf16>, vector<8x256xf32> -> vector<8x256xf32>
    %c0_27 = arith.constant 0 : index
    %c0_28 = arith.constant 0 : index
    %60 = vector.load %arg5[%c0_27, %c0_28] : memref<8x256xf32, #tpu.memory_space<vmem>>, vector<1x256xf32>
    %61 = vector.broadcast %60 : vector<1x256xf32> to vector<8x256xf32>
    %62 = arith.mulf %59, %61 : vector<8x256xf32>
    %63 = arith.addf %4, %62 : vector<8x256xf32>
    %c8_29 = arith.constant 8 : index
    %c0_30 = arith.constant 0 : index
    %64 = vector.load %arg4[%c8_29, %c0_30] : memref<64x256xi32, #tpu.memory_space<vmem>>, vector<8x256xi32>
    %c0_i32_31 = arith.constant 0 : i32
    %65 = vector.broadcast %c0_i32_31 : i32 to vector<8x256xi32>
    %66 = arith.shrsi %64, %65 : vector<8x256xi32>
    %c15_i32_32 = arith.constant 15 : i32
    %67 = vector.broadcast %c15_i32_32 : i32 to vector<8x256xi32>
    %68 = arith.andi %66, %67 : vector<8x256xi32>
    %69 = arith.sitofp %68 : vector<8x256xi32> to vector<8x256xbf16>
    %c64 = arith.constant 64 : index
    %c0_33 = arith.constant 0 : index
    %70 = vector.load %arg11[%c64, %c0_33] : memref<128x256xbf16, #tpu.memory_space<vmem>>, vector<8x256xbf16>
    tpu.vector_store %arg11[%c64, %c0_33], %69 {strides = array<i32>} : memref<128x256xbf16, #tpu.memory_space<vmem>>, vector<8x256xbf16>,
    %c4_i32_34 = arith.constant 4 : i32
    %71 = vector.broadcast %c4_i32_34 : i32 to vector<8x256xi32>
    %72 = arith.shrsi %64, %71 : vector<8x256xi32>
    %c15_i32_35 = arith.constant 15 : i32
    %73 = vector.broadcast %c15_i32_35 : i32 to vector<8x256xi32>
    %74 = arith.andi %72, %73 : vector<8x256xi32>
    %75 = arith.sitofp %74 : vector<8x256xi32> to vector<8x256xbf16>
    %c72 = arith.constant 72 : index
    %c0_36 = arith.constant 0 : index
    %76 = vector.load %arg11[%c72, %c0_36] : memref<128x256xbf16, #tpu.memory_space<vmem>>, vector<8x256xbf16>
    tpu.vector_store %arg11[%c72, %c0_36], %75 {strides = array<i32>} : memref<128x256xbf16, #tpu.memory_space<vmem>>, vector<8x256xbf16>,
    %c8_i32_37 = arith.constant 8 : i32
    %77 = vector.broadcast %c8_i32_37 : i32 to vector<8x256xi32>
    %78 = arith.shrsi %64, %77 : vector<8x256xi32>
    %c15_i32_38 = arith.constant 15 : i32
    %79 = vector.broadcast %c15_i32_38 : i32 to vector<8x256xi32>
    %80 = arith.andi %78, %79 : vector<8x256xi32>
    %81 = arith.sitofp %80 : vector<8x256xi32> to vector<8x256xbf16>
    %c80 = arith.constant 80 : index
    %c0_39 = arith.constant 0 : index
    %82 = vector.load %arg11[%c80, %c0_39] : memref<128x256xbf16, #tpu.memory_space<vmem>>, vector<8x256xbf16>
    tpu.vector_store %arg11[%c80, %c0_39], %81 {strides = array<i32>} : memref<128x256xbf16, #tpu.memory_space<vmem>>, vector<8x256xbf16>,
    %c12_i32_40 = arith.constant 12 : i32
    %83 = vector.broadcast %c12_i32_40 : i32 to vector<8x256xi32>
    %84 = arith.shrsi %64, %83 : vector<8x256xi32>
    %c15_i32_41 = arith.constant 15 : i32
    %85 = vector.broadcast %c15_i32_41 : i32 to vector<8x256xi32>
    %86 = arith.andi %84, %85 : vector<8x256xi32>
    %87 = arith.sitofp %86 : vector<8x256xi32> to vector<8x256xbf16>
    %c88 = arith.constant 88 : index
    %c0_42 = arith.constant 0 : index
    %88 = vector.load %arg11[%c88, %c0_42] : memref<128x256xbf16, #tpu.memory_space<vmem>>, vector<8x256xbf16>
    tpu.vector_store %arg11[%c88, %c0_42], %87 {strides = array<i32>} : memref<128x256xbf16, #tpu.memory_space<vmem>>, vector<8x256xbf16>,
    %c16_i32_43 = arith.constant 16 : i32
    %89 = vector.broadcast %c16_i32_43 : i32 to vector<8x256xi32>
    %90 = arith.shrsi %64, %89 : vector<8x256xi32>
    %c15_i32_44 = arith.constant 15 : i32
    %91 = vector.broadcast %c15_i32_44 : i32 to vector<8x256xi32>
    %92 = arith.andi %90, %91 : vector<8x256xi32>
    %93 = arith.sitofp %92 : vector<8x256xi32> to vector<8x256xbf16>
    %c96 = arith.constant 96 : index
    %c0_45 = arith.constant 0 : index
    %94 = vector.load %arg11[%c96, %c0_45] : memref<128x256xbf16, #tpu.memory_space<vmem>>, vector<8x256xbf16>
    tpu.vector_store %arg11[%c96, %c0_45], %93 {strides = array<i32>} : memref<128x256xbf16, #tpu.memory_space<vmem>>, vector<8x256xbf16>,
    %c20_i32_46 = arith.constant 20 : i32
    %95 = vector.broadcast %c20_i32_46 : i32 to vector<8x256xi32>
    %96 = arith.shrsi %64, %95 : vector<8x256xi32>
    %c15_i32_47 = arith.constant 15 : i32
    %97 = vector.broadcast %c15_i32_47 : i32 to vector<8x256xi32>
    %98 = arith.andi %96, %97 : vector<8x256xi32>
    %99 = arith.sitofp %98 : vector<8x256xi32> to vector<8x256xbf16>
    %c104 = arith.constant 104 : index
    %c0_48 = arith.constant 0 : index
    %100 = vector.load %arg11[%c104, %c0_48] : memref<128x256xbf16, #tpu.memory_space<vmem>>, vector<8x256xbf16>
    tpu.vector_store %arg11[%c104, %c0_48], %99 {strides = array<i32>} : memref<128x256xbf16, #tpu.memory_space<vmem>>, vector<8x256xbf16>,
    %c24_i32_49 = arith.constant 24 : i32
    %101 = vector.broadcast %c24_i32_49 : i32 to vector<8x256xi32>
    %102 = arith.shrsi %64, %101 : vector<8x256xi32>
    %c15_i32_50 = arith.constant 15 : i32
    %103 = vector.broadcast %c15_i32_50 : i32 to vector<8x256xi32>
    %104 = arith.andi %102, %103 : vector<8x256xi32>
    %105 = arith.sitofp %104 : vector<8x256xi32> to vector<8x256xbf16>
    %c112 = arith.constant 112 : index
    %c0_51 = arith.constant 0 : index
    %106 = vector.load %arg11[%c112, %c0_51] : memref<128x256xbf16, #tpu.memory_space<vmem>>, vector<8x256xbf16>
    tpu.vector_store %arg11[%c112, %c0_51], %105 {strides = array<i32>} : memref<128x256xbf16, #tpu.memory_space<vmem>>, vector<8x256xbf16>,
    %c28_i32_52 = arith.constant 28 : i32
    %107 = vector.broadcast %c28_i32_52 : i32 to vector<8x256xi32>
    %108 = arith.shrsi %64, %107 : vector<8x256xi32>
    %c15_i32_53 = arith.constant 15 : i32
    %109 = vector.broadcast %c15_i32_53 : i32 to vector<8x256xi32>
    %110 = arith.andi %108, %109 : vector<8x256xi32>
    %111 = arith.sitofp %110 : vector<8x256xi32> to vector<8x256xbf16>
    %c120 = arith.constant 120 : index
    %c0_54 = arith.constant 0 : index
    %112 = vector.load %arg11[%c120, %c0_54] : memref<128x256xbf16, #tpu.memory_space<vmem>>, vector<8x256xbf16>
    tpu.vector_store %arg11[%c120, %c0_54], %111 {strides = array<i32>} : memref<128x256xbf16, #tpu.memory_space<vmem>>, vector<8x256xbf16>,
    %c1_i32 = arith.constant 1 : i32
    %113 = arith.addi %3, %c1_i32 : i32
    %114 = arith.index_cast %113 : i32 to index
    %c0_55 = arith.constant 0 : index
    %c0_56 = arith.constant 0 : index
    %115 = vector.load %arg3[%114, %c0_55, %c0_56] : memref<16x8x64xbf16, #tpu.memory_space<vmem>>, vector<1x8x64xbf16>
    %116 = vector.shape_cast %115 : vector<1x8x64xbf16> to vector<8x64xbf16>
    %c64_57 = arith.constant 64 : index
    %c0_58 = arith.constant 0 : index
    %117 = vector.load %arg11[%c64_57, %c0_58] : memref<128x256xbf16, #tpu.memory_space<vmem>>, vector<64x256xbf16>
    %cst_59 = arith.constant dense<0.000000e+00> : vector<8x256xf32>
    %118 = tpu.matmul %116, %117, %cst_59 {dimension_numbers = #tpu.dot_dimension_numbers<[1], [0], [0], [1], [0, 0, 1, 1], [], []>} : vector<8x64xbf16>, vector<64x256xbf16>, vector<8x256xf32> -> vector<8x256xf32>
    %c1 = arith.constant 1 : index
    %c0_60 = arith.constant 0 : index
    %119 = vector.load %arg5[%c1, %c0_60] : memref<8x256xf32, #tpu.memory_space<vmem>>, vector<1x256xf32>
    %120 = vector.broadcast %119 : vector<1x256xf32> to vector<8x256xf32>
    %121 = arith.mulf %118, %120 : vector<8x256xf32>
    %122 = arith.addf %63, %121 : vector<8x256xf32>
    %c16_61 = arith.constant 16 : index
    %c0_62 = arith.constant 0 : index
    %123 = vector.load %arg4[%c16_61, %c0_62] : memref<64x256xi32, #tpu.memory_space<vmem>>, vector<8x256xi32>
    %c0_i32_63 = arith.constant 0 : i32
    %124 = vector.broadcast %c0_i32_63 : i32 to vector<8x256xi32>
    %125 = arith.shrsi %123, %124 : vector<8x256xi32>
    %c15_i32_64 = arith.constant 15 : i32
    %126 = vector.broadcast %c15_i32_64 : i32 to vector<8x256xi32>
    %127 = arith.andi %125, %126 : vector<8x256xi32>
    %128 = arith.sitofp %127 : vector<8x256xi32> to vector<8x256xbf16>
    %c0_65 = arith.constant 0 : index
    %c0_66 = arith.constant 0 : index
    %129 = vector.load %arg11[%c0_65, %c0_66] : memref<128x256xbf16, #tpu.memory_space<vmem>>, vector<8x256xbf16>
    tpu.vector_store %arg11[%c0_65, %c0_66], %128 {strides = array<i32>} : memref<128x256xbf16, #tpu.memory_space<vmem>>, vector<8x256xbf16>,
    %c4_i32_67 = arith.constant 4 : i32
    %130 = vector.broadcast %c4_i32_67 : i32 to vector<8x256xi32>
    %131 = arith.shrsi %123, %130 : vector<8x256xi32>
    %c15_i32_68 = arith.constant 15 : i32
    %132 = vector.broadcast %c15_i32_68 : i32 to vector<8x256xi32>
    %133 = arith.andi %131, %132 : vector<8x256xi32>
    %134 = arith.sitofp %133 : vector<8x256xi32> to vector<8x256xbf16>
    %c8_69 = arith.constant 8 : index
    %c0_70 = arith.constant 0 : index
    %135 = vector.load %arg11[%c8_69, %c0_70] : memref<128x256xbf16, #tpu.memory_space<vmem>>, vector<8x256xbf16>
    tpu.vector_store %arg11[%c8_69, %c0_70], %134 {strides = array<i32>} : memref<128x256xbf16, #tpu.memory_space<vmem>>, vector<8x256xbf16>,
    %c8_i32_71 = arith.constant 8 : i32
    %136 = vector.broadcast %c8_i32_71 : i32 to vector<8x256xi32>
    %137 = arith.shrsi %123, %136 : vector<8x256xi32>
    %c15_i32_72 = arith.constant 15 : i32
    %138 = vector.broadcast %c15_i32_72 : i32 to vector<8x256xi32>
    %139 = arith.andi %137, %138 : vector<8x256xi32>
    %140 = arith.sitofp %139 : vector<8x256xi32> to vector<8x256xbf16>
    %c16_73 = arith.constant 16 : index
    %c0_74 = arith.constant 0 : index
    %141 = vector.load %arg11[%c16_73, %c0_74] : memref<128x256xbf16, #tpu.memory_space<vmem>>, vector<8x256xbf16>
    tpu.vector_store %arg11[%c16_73, %c0_74], %140 {strides = array<i32>} : memref<128x256xbf16, #tpu.memory_space<vmem>>, vector<8x256xbf16>,
    %c12_i32_75 = arith.constant 12 : i32
    %142 = vector.broadcast %c12_i32_75 : i32 to vector<8x256xi32>
    %143 = arith.shrsi %123, %142 : vector<8x256xi32>
    %c15_i32_76 = arith.constant 15 : i32
    %144 = vector.broadcast %c15_i32_76 : i32 to vector<8x256xi32>
    %145 = arith.andi %143, %144 : vector<8x256xi32>
    %146 = arith.sitofp %145 : vector<8x256xi32> to vector<8x256xbf16>
    %c24_77 = arith.constant 24 : index
    %c0_78 = arith.constant 0 : index
    %147 = vector.load %arg11[%c24_77, %c0_78] : memref<128x256xbf16, #tpu.memory_space<vmem>>, vector<8x256xbf16>
    tpu.vector_store %arg11[%c24_77, %c0_78], %146 {strides = array<i32>} : memref<128x256xbf16, #tpu.memory_space<vmem>>, vector<8x256xbf16>,
    %c16_i32_79 = arith.constant 16 : i32
    %148 = vector.broadcast %c16_i32_79 : i32 to vector<8x256xi32>
    %149 = arith.shrsi %123, %148 : vector<8x256xi32>
    %c15_i32_80 = arith.constant 15 : i32
    %150 = vector.broadcast %c15_i32_80 : i32 to vector<8x256xi32>
    %151 = arith.andi %149, %150 : vector<8x256xi32>
    %152 = arith.sitofp %151 : vector<8x256xi32> to vector<8x256xbf16>
    %c32_81 = arith.constant 32 : index
    %c0_82 = arith.constant 0 : index
    %153 = vector.load %arg11[%c32_81, %c0_82] : memref<128x256xbf16, #tpu.memory_space<vmem>>, vector<8x256xbf16>
    tpu.vector_store %arg11[%c32_81, %c0_82], %152 {strides = array<i32>} : memref<128x256xbf16, #tpu.memory_space<vmem>>, vector<8x256xbf16>,
    %c20_i32_83 = arith.constant 20 : i32
    %154 = vector.broadcast %c20_i32_83 : i32 to vector<8x256xi32>
    %155 = arith.shrsi %123, %154 : vector<8x256xi32>
    %c15_i32_84 = arith.constant 15 : i32
    %156 = vector.broadcast %c15_i32_84 : i32 to vector<8x256xi32>
    %157 = arith.andi %155, %156 : vector<8x256xi32>
    %158 = arith.sitofp %157 : vector<8x256xi32> to vector<8x256xbf16>
    %c40_85 = arith.constant 40 : index
    %c0_86 = arith.constant 0 : index
    %159 = vector.load %arg11[%c40_85, %c0_86] : memref<128x256xbf16, #tpu.memory_space<vmem>>, vector<8x256xbf16>
    tpu.vector_store %arg11[%c40_85, %c0_86], %158 {strides = array<i32>} : memref<128x256xbf16, #tpu.memory_space<vmem>>, vector<8x256xbf16>,
    %c24_i32_87 = arith.constant 24 : i32
    %160 = vector.broadcast %c24_i32_87 : i32 to vector<8x256xi32>
    %161 = arith.shrsi %123, %160 : vector<8x256xi32>
    %c15_i32_88 = arith.constant 15 : i32
    %162 = vector.broadcast %c15_i32_88 : i32 to vector<8x256xi32>
    %163 = arith.andi %161, %162 : vector<8x256xi32>
    %164 = arith.sitofp %163 : vector<8x256xi32> to vector<8x256xbf16>
    %c48_89 = arith.constant 48 : index
    %c0_90 = arith.constant 0 : index
    %165 = vector.load %arg11[%c48_89, %c0_90] : memref<128x256xbf16, #tpu.memory_space<vmem>>, vector<8x256xbf16>
    tpu.vector_store %arg11[%c48_89, %c0_90], %164 {strides = array<i32>} : memref<128x256xbf16, #tpu.memory_space<vmem>>, vector<8x256xbf16>,
    %c28_i32_91 = arith.constant 28 : i32
    %166 = vector.broadcast %c28_i32_91 : i32 to vector<8x256xi32>
    %167 = arith.shrsi %123, %166 : vector<8x256xi32>
    %c15_i32_92 = arith.constant 15 : i32
    %168 = vector.broadcast %c15_i32_92 : i32 to vector<8x256xi32>
    %169 = arith.andi %167, %168 : vector<8x256xi32>
    %170 = arith.sitofp %169 : vector<8x256xi32> to vector<8x256xbf16>
    %c56_93 = arith.constant 56 : index
    %c0_94 = arith.constant 0 : index
    %171 = vector.load %arg11[%c56_93, %c0_94] : memref<128x256xbf16, #tpu.memory_space<vmem>>, vector<8x256xbf16>
    tpu.vector_store %arg11[%c56_93, %c0_94], %170 {strides = array<i32>} : memref<128x256xbf16, #tpu.memory_space<vmem>>, vector<8x256xbf16>,
    %c2_i32 = arith.constant 2 : i32
    %172 = arith.addi %3, %c2_i32 : i32
    %173 = arith.index_cast %172 : i32 to index
    %c0_95 = arith.constant 0 : index
    %c0_96 = arith.constant 0 : index
    %174 = vector.load %arg3[%173, %c0_95, %c0_96] : memref<16x8x64xbf16, #tpu.memory_space<vmem>>, vector<1x8x64xbf16>
    %175 = vector.shape_cast %174 : vector<1x8x64xbf16> to vector<8x64xbf16>
    %c0_97 = arith.constant 0 : index
    %c0_98 = arith.constant 0 : index
    %176 = vector.load %arg11[%c0_97, %c0_98] : memref<128x256xbf16, #tpu.memory_space<vmem>>, vector<64x256xbf16>
    %cst_99 = arith.constant dense<0.000000e+00> : vector<8x256xf32>
    %177 = tpu.matmul %175, %176, %cst_99 {dimension_numbers = #tpu.dot_dimension_numbers<[1], [0], [0], [1], [0, 0, 1, 1], [], []>} : vector<8x64xbf16>, vector<64x256xbf16>, vector<8x256xf32> -> vector<8x256xf32>
    %c2 = arith.constant 2 : index
    %c0_100 = arith.constant 0 : index
    %178 = vector.load %arg5[%c2, %c0_100] : memref<8x256xf32, #tpu.memory_space<vmem>>, vector<1x256xf32>
    %179 = vector.broadcast %178 : vector<1x256xf32> to vector<8x256xf32>
    %180 = arith.mulf %177, %179 : vector<8x256xf32>
    %181 = arith.addf %122, %180 : vector<8x256xf32>
    %c24_101 = arith.constant 24 : index
    %c0_102 = arith.constant 0 : index
    %182 = vector.load %arg4[%c24_101, %c0_102] : memref<64x256xi32, #tpu.memory_space<vmem>>, vector<8x256xi32>
    %c0_i32_103 = arith.constant 0 : i32
    %183 = vector.broadcast %c0_i32_103 : i32 to vector<8x256xi32>
    %184 = arith.shrsi %182, %183 : vector<8x256xi32>
    %c15_i32_104 = arith.constant 15 : i32
    %185 = vector.broadcast %c15_i32_104 : i32 to vector<8x256xi32>
    %186 = arith.andi %184, %185 : vector<8x256xi32>
    %187 = arith.sitofp %186 : vector<8x256xi32> to vector<8x256xbf16>
    %c64_105 = arith.constant 64 : index
    %c0_106 = arith.constant 0 : index
    %188 = vector.load %arg11[%c64_105, %c0_106] : memref<128x256xbf16, #tpu.memory_space<vmem>>, vector<8x256xbf16>
    tpu.vector_store %arg11[%c64_105, %c0_106], %187 {strides = array<i32>} : memref<128x256xbf16, #tpu.memory_space<vmem>>, vector<8x256xbf16>,
    %c4_i32_107 = arith.constant 4 : i32
    %189 = vector.broadcast %c4_i32_107 : i32 to vector<8x256xi32>
    %190 = arith.shrsi %182, %189 : vector<8x256xi32>
    %c15_i32_108 = arith.constant 15 : i32
    %191 = vector.broadcast %c15_i32_108 : i32 to vector<8x256xi32>
    %192 = arith.andi %190, %191 : vector<8x256xi32>
    %193 = arith.sitofp %192 : vector<8x256xi32> to vector<8x256xbf16>
    %c72_109 = arith.constant 72 : index
    %c0_110 = arith.constant 0 : index
    %194 = vector.load %arg11[%c72_109, %c0_110] : memref<128x256xbf16, #tpu.memory_space<vmem>>, vector<8x256xbf16>
    tpu.vector_store %arg11[%c72_109, %c0_110], %193 {strides = array<i32>} : memref<128x256xbf16, #tpu.memory_space<vmem>>, vector<8x256xbf16>,
    %c8_i32_111 = arith.constant 8 : i32
    %195 = vector.broadcast %c8_i32_111 : i32 to vector<8x256xi32>
    %196 = arith.shrsi %182, %195 : vector<8x256xi32>
    %c15_i32_112 = arith.constant 15 : i32
    %197 = vector.broadcast %c15_i32_112 : i32 to vector<8x256xi32>
    %198 = arith.andi %196, %197 : vector<8x256xi32>
    %199 = arith.sitofp %198 : vector<8x256xi32> to vector<8x256xbf16>
    %c80_113 = arith.constant 80 : index
    %c0_114 = arith.constant 0 : index
    %200 = vector.load %arg11[%c80_113, %c0_114] : memref<128x256xbf16, #tpu.memory_space<vmem>>, vector<8x256xbf16>
    tpu.vector_store %arg11[%c80_113, %c0_114], %199 {strides = array<i32>} : memref<128x256xbf16, #tpu.memory_space<vmem>>, vector<8x256xbf16>,
    %c12_i32_115 = arith.constant 12 : i32
    %201 = vector.broadcast %c12_i32_115 : i32 to vector<8x256xi32>
    %202 = arith.shrsi %182, %201 : vector<8x256xi32>
    %c15_i32_116 = arith.constant 15 : i32
    %203 = vector.broadcast %c15_i32_116 : i32 to vector<8x256xi32>
    %204 = arith.andi %202, %203 : vector<8x256xi32>
    %205 = arith.sitofp %204 : vector<8x256xi32> to vector<8x256xbf16>
    %c88_117 = arith.constant 88 : index
    %c0_118 = arith.constant 0 : index
    %206 = vector.load %arg11[%c88_117, %c0_118] : memref<128x256xbf16, #tpu.memory_space<vmem>>, vector<8x256xbf16>
    tpu.vector_store %arg11[%c88_117, %c0_118], %205 {strides = array<i32>} : memref<128x256xbf16, #tpu.memory_space<vmem>>, vector<8x256xbf16>,
    %c16_i32_119 = arith.constant 16 : i32
    %207 = vector.broadcast %c16_i32_119 : i32 to vector<8x256xi32>
    %208 = arith.shrsi %182, %207 : vector<8x256xi32>
    %c15_i32_120 = arith.constant 15 : i32
    %209 = vector.broadcast %c15_i32_120 : i32 to vector<8x256xi32>
    %210 = arith.andi %208, %209 : vector<8x256xi32>
    %211 = arith.sitofp %210 : vector<8x256xi32> to vector<8x256xbf16>
    %c96_121 = arith.constant 96 : index
    %c0_122 = arith.constant 0 : index
    %212 = vector.load %arg11[%c96_121, %c0_122] : memref<128x256xbf16, #tpu.memory_space<vmem>>, vector<8x256xbf16>
    tpu.vector_store %arg11[%c96_121, %c0_122], %211 {strides = array<i32>} : memref<128x256xbf16, #tpu.memory_space<vmem>>, vector<8x256xbf16>,
    %c20_i32_123 = arith.constant 20 : i32
    %213 = vector.broadcast %c20_i32_123 : i32 to vector<8x256xi32>
    %214 = arith.shrsi %182, %213 : vector<8x256xi32>
    %c15_i32_124 = arith.constant 15 : i32
    %215 = vector.broadcast %c15_i32_124 : i32 to vector<8x256xi32>
    %216 = arith.andi %214, %215 : vector<8x256xi32>
    %217 = arith.sitofp %216 : vector<8x256xi32> to vector<8x256xbf16>
    %c104_125 = arith.constant 104 : index
    %c0_126 = arith.constant 0 : index
    %218 = vector.load %arg11[%c104_125, %c0_126] : memref<128x256xbf16, #tpu.memory_space<vmem>>, vector<8x256xbf16>
    tpu.vector_store %arg11[%c104_125, %c0_126], %217 {strides = array<i32>} : memref<128x256xbf16, #tpu.memory_space<vmem>>, vector<8x256xbf16>,
    %c24_i32_127 = arith.constant 24 : i32
    %219 = vector.broadcast %c24_i32_127 : i32 to vector<8x256xi32>
    %220 = arith.shrsi %182, %219 : vector<8x256xi32>
    %c15_i32_128 = arith.constant 15 : i32
    %221 = vector.broadcast %c15_i32_128 : i32 to vector<8x256xi32>
    %222 = arith.andi %220, %221 : vector<8x256xi32>
    %223 = arith.sitofp %222 : vector<8x256xi32> to vector<8x256xbf16>
    %c112_129 = arith.constant 112 : index
    %c0_130 = arith.constant 0 : index
    %224 = vector.load %arg11[%c112_129, %c0_130] : memref<128x256xbf16, #tpu.memory_space<vmem>>, vector<8x256xbf16>
    tpu.vector_store %arg11[%c112_129, %c0_130], %223 {strides = array<i32>} : memref<128x256xbf16, #tpu.memory_space<vmem>>, vector<8x256xbf16>,
    %c28_i32_131 = arith.constant 28 : i32
    %225 = vector.broadcast %c28_i32_131 : i32 to vector<8x256xi32>
    %226 = arith.shrsi %182, %225 : vector<8x256xi32>
    %c15_i32_132 = arith.constant 15 : i32
    %227 = vector.broadcast %c15_i32_132 : i32 to vector<8x256xi32>
    %228 = arith.andi %226, %227 : vector<8x256xi32>
    %229 = arith.sitofp %228 : vector<8x256xi32> to vector<8x256xbf16>
    %c120_133 = arith.constant 120 : index
    %c0_134 = arith.constant 0 : index
    %230 = vector.load %arg11[%c120_133, %c0_134] : memref<128x256xbf16, #tpu.memory_space<vmem>>, vector<8x256xbf16>
    tpu.vector_store %arg11[%c120_133, %c0_134], %229 {strides = array<i32>} : memref<128x256xbf16, #tpu.memory_space<vmem>>, vector<8x256xbf16>,
    %c3_i32 = arith.constant 3 : i32
    %231 = arith.addi %3, %c3_i32 : i32
    %232 = arith.index_cast %231 : i32 to index
    %c0_135 = arith.constant 0 : index
    %c0_136 = arith.constant 0 : index
    %233 = vector.load %arg3[%232, %c0_135, %c0_136] : memref<16x8x64xbf16, #tpu.memory_space<vmem>>, vector<1x8x64xbf16>
    %234 = vector.shape_cast %233 : vector<1x8x64xbf16> to vector<8x64xbf16>
    %c64_137 = arith.constant 64 : index
    %c0_138 = arith.constant 0 : index
    %235 = vector.load %arg11[%c64_137, %c0_138] : memref<128x256xbf16, #tpu.memory_space<vmem>>, vector<64x256xbf16>
    %cst_139 = arith.constant dense<0.000000e+00> : vector<8x256xf32>
    %236 = tpu.matmul %234, %235, %cst_139 {dimension_numbers = #tpu.dot_dimension_numbers<[1], [0], [0], [1], [0, 0, 1, 1], [], []>} : vector<8x64xbf16>, vector<64x256xbf16>, vector<8x256xf32> -> vector<8x256xf32>
    %c3 = arith.constant 3 : index
    %c0_140 = arith.constant 0 : index
    %237 = vector.load %arg5[%c3, %c0_140] : memref<8x256xf32, #tpu.memory_space<vmem>>, vector<1x256xf32>
    %238 = vector.broadcast %237 : vector<1x256xf32> to vector<8x256xf32>
    %239 = arith.mulf %236, %238 : vector<8x256xf32>
    %240 = arith.addf %181, %239 : vector<8x256xf32>
    %c32_141 = arith.constant 32 : index
    %c0_142 = arith.constant 0 : index
    %241 = vector.load %arg4[%c32_141, %c0_142] : memref<64x256xi32, #tpu.memory_space<vmem>>, vector<8x256xi32>
    %c0_i32_143 = arith.constant 0 : i32
    %242 = vector.broadcast %c0_i32_143 : i32 to vector<8x256xi32>
    %243 = arith.shrsi %241, %242 : vector<8x256xi32>
    %c15_i32_144 = arith.constant 15 : i32
    %244 = vector.broadcast %c15_i32_144 : i32 to vector<8x256xi32>
    %245 = arith.andi %243, %244 : vector<8x256xi32>
    %246 = arith.sitofp %245 : vector<8x256xi32> to vector<8x256xbf16>
    %c0_145 = arith.constant 0 : index
    %c0_146 = arith.constant 0 : index
    %247 = vector.load %arg11[%c0_145, %c0_146] : memref<128x256xbf16, #tpu.memory_space<vmem>>, vector<8x256xbf16>
    tpu.vector_store %arg11[%c0_145, %c0_146], %246 {strides = array<i32>} : memref<128x256xbf16, #tpu.memory_space<vmem>>, vector<8x256xbf16>,
    %c4_i32_147 = arith.constant 4 : i32
    %248 = vector.broadcast %c4_i32_147 : i32 to vector<8x256xi32>
    %249 = arith.shrsi %241, %248 : vector<8x256xi32>
    %c15_i32_148 = arith.constant 15 : i32
    %250 = vector.broadcast %c15_i32_148 : i32 to vector<8x256xi32>
    %251 = arith.andi %249, %250 : vector<8x256xi32>
    %252 = arith.sitofp %251 : vector<8x256xi32> to vector<8x256xbf16>
    %c8_149 = arith.constant 8 : index
    %c0_150 = arith.constant 0 : index
    %253 = vector.load %arg11[%c8_149, %c0_150] : memref<128x256xbf16, #tpu.memory_space<vmem>>, vector<8x256xbf16>
    tpu.vector_store %arg11[%c8_149, %c0_150], %252 {strides = array<i32>} : memref<128x256xbf16, #tpu.memory_space<vmem>>, vector<8x256xbf16>,
    %c8_i32_151 = arith.constant 8 : i32
    %254 = vector.broadcast %c8_i32_151 : i32 to vector<8x256xi32>
    %255 = arith.shrsi %241, %254 : vector<8x256xi32>
    %c15_i32_152 = arith.constant 15 : i32
    %256 = vector.broadcast %c15_i32_152 : i32 to vector<8x256xi32>
    %257 = arith.andi %255, %256 : vector<8x256xi32>
    %258 = arith.sitofp %257 : vector<8x256xi32> to vector<8x256xbf16>
    %c16_153 = arith.constant 16 : index
    %c0_154 = arith.constant 0 : index
    %259 = vector.load %arg11[%c16_153, %c0_154] : memref<128x256xbf16, #tpu.memory_space<vmem>>, vector<8x256xbf16>
    tpu.vector_store %arg11[%c16_153, %c0_154], %258 {strides = array<i32>} : memref<128x256xbf16, #tpu.memory_space<vmem>>, vector<8x256xbf16>,
    %c12_i32_155 = arith.constant 12 : i32
    %260 = vector.broadcast %c12_i32_155 : i32 to vector<8x256xi32>
    %261 = arith.shrsi %241, %260 : vector<8x256xi32>
    %c15_i32_156 = arith.constant 15 : i32
    %262 = vector.broadcast %c15_i32_156 : i32 to vector<8x256xi32>
    %263 = arith.andi %261, %262 : vector<8x256xi32>
    %264 = arith.sitofp %263 : vector<8x256xi32> to vector<8x256xbf16>
    %c24_157 = arith.constant 24 : index
    %c0_158 = arith.constant 0 : index
    %265 = vector.load %arg11[%c24_157, %c0_158] : memref<128x256xbf16, #tpu.memory_space<vmem>>, vector<8x256xbf16>
    tpu.vector_store %arg11[%c24_157, %c0_158], %264 {strides = array<i32>} : memref<128x256xbf16, #tpu.memory_space<vmem>>, vector<8x256xbf16>,
    %c16_i32_159 = arith.constant 16 : i32
    %266 = vector.broadcast %c16_i32_159 : i32 to vector<8x256xi32>
    %267 = arith.shrsi %241, %266 : vector<8x256xi32>
    %c15_i32_160 = arith.constant 15 : i32
    %268 = vector.broadcast %c15_i32_160 : i32 to vector<8x256xi32>
    %269 = arith.andi %267, %268 : vector<8x256xi32>
    %270 = arith.sitofp %269 : vector<8x256xi32> to vector<8x256xbf16>
    %c32_161 = arith.constant 32 : index
    %c0_162 = arith.constant 0 : index
    %271 = vector.load %arg11[%c32_161, %c0_162] : memref<128x256xbf16, #tpu.memory_space<vmem>>, vector<8x256xbf16>
    tpu.vector_store %arg11[%c32_161, %c0_162], %270 {strides = array<i32>} : memref<128x256xbf16, #tpu.memory_space<vmem>>, vector<8x256xbf16>,
    %c20_i32_163 = arith.constant 20 : i32
    %272 = vector.broadcast %c20_i32_163 : i32 to vector<8x256xi32>
    %273 = arith.shrsi %241, %272 : vector<8x256xi32>
    %c15_i32_164 = arith.constant 15 : i32
    %274 = vector.broadcast %c15_i32_164 : i32 to vector<8x256xi32>
    %275 = arith.andi %273, %274 : vector<8x256xi32>
    %276 = arith.sitofp %275 : vector<8x256xi32> to vector<8x256xbf16>
    %c40_165 = arith.constant 40 : index
    %c0_166 = arith.constant 0 : index
    %277 = vector.load %arg11[%c40_165, %c0_166] : memref<128x256xbf16, #tpu.memory_space<vmem>>, vector<8x256xbf16>
    tpu.vector_store %arg11[%c40_165, %c0_166], %276 {strides = array<i32>} : memref<128x256xbf16, #tpu.memory_space<vmem>>, vector<8x256xbf16>,
    %c24_i32_167 = arith.constant 24 : i32
    %278 = vector.broadcast %c24_i32_167 : i32 to vector<8x256xi32>
    %279 = arith.shrsi %241, %278 : vector<8x256xi32>
    %c15_i32_168 = arith.constant 15 : i32
    %280 = vector.broadcast %c15_i32_168 : i32 to vector<8x256xi32>
    %281 = arith.andi %279, %280 : vector<8x256xi32>
    %282 = arith.sitofp %281 : vector<8x256xi32> to vector<8x256xbf16>
    %c48_169 = arith.constant 48 : index
    %c0_170 = arith.constant 0 : index
    %283 = vector.load %arg11[%c48_169, %c0_170] : memref<128x256xbf16, #tpu.memory_space<vmem>>, vector<8x256xbf16>
    tpu.vector_store %arg11[%c48_169, %c0_170], %282 {strides = array<i32>} : memref<128x256xbf16, #tpu.memory_space<vmem>>, vector<8x256xbf16>,
    %c28_i32_171 = arith.constant 28 : i32
    %284 = vector.broadcast %c28_i32_171 : i32 to vector<8x256xi32>
    %285 = arith.shrsi %241, %284 : vector<8x256xi32>
    %c15_i32_172 = arith.constant 15 : i32
    %286 = vector.broadcast %c15_i32_172 : i32 to vector<8x256xi32>
    %287 = arith.andi %285, %286 : vector<8x256xi32>
    %288 = arith.sitofp %287 : vector<8x256xi32> to vector<8x256xbf16>
    %c56_173 = arith.constant 56 : index
    %c0_174 = arith.constant 0 : index
    %289 = vector.load %arg11[%c56_173, %c0_174] : memref<128x256xbf16, #tpu.memory_space<vmem>>, vector<8x256xbf16>
    tpu.vector_store %arg11[%c56_173, %c0_174], %288 {strides = array<i32>} : memref<128x256xbf16, #tpu.memory_space<vmem>>, vector<8x256xbf16>,
    %c4_i32_175 = arith.constant 4 : i32
    %290 = arith.addi %3, %c4_i32_175 : i32
    %291 = arith.index_cast %290 : i32 to index
    %c0_176 = arith.constant 0 : index
    %c0_177 = arith.constant 0 : index
    %292 = vector.load %arg3[%291, %c0_176, %c0_177] : memref<16x8x64xbf16, #tpu.memory_space<vmem>>, vector<1x8x64xbf16>
    %293 = vector.shape_cast %292 : vector<1x8x64xbf16> to vector<8x64xbf16>
    %c0_178 = arith.constant 0 : index
    %c0_179 = arith.constant 0 : index
    %294 = vector.load %arg11[%c0_178, %c0_179] : memref<128x256xbf16, #tpu.memory_space<vmem>>, vector<64x256xbf16>
    %cst_180 = arith.constant dense<0.000000e+00> : vector<8x256xf32>
    %295 = tpu.matmul %293, %294, %cst_180 {dimension_numbers = #tpu.dot_dimension_numbers<[1], [0], [0], [1], [0, 0, 1, 1], [], []>} : vector<8x64xbf16>, vector<64x256xbf16>, vector<8x256xf32> -> vector<8x256xf32>
    %c4 = arith.constant 4 : index
    %c0_181 = arith.constant 0 : index
    %296 = vector.load %arg5[%c4, %c0_181] : memref<8x256xf32, #tpu.memory_space<vmem>>, vector<1x256xf32>
    %297 = vector.broadcast %296 : vector<1x256xf32> to vector<8x256xf32>
    %298 = arith.mulf %295, %297 : vector<8x256xf32>
    %299 = arith.addf %240, %298 : vector<8x256xf32>
    %c40_182 = arith.constant 40 : index
    %c0_183 = arith.constant 0 : index
    %300 = vector.load %arg4[%c40_182, %c0_183] : memref<64x256xi32, #tpu.memory_space<vmem>>, vector<8x256xi32>
    %c0_i32_184 = arith.constant 0 : i32
    %301 = vector.broadcast %c0_i32_184 : i32 to vector<8x256xi32>
    %302 = arith.shrsi %300, %301 : vector<8x256xi32>
    %c15_i32_185 = arith.constant 15 : i32
    %303 = vector.broadcast %c15_i32_185 : i32 to vector<8x256xi32>
    %304 = arith.andi %302, %303 : vector<8x256xi32>
    %305 = arith.sitofp %304 : vector<8x256xi32> to vector<8x256xbf16>
    %c64_186 = arith.constant 64 : index
    %c0_187 = arith.constant 0 : index
    %306 = vector.load %arg11[%c64_186, %c0_187] : memref<128x256xbf16, #tpu.memory_space<vmem>>, vector<8x256xbf16>
    tpu.vector_store %arg11[%c64_186, %c0_187], %305 {strides = array<i32>} : memref<128x256xbf16, #tpu.memory_space<vmem>>, vector<8x256xbf16>,
    %c4_i32_188 = arith.constant 4 : i32
    %307 = vector.broadcast %c4_i32_188 : i32 to vector<8x256xi32>
    %308 = arith.shrsi %300, %307 : vector<8x256xi32>
    %c15_i32_189 = arith.constant 15 : i32
    %309 = vector.broadcast %c15_i32_189 : i32 to vector<8x256xi32>
    %310 = arith.andi %308, %309 : vector<8x256xi32>
    %311 = arith.sitofp %310 : vector<8x256xi32> to vector<8x256xbf16>
    %c72_190 = arith.constant 72 : index
    %c0_191 = arith.constant 0 : index
    %312 = vector.load %arg11[%c72_190, %c0_191] : memref<128x256xbf16, #tpu.memory_space<vmem>>, vector<8x256xbf16>
    tpu.vector_store %arg11[%c72_190, %c0_191], %311 {strides = array<i32>} : memref<128x256xbf16, #tpu.memory_space<vmem>>, vector<8x256xbf16>,
    %c8_i32_192 = arith.constant 8 : i32
    %313 = vector.broadcast %c8_i32_192 : i32 to vector<8x256xi32>
    %314 = arith.shrsi %300, %313 : vector<8x256xi32>
    %c15_i32_193 = arith.constant 15 : i32
    %315 = vector.broadcast %c15_i32_193 : i32 to vector<8x256xi32>
    %316 = arith.andi %314, %315 : vector<8x256xi32>
    %317 = arith.sitofp %316 : vector<8x256xi32> to vector<8x256xbf16>
    %c80_194 = arith.constant 80 : index
    %c0_195 = arith.constant 0 : index
    %318 = vector.load %arg11[%c80_194, %c0_195] : memref<128x256xbf16, #tpu.memory_space<vmem>>, vector<8x256xbf16>
    tpu.vector_store %arg11[%c80_194, %c0_195], %317 {strides = array<i32>} : memref<128x256xbf16, #tpu.memory_space<vmem>>, vector<8x256xbf16>,
    %c12_i32_196 = arith.constant 12 : i32
    %319 = vector.broadcast %c12_i32_196 : i32 to vector<8x256xi32>
    %320 = arith.shrsi %300, %319 : vector<8x256xi32>
    %c15_i32_197 = arith.constant 15 : i32
    %321 = vector.broadcast %c15_i32_197 : i32 to vector<8x256xi32>
    %322 = arith.andi %320, %321 : vector<8x256xi32>
    %323 = arith.sitofp %322 : vector<8x256xi32> to vector<8x256xbf16>
    %c88_198 = arith.constant 88 : index
    %c0_199 = arith.constant 0 : index
    %324 = vector.load %arg11[%c88_198, %c0_199] : memref<128x256xbf16, #tpu.memory_space<vmem>>, vector<8x256xbf16>
    tpu.vector_store %arg11[%c88_198, %c0_199], %323 {strides = array<i32>} : memref<128x256xbf16, #tpu.memory_space<vmem>>, vector<8x256xbf16>,
    %c16_i32_200 = arith.constant 16 : i32
    %325 = vector.broadcast %c16_i32_200 : i32 to vector<8x256xi32>
    %326 = arith.shrsi %300, %325 : vector<8x256xi32>
    %c15_i32_201 = arith.constant 15 : i32
    %327 = vector.broadcast %c15_i32_201 : i32 to vector<8x256xi32>
    %328 = arith.andi %326, %327 : vector<8x256xi32>
    %329 = arith.sitofp %328 : vector<8x256xi32> to vector<8x256xbf16>
    %c96_202 = arith.constant 96 : index
    %c0_203 = arith.constant 0 : index
    %330 = vector.load %arg11[%c96_202, %c0_203] : memref<128x256xbf16, #tpu.memory_space<vmem>>, vector<8x256xbf16>
    tpu.vector_store %arg11[%c96_202, %c0_203], %329 {strides = array<i32>} : memref<128x256xbf16, #tpu.memory_space<vmem>>, vector<8x256xbf16>,
    %c20_i32_204 = arith.constant 20 : i32
    %331 = vector.broadcast %c20_i32_204 : i32 to vector<8x256xi32>
    %332 = arith.shrsi %300, %331 : vector<8x256xi32>
    %c15_i32_205 = arith.constant 15 : i32
    %333 = vector.broadcast %c15_i32_205 : i32 to vector<8x256xi32>
    %334 = arith.andi %332, %333 : vector<8x256xi32>
    %335 = arith.sitofp %334 : vector<8x256xi32> to vector<8x256xbf16>
    %c104_206 = arith.constant 104 : index
    %c0_207 = arith.constant 0 : index
    %336 = vector.load %arg11[%c104_206, %c0_207] : memref<128x256xbf16, #tpu.memory_space<vmem>>, vector<8x256xbf16>
    tpu.vector_store %arg11[%c104_206, %c0_207], %335 {strides = array<i32>} : memref<128x256xbf16, #tpu.memory_space<vmem>>, vector<8x256xbf16>,
    %c24_i32_208 = arith.constant 24 : i32
    %337 = vector.broadcast %c24_i32_208 : i32 to vector<8x256xi32>
    %338 = arith.shrsi %300, %337 : vector<8x256xi32>
    %c15_i32_209 = arith.constant 15 : i32
    %339 = vector.broadcast %c15_i32_209 : i32 to vector<8x256xi32>
    %340 = arith.andi %338, %339 : vector<8x256xi32>
    %341 = arith.sitofp %340 : vector<8x256xi32> to vector<8x256xbf16>
    %c112_210 = arith.constant 112 : index
    %c0_211 = arith.constant 0 : index
    %342 = vector.load %arg11[%c112_210, %c0_211] : memref<128x256xbf16, #tpu.memory_space<vmem>>, vector<8x256xbf16>
    tpu.vector_store %arg11[%c112_210, %c0_211], %341 {strides = array<i32>} : memref<128x256xbf16, #tpu.memory_space<vmem>>, vector<8x256xbf16>,
    %c28_i32_212 = arith.constant 28 : i32
    %343 = vector.broadcast %c28_i32_212 : i32 to vector<8x256xi32>
    %344 = arith.shrsi %300, %343 : vector<8x256xi32>
    %c15_i32_213 = arith.constant 15 : i32
    %345 = vector.broadcast %c15_i32_213 : i32 to vector<8x256xi32>
    %346 = arith.andi %344, %345 : vector<8x256xi32>
    %347 = arith.sitofp %346 : vector<8x256xi32> to vector<8x256xbf16>
    %c120_214 = arith.constant 120 : index
    %c0_215 = arith.constant 0 : index
    %348 = vector.load %arg11[%c120_214, %c0_215] : memref<128x256xbf16, #tpu.memory_space<vmem>>, vector<8x256xbf16>
    tpu.vector_store %arg11[%c120_214, %c0_215], %347 {strides = array<i32>} : memref<128x256xbf16, #tpu.memory_space<vmem>>, vector<8x256xbf16>,
    %c5_i32 = arith.constant 5 : i32
    %349 = arith.addi %3, %c5_i32 : i32
    %350 = arith.index_cast %349 : i32 to index
    %c0_216 = arith.constant 0 : index
    %c0_217 = arith.constant 0 : index
    %351 = vector.load %arg3[%350, %c0_216, %c0_217] : memref<16x8x64xbf16, #tpu.memory_space<vmem>>, vector<1x8x64xbf16>
    %352 = vector.shape_cast %351 : vector<1x8x64xbf16> to vector<8x64xbf16>
    %c64_218 = arith.constant 64 : index
    %c0_219 = arith.constant 0 : index
    %353 = vector.load %arg11[%c64_218, %c0_219] : memref<128x256xbf16, #tpu.memory_space<vmem>>, vector<64x256xbf16>
    %cst_220 = arith.constant dense<0.000000e+00> : vector<8x256xf32>
    %354 = tpu.matmul %352, %353, %cst_220 {dimension_numbers = #tpu.dot_dimension_numbers<[1], [0], [0], [1], [0, 0, 1, 1], [], []>} : vector<8x64xbf16>, vector<64x256xbf16>, vector<8x256xf32> -> vector<8x256xf32>
    %c5 = arith.constant 5 : index
    %c0_221 = arith.constant 0 : index
    %355 = vector.load %arg5[%c5, %c0_221] : memref<8x256xf32, #tpu.memory_space<vmem>>, vector<1x256xf32>
    %356 = vector.broadcast %355 : vector<1x256xf32> to vector<8x256xf32>
    %357 = arith.mulf %354, %356 : vector<8x256xf32>
    %358 = arith.addf %299, %357 : vector<8x256xf32>
    %c48_222 = arith.constant 48 : index
    %c0_223 = arith.constant 0 : index
    %359 = vector.load %arg4[%c48_222, %c0_223] : memref<64x256xi32, #tpu.memory_space<vmem>>, vector<8x256xi32>
    %c0_i32_224 = arith.constant 0 : i32
    %360 = vector.broadcast %c0_i32_224 : i32 to vector<8x256xi32>
    %361 = arith.shrsi %359, %360 : vector<8x256xi32>
    %c15_i32_225 = arith.constant 15 : i32
    %362 = vector.broadcast %c15_i32_225 : i32 to vector<8x256xi32>
    %363 = arith.andi %361, %362 : vector<8x256xi32>
    %364 = arith.sitofp %363 : vector<8x256xi32> to vector<8x256xbf16>
    %c0_226 = arith.constant 0 : index
    %c0_227 = arith.constant 0 : index
    %365 = vector.load %arg11[%c0_226, %c0_227] : memref<128x256xbf16, #tpu.memory_space<vmem>>, vector<8x256xbf16>
    tpu.vector_store %arg11[%c0_226, %c0_227], %364 {strides = array<i32>} : memref<128x256xbf16, #tpu.memory_space<vmem>>, vector<8x256xbf16>,
    %c4_i32_228 = arith.constant 4 : i32
    %366 = vector.broadcast %c4_i32_228 : i32 to vector<8x256xi32>
    %367 = arith.shrsi %359, %366 : vector<8x256xi32>
    %c15_i32_229 = arith.constant 15 : i32
    %368 = vector.broadcast %c15_i32_229 : i32 to vector<8x256xi32>
    %369 = arith.andi %367, %368 : vector<8x256xi32>
    %370 = arith.sitofp %369 : vector<8x256xi32> to vector<8x256xbf16>
    %c8_230 = arith.constant 8 : index
    %c0_231 = arith.constant 0 : index
    %371 = vector.load %arg11[%c8_230, %c0_231] : memref<128x256xbf16, #tpu.memory_space<vmem>>, vector<8x256xbf16>
    tpu.vector_store %arg11[%c8_230, %c0_231], %370 {strides = array<i32>} : memref<128x256xbf16, #tpu.memory_space<vmem>>, vector<8x256xbf16>,
    %c8_i32_232 = arith.constant 8 : i32
    %372 = vector.broadcast %c8_i32_232 : i32 to vector<8x256xi32>
    %373 = arith.shrsi %359, %372 : vector<8x256xi32>
    %c15_i32_233 = arith.constant 15 : i32
    %374 = vector.broadcast %c15_i32_233 : i32 to vector<8x256xi32>
    %375 = arith.andi %373, %374 : vector<8x256xi32>
    %376 = arith.sitofp %375 : vector<8x256xi32> to vector<8x256xbf16>
    %c16_234 = arith.constant 16 : index
    %c0_235 = arith.constant 0 : index
    %377 = vector.load %arg11[%c16_234, %c0_235] : memref<128x256xbf16, #tpu.memory_space<vmem>>, vector<8x256xbf16>
    tpu.vector_store %arg11[%c16_234, %c0_235], %376 {strides = array<i32>} : memref<128x256xbf16, #tpu.memory_space<vmem>>, vector<8x256xbf16>,
    %c12_i32_236 = arith.constant 12 : i32
    %378 = vector.broadcast %c12_i32_236 : i32 to vector<8x256xi32>
    %379 = arith.shrsi %359, %378 : vector<8x256xi32>
    %c15_i32_237 = arith.constant 15 : i32
    %380 = vector.broadcast %c15_i32_237 : i32 to vector<8x256xi32>
    %381 = arith.andi %379, %380 : vector<8x256xi32>
    %382 = arith.sitofp %381 : vector<8x256xi32> to vector<8x256xbf16>
    %c24_238 = arith.constant 24 : index
    %c0_239 = arith.constant 0 : index
    %383 = vector.load %arg11[%c24_238, %c0_239] : memref<128x256xbf16, #tpu.memory_space<vmem>>, vector<8x256xbf16>
    tpu.vector_store %arg11[%c24_238, %c0_239], %382 {strides = array<i32>} : memref<128x256xbf16, #tpu.memory_space<vmem>>, vector<8x256xbf16>,
    %c16_i32_240 = arith.constant 16 : i32
    %384 = vector.broadcast %c16_i32_240 : i32 to vector<8x256xi32>
    %385 = arith.shrsi %359, %384 : vector<8x256xi32>
    %c15_i32_241 = arith.constant 15 : i32
    %386 = vector.broadcast %c15_i32_241 : i32 to vector<8x256xi32>
    %387 = arith.andi %385, %386 : vector<8x256xi32>
    %388 = arith.sitofp %387 : vector<8x256xi32> to vector<8x256xbf16>
    %c32_242 = arith.constant 32 : index
    %c0_243 = arith.constant 0 : index
    %389 = vector.load %arg11[%c32_242, %c0_243] : memref<128x256xbf16, #tpu.memory_space<vmem>>, vector<8x256xbf16>
    tpu.vector_store %arg11[%c32_242, %c0_243], %388 {strides = array<i32>} : memref<128x256xbf16, #tpu.memory_space<vmem>>, vector<8x256xbf16>,
    %c20_i32_244 = arith.constant 20 : i32
    %390 = vector.broadcast %c20_i32_244 : i32 to vector<8x256xi32>
    %391 = arith.shrsi %359, %390 : vector<8x256xi32>
    %c15_i32_245 = arith.constant 15 : i32
    %392 = vector.broadcast %c15_i32_245 : i32 to vector<8x256xi32>
    %393 = arith.andi %391, %392 : vector<8x256xi32>
    %394 = arith.sitofp %393 : vector<8x256xi32> to vector<8x256xbf16>
    %c40_246 = arith.constant 40 : index
    %c0_247 = arith.constant 0 : index
    %395 = vector.load %arg11[%c40_246, %c0_247] : memref<128x256xbf16, #tpu.memory_space<vmem>>, vector<8x256xbf16>
    tpu.vector_store %arg11[%c40_246, %c0_247], %394 {strides = array<i32>} : memref<128x256xbf16, #tpu.memory_space<vmem>>, vector<8x256xbf16>,
    %c24_i32_248 = arith.constant 24 : i32
    %396 = vector.broadcast %c24_i32_248 : i32 to vector<8x256xi32>
    %397 = arith.shrsi %359, %396 : vector<8x256xi32>
    %c15_i32_249 = arith.constant 15 : i32
    %398 = vector.broadcast %c15_i32_249 : i32 to vector<8x256xi32>
    %399 = arith.andi %397, %398 : vector<8x256xi32>
    %400 = arith.sitofp %399 : vector<8x256xi32> to vector<8x256xbf16>
    %c48_250 = arith.constant 48 : index
    %c0_251 = arith.constant 0 : index
    %401 = vector.load %arg11[%c48_250, %c0_251] : memref<128x256xbf16, #tpu.memory_space<vmem>>, vector<8x256xbf16>
    tpu.vector_store %arg11[%c48_250, %c0_251], %400 {strides = array<i32>} : memref<128x256xbf16, #tpu.memory_space<vmem>>, vector<8x256xbf16>,
    %c28_i32_252 = arith.constant 28 : i32
    %402 = vector.broadcast %c28_i32_252 : i32 to vector<8x256xi32>
    %403 = arith.shrsi %359, %402 : vector<8x256xi32>
    %c15_i32_253 = arith.constant 15 : i32
    %404 = vector.broadcast %c15_i32_253 : i32 to vector<8x256xi32>
    %405 = arith.andi %403, %404 : vector<8x256xi32>
    %406 = arith.sitofp %405 : vector<8x256xi32> to vector<8x256xbf16>
    %c56_254 = arith.constant 56 : index
    %c0_255 = arith.constant 0 : index
    %407 = vector.load %arg11[%c56_254, %c0_255] : memref<128x256xbf16, #tpu.memory_space<vmem>>, vector<8x256xbf16>
    tpu.vector_store %arg11[%c56_254, %c0_255], %406 {strides = array<i32>} : memref<128x256xbf16, #tpu.memory_space<vmem>>, vector<8x256xbf16>,
    %c6_i32 = arith.constant 6 : i32
    %408 = arith.addi %3, %c6_i32 : i32
    %409 = arith.index_cast %408 : i32 to index
    %c0_256 = arith.constant 0 : index
    %c0_257 = arith.constant 0 : index
    %410 = vector.load %arg3[%409, %c0_256, %c0_257] : memref<16x8x64xbf16, #tpu.memory_space<vmem>>, vector<1x8x64xbf16>
    %411 = vector.shape_cast %410 : vector<1x8x64xbf16> to vector<8x64xbf16>
    %c0_258 = arith.constant 0 : index
    %c0_259 = arith.constant 0 : index
    %412 = vector.load %arg11[%c0_258, %c0_259] : memref<128x256xbf16, #tpu.memory_space<vmem>>, vector<64x256xbf16>
    %cst_260 = arith.constant dense<0.000000e+00> : vector<8x256xf32>
    %413 = tpu.matmul %411, %412, %cst_260 {dimension_numbers = #tpu.dot_dimension_numbers<[1], [0], [0], [1], [0, 0, 1, 1], [], []>} : vector<8x64xbf16>, vector<64x256xbf16>, vector<8x256xf32> -> vector<8x256xf32>
    %c6 = arith.constant 6 : index
    %c0_261 = arith.constant 0 : index
    %414 = vector.load %arg5[%c6, %c0_261] : memref<8x256xf32, #tpu.memory_space<vmem>>, vector<1x256xf32>
    %415 = vector.broadcast %414 : vector<1x256xf32> to vector<8x256xf32>
    %416 = arith.mulf %413, %415 : vector<8x256xf32>
    %417 = arith.addf %358, %416 : vector<8x256xf32>
    %c56_262 = arith.constant 56 : index
    %c0_263 = arith.constant 0 : index
    %418 = vector.load %arg4[%c56_262, %c0_263] : memref<64x256xi32, #tpu.memory_space<vmem>>, vector<8x256xi32>
    %c0_i32_264 = arith.constant 0 : i32
    %419 = vector.broadcast %c0_i32_264 : i32 to vector<8x256xi32>
    %420 = arith.shrsi %418, %419 : vector<8x256xi32>
    %c15_i32_265 = arith.constant 15 : i32
    %421 = vector.broadcast %c15_i32_265 : i32 to vector<8x256xi32>
    %422 = arith.andi %420, %421 : vector<8x256xi32>
    %423 = arith.sitofp %422 : vector<8x256xi32> to vector<8x256xbf16>
    %c64_266 = arith.constant 64 : index
    %c0_267 = arith.constant 0 : index
    %424 = vector.load %arg11[%c64_266, %c0_267] : memref<128x256xbf16, #tpu.memory_space<vmem>>, vector<8x256xbf16>
    tpu.vector_store %arg11[%c64_266, %c0_267], %423 {strides = array<i32>} : memref<128x256xbf16, #tpu.memory_space<vmem>>, vector<8x256xbf16>,
    %c4_i32_268 = arith.constant 4 : i32
    %425 = vector.broadcast %c4_i32_268 : i32 to vector<8x256xi32>
    %426 = arith.shrsi %418, %425 : vector<8x256xi32>
    %c15_i32_269 = arith.constant 15 : i32
    %427 = vector.broadcast %c15_i32_269 : i32 to vector<8x256xi32>
    %428 = arith.andi %426, %427 : vector<8x256xi32>
    %429 = arith.sitofp %428 : vector<8x256xi32> to vector<8x256xbf16>
    %c72_270 = arith.constant 72 : index
    %c0_271 = arith.constant 0 : index
    %430 = vector.load %arg11[%c72_270, %c0_271] : memref<128x256xbf16, #tpu.memory_space<vmem>>, vector<8x256xbf16>
    tpu.vector_store %arg11[%c72_270, %c0_271], %429 {strides = array<i32>} : memref<128x256xbf16, #tpu.memory_space<vmem>>, vector<8x256xbf16>,
    %c8_i32_272 = arith.constant 8 : i32
    %431 = vector.broadcast %c8_i32_272 : i32 to vector<8x256xi32>
    %432 = arith.shrsi %418, %431 : vector<8x256xi32>
    %c15_i32_273 = arith.constant 15 : i32
    %433 = vector.broadcast %c15_i32_273 : i32 to vector<8x256xi32>
    %434 = arith.andi %432, %433 : vector<8x256xi32>
    %435 = arith.sitofp %434 : vector<8x256xi32> to vector<8x256xbf16>
    %c80_274 = arith.constant 80 : index
    %c0_275 = arith.constant 0 : index
    %436 = vector.load %arg11[%c80_274, %c0_275] : memref<128x256xbf16, #tpu.memory_space<vmem>>, vector<8x256xbf16>
    tpu.vector_store %arg11[%c80_274, %c0_275], %435 {strides = array<i32>} : memref<128x256xbf16, #tpu.memory_space<vmem>>, vector<8x256xbf16>,
    %c12_i32_276 = arith.constant 12 : i32
    %437 = vector.broadcast %c12_i32_276 : i32 to vector<8x256xi32>
    %438 = arith.shrsi %418, %437 : vector<8x256xi32>
    %c15_i32_277 = arith.constant 15 : i32
    %439 = vector.broadcast %c15_i32_277 : i32 to vector<8x256xi32>
    %440 = arith.andi %438, %439 : vector<8x256xi32>
    %441 = arith.sitofp %440 : vector<8x256xi32> to vector<8x256xbf16>
    %c88_278 = arith.constant 88 : index
    %c0_279 = arith.constant 0 : index
    %442 = vector.load %arg11[%c88_278, %c0_279] : memref<128x256xbf16, #tpu.memory_space<vmem>>, vector<8x256xbf16>
    tpu.vector_store %arg11[%c88_278, %c0_279], %441 {strides = array<i32>} : memref<128x256xbf16, #tpu.memory_space<vmem>>, vector<8x256xbf16>,
    %c16_i32_280 = arith.constant 16 : i32
    %443 = vector.broadcast %c16_i32_280 : i32 to vector<8x256xi32>
    %444 = arith.shrsi %418, %443 : vector<8x256xi32>
    %c15_i32_281 = arith.constant 15 : i32
    %445 = vector.broadcast %c15_i32_281 : i32 to vector<8x256xi32>
    %446 = arith.andi %444, %445 : vector<8x256xi32>
    %447 = arith.sitofp %446 : vector<8x256xi32> to vector<8x256xbf16>
    %c96_282 = arith.constant 96 : index
    %c0_283 = arith.constant 0 : index
    %448 = vector.load %arg11[%c96_282, %c0_283] : memref<128x256xbf16, #tpu.memory_space<vmem>>, vector<8x256xbf16>
    tpu.vector_store %arg11[%c96_282, %c0_283], %447 {strides = array<i32>} : memref<128x256xbf16, #tpu.memory_space<vmem>>, vector<8x256xbf16>,
    %c20_i32_284 = arith.constant 20 : i32
    %449 = vector.broadcast %c20_i32_284 : i32 to vector<8x256xi32>
    %450 = arith.shrsi %418, %449 : vector<8x256xi32>
    %c15_i32_285 = arith.constant 15 : i32
    %451 = vector.broadcast %c15_i32_285 : i32 to vector<8x256xi32>
    %452 = arith.andi %450, %451 : vector<8x256xi32>
    %453 = arith.sitofp %452 : vector<8x256xi32> to vector<8x256xbf16>
    %c104_286 = arith.constant 104 : index
    %c0_287 = arith.constant 0 : index
    %454 = vector.load %arg11[%c104_286, %c0_287] : memref<128x256xbf16, #tpu.memory_space<vmem>>, vector<8x256xbf16>
    tpu.vector_store %arg11[%c104_286, %c0_287], %453 {strides = array<i32>} : memref<128x256xbf16, #tpu.memory_space<vmem>>, vector<8x256xbf16>,
    %c24_i32_288 = arith.constant 24 : i32
    %455 = vector.broadcast %c24_i32_288 : i32 to vector<8x256xi32>
    %456 = arith.shrsi %418, %455 : vector<8x256xi32>
    %c15_i32_289 = arith.constant 15 : i32
    %457 = vector.broadcast %c15_i32_289 : i32 to vector<8x256xi32>
    %458 = arith.andi %456, %457 : vector<8x256xi32>
    %459 = arith.sitofp %458 : vector<8x256xi32> to vector<8x256xbf16>
    %c112_290 = arith.constant 112 : index
    %c0_291 = arith.constant 0 : index
    %460 = vector.load %arg11[%c112_290, %c0_291] : memref<128x256xbf16, #tpu.memory_space<vmem>>, vector<8x256xbf16>
    tpu.vector_store %arg11[%c112_290, %c0_291], %459 {strides = array<i32>} : memref<128x256xbf16, #tpu.memory_space<vmem>>, vector<8x256xbf16>,
    %c28_i32_292 = arith.constant 28 : i32
    %461 = vector.broadcast %c28_i32_292 : i32 to vector<8x256xi32>
    %462 = arith.shrsi %418, %461 : vector<8x256xi32>
    %c15_i32_293 = arith.constant 15 : i32
    %463 = vector.broadcast %c15_i32_293 : i32 to vector<8x256xi32>
    %464 = arith.andi %462, %463 : vector<8x256xi32>
    %465 = arith.sitofp %464 : vector<8x256xi32> to vector<8x256xbf16>
    %c120_294 = arith.constant 120 : index
    %c0_295 = arith.constant 0 : index
    %466 = vector.load %arg11[%c120_294, %c0_295] : memref<128x256xbf16, #tpu.memory_space<vmem>>, vector<8x256xbf16>
    tpu.vector_store %arg11[%c120_294, %c0_295], %465 {strides = array<i32>} : memref<128x256xbf16, #tpu.memory_space<vmem>>, vector<8x256xbf16>,
    %c7_i32 = arith.constant 7 : i32
    %467 = arith.addi %3, %c7_i32 : i32
    %468 = arith.index_cast %467 : i32 to index
    %c0_296 = arith.constant 0 : index
    %c0_297 = arith.constant 0 : index
    %469 = vector.load %arg3[%468, %c0_296, %c0_297] : memref<16x8x64xbf16, #tpu.memory_space<vmem>>, vector<1x8x64xbf16>
    %470 = vector.shape_cast %469 : vector<1x8x64xbf16> to vector<8x64xbf16>
    %c64_298 = arith.constant 64 : index
    %c0_299 = arith.constant 0 : index
    %471 = vector.load %arg11[%c64_298, %c0_299] : memref<128x256xbf16, #tpu.memory_space<vmem>>, vector<64x256xbf16>
    %cst_300 = arith.constant dense<0.000000e+00> : vector<8x256xf32>
    %472 = tpu.matmul %470, %471, %cst_300 {dimension_numbers = #tpu.dot_dimension_numbers<[1], [0], [0], [1], [0, 0, 1, 1], [], []>} : vector<8x64xbf16>, vector<64x256xbf16>, vector<8x256xf32> -> vector<8x256xf32>
    %c7 = arith.constant 7 : index
    %c0_301 = arith.constant 0 : index
    %473 = vector.load %arg5[%c7, %c0_301] : memref<8x256xf32, #tpu.memory_space<vmem>>, vector<1x256xf32>
    %474 = vector.broadcast %473 : vector<1x256xf32> to vector<8x256xf32>
    %475 = arith.mulf %472, %474 : vector<8x256xf32>
    %476 = arith.addf %417, %475 : vector<8x256xf32>
    %c0_302 = arith.constant 0 : index
    %c0_303 = arith.constant 0 : index
    %477 = vector.load %arg10[%c0_302, %c0_303] : memref<8x256xf32, #tpu.memory_space<vmem>>, vector<8x256xf32>
    tpu.vector_store %arg10[%c0_302, %c0_303], %476 {strides = array<i32>} : memref<8x256xf32, #tpu.memory_space<vmem>>, vector<8x256xf32>,
    %c1_i32_304 = arith.constant 1 : i32
    %478 = arith.cmpi eq, %arg2, %c1_i32_304 : i32
    %479 = arith.extui %478 : i1 to i32
    %c0_i32_305 = arith.constant 0 : i32
    %480 = arith.cmpi ne, %479, %c0_i32_305 : i32
    scf.if %480 {
      %c0_306 = arith.constant 0 : index
      %c0_307 = arith.constant 0 : index
      %481 = vector.load %arg6[%c0_306, %c0_307] : memref<8x16xf32, #tpu.memory_space<vmem>>, vector<8x16xf32>
      %c0_308 = arith.constant 0 : index
      %c0_309 = arith.constant 0 : index
      %482 = vector.load %arg7[%c0_308, %c0_309] : memref<16x256xf32, #tpu.memory_space<vmem>>, vector<16x256xf32>
      %cst_310 = arith.constant dense<0.000000e+00> : vector<8x256xf32>
      %483 = tpu.matmul %481, %482, %cst_310 {dimension_numbers = #tpu.dot_dimension_numbers<[1], [0], [0], [1], [0, 0, 1, 1], [], []>} : vector<8x16xf32>, vector<16x256xf32>, vector<8x256xf32> -> vector<8x256xf32>
      %c0_311 = arith.constant 0 : index
      %c0_312 = arith.constant 0 : index
      %484 = vector.load %arg10[%c0_311, %c0_312] : memref<8x256xf32, #tpu.memory_space<vmem>>, vector<8x256xf32>
      %485 = arith.subf %484, %483 : vector<8x256xf32>
      %486 = arith.truncf %485 : vector<8x256xf32> to vector<8x256xbf16>
      %c0_313 = arith.constant 0 : index
      %c0_314 = arith.constant 0 : index
      %487 = vector.load %arg9[%c0_313, %c0_314] : memref<8x256xbf16, #tpu.memory_space<vmem>>, vector<8x256xbf16>
      tpu.vector_store %arg9[%c0_313, %c0_314], %486 {strides = array<i32>} : memref<8x256xbf16, #tpu.memory_space<vmem>>, vector<8x256xbf16>,
    } else {
    }
    return
  }
  func.func @transform_0(%arg0: i32, %arg1: i32, %arg2: i32) -> (i32, i32, i32) {
    %c0_i32 = arith.constant 0 : i32
    %c0_i32_0 = arith.constant 0 : i32
    %c0_i32_1 = arith.constant 0 : i32
    return %c0_i32, %arg0, %c0_i32_0 : i32, i32, i32
  }
  func.func @transform_1(%arg0: i32, %arg1: i32, %arg2: i32) -> (i32, i32) {
    %c0_i32 = arith.constant 0 : i32
    return %arg2, %arg1 : i32, i32
  }
  func.func @transform_2(%arg0: i32, %arg1: i32, %arg2: i32) -> (i32, i32) {
    %c0_i32 = arith.constant 0 : i32
    return %arg2, %arg1 : i32, i32
  }
  func.func @transform_3(%arg0: i32, %arg1: i32, %arg2: i32) -> (i32, i32) {
    %c0_i32 = arith.constant 0 : i32
    %c0_i32_0 = arith.constant 0 : i32
    return %arg0, %c0_i32 : i32, i32
  }
  func.func @transform_4(%arg0: i32, %arg1: i32, %arg2: i32) -> (i32, i32) {
    %c0_i32 = arith.constant 0 : i32
    %c0_i32_0 = arith.constant 0 : i32
    return %c0_i32, %arg1 : i32, i32
  }
  func.func @transform_5(%arg0: i32, %arg1: i32, %arg2: i32) -> (i32, i32) {
    %c0_i32 = arith.constant 0 : i32
    %c0_i32_0 = arith.constant 0 : i32
    return %c0_i32, %arg1 : i32, i32
  }
  func.func @transform_6(%arg0: i32, %arg1: i32, %arg2: i32) -> (i32, i32) {
    %c0_i32 = arith.constant 0 : i32
    return %arg0, %arg1 : i32, i32
  }
}

</mosaic_0001>

<bundles_post_ra>
// kernel: tpu_custom_call.1
= control target key start
LH: loop header
LB: loop body
LE: loop exit
PB: predicated region body
PF: predicated region fallthrough
CT: control target
= control target key end

     0   :  { %s3380_s0 = inlined_call_operand.hbm [shape: bf16[16,8,64], index: 0, kind: input, shape index: {}]   ;;  %s3381_s1 = inlined_call_operand.hbm [shape: s32[128,512], index: 1, kind: input, shape index: {}]   ;;  %s3382_s2 = inlined_call_operand.hbm [shape: f32[16,512], index: 2, kind: input, shape index: {}]   ;;  %s3383_s3 = inlined_call_operand.vmem [shape: f32[8,16], index: 3, kind: input, shape index: {}]   ;;  %s3384_s4 = inlined_call_operand.hbm [shape: f32[16,512], index: 4, kind: input, shape index: {}]   ;;  %s3385_s5 = inlined_call_operand.vmem [shape: f32[1,512], index: 5, kind: input, shape index: {}]   ;;  %s3386_s6 = inlined_call_operand.hbm [shape: bf16[8,512], index: 6, kind: output, shape index: {}]  }
   0x1   :  { %3408 = sst [smem:[#allocation26_spill]] %s3381_s1 }
   0x2   :  { %3409 = sst [smem:[#allocation27_spill]] %s3383_s3 }
   0x3   :  { %3410 = sst [smem:[#allocation28_spill]] %s3385_s5 }
   0x4   :  { %3411 = sst [smem:[#allocation29_spill]] %s3386_s6 }
   0x5   :  { %11 = vsyncpa [#allocation5], 0 }
   0x6   :  { %12 = vsyncpa [#allocation8], 0 }
   0x7   :  { %14 = vsyncpa [#allocation8 + $0x1], 0 }
   0x8   :  { %15 = vsyncpa [#allocation11], 0 }
   0x9   :  { %17 = vsyncpa [#allocation11 + $0x1], 0 }
   0xa   :  { %18 = vsyncpa [#allocation6], 0 }
   0xb   :  { %20 = vsyncpa [#allocation6 + $0x1], 0  ;;  %s2726_s21 = smov 0   ;;  %s2728_s22 = smov 0  }
   0xc   :  { %s2730_s23 = smov 0   ;;  %s2732_s24 = smov 0  }
   0xd   :  { %s2734_s25 = smov 0   ;;  %s2736_s26 = smov 0  }
   0xe   :  { %s2738_s27 = smov 0   ;;  %s2740_s28 = smov 0  }
   0xf   :  { %s2742_s29 = smov 0   ;;  %s2744_s30 = smov 0  }
  0x10   :  { %s2746_s7 = smov 0  }
  0x11 LB: > { %3412 = sst [smem:[#allocation17_spill]] %s2637_s21  ;;  %s38_s8 = sadd.s32 1, %s2669_s29  ;;  %s2677_s7 = sphi %s2746_s7, %s26_s7   ;;  %s2673_s30 = sphi %s2744_s30, %s3467_s30   ;;  %s2669_s29 = sphi %s2742_s29, %s3458_s29   ;;  %s2665_s28 = sphi %s2740_s28, %s3466_s28   ;;  %s2661_s27 = sphi %s2738_s27, %s3457_s27   ;;  %s2657_s26 = sphi %s2736_s26, %s3465_s26   ;;  %s2653_s25 = sphi %s2734_s25, %s3464_s25   ;;  %s2649_s24 = sphi %s2732_s24, %s3463_s24   ;;  %s2645_s23 = sphi %s2730_s23, %s3462_s23   ;;  %s2641_s22 = sphi %s2728_s22, %s3461_s22   ;;  %s2637_s21 = sphi %s2726_s21, %s3460_s21  }
  0x12   : > { %3413 = sst [smem:[#allocation18_spill]] %s2661_s27  ;;  %p39_p0 = scmp.ge.s32.totalorder %s38_s8, 2 }
  0x13   : > { %3414 = sst [smem:[#allocation19_spill]] %s2665_s28  ;;  %s41_s9 = sadd.s32 1, %s2673_s30 }
  0x14   : > { %3415 = sst [smem:[#allocation20_spill]] %s2669_s29  ;;  %p87_p1 = scmp.ne.s32.totalorder %s2657_s26, %s2653_s25 }
  0x15   : > { %p3401_p2 = scmp.eq.s32.totalorder %s2677_s7, 0  ;;  %s3469_s8 = smov (%p39_p0, %s38_s8), 0 }
  0x16   : > { %3416 = sst [smem:[#allocation21_spill]] %s3469_s8  ;;  %s3471_s9 = smov (!%p39_p0, %s41_s9), %s2673_s30 }
  0x17   : > { %s75_s10 = ssub.s32 %s2669_s29, %s3469_s8  ;;  %s80_s11 = sadd.s32 1, %s2657_s26 }
  0x18   : > { %p43_p3 = scmp.ge.s32.totalorder %s3471_s9, 2  ;;  %p2794_p4 = por %p3401_p2, %p87_p1 }
  0x19   : > { %s273_s13 = sand.u32 1, %s2677_s7   ;;  %p3391_p5 = scmp.lt.s32.totalorder %s2677_s7, 4 }
  0x1a   : > { %s3473_s9 = smov (%p43_p3, %s3471_s9), 0  ;;  %s275_s14 = sand.u32 1, %s2657_s26  }
  0x1b   : > { %3418 = sst [smem:[#allocation22_spill]] %s3473_s9  ;;  %s2805_s15 = ssub.s32 %s2673_s30, %s3473_s9 }
  0x1c   : > { %s2201_s16 = sshll.u32 %s275_s14, 7  ;;  %s77_s17 = sor.u32 %s2805_s15, %s75_s10 }
  0x1d   : > { %p78_p6 = scmp.eq.s32.totalorder %s77_s17, 0  ;;  %s2203_s18 = sshll.u32 %s2673_s30, 1 }
  0x1e   : > { %s2283_s19 = sshll.u32 %s2669_s29, 5  ;;  %s277_s6 = scalar_lea.vmem [#allocation7], %s2201_s16 }
  0x1f   : > { %s2813_s20 = scalar_select %p78_p6, %s2657_s26, %s80_s11  }
  0x20   : > { %s284_s8 = sadd.s32 %s2283_s19, %s2203_s18  ;;  %s287_s3 = sshll.u32 %s277_s6, 4  ;;  %s2817_s3 = int_to_ptr.vmem [resolvable:$true] %s287_s3 }
  0x21   : > { %3419 = sst [smem:[#allocation23_spill]] %s2813_s20  ;;  %s2205_s27 = sshll.u32 %s284_s8, 7 }
  0x22   : > { %s3420_s1 = sld [smem:[#allocation26_spill]]  ;;  %p2828_p7 = pnand %p3391_p5, %p2794_p4 }
  0x23   : > { %s2832_s6 = scalar_lea.sflag [#allocation8], %s273_s13 }
  0x24   : > { %s3421_s10 = scalar_select %p2828_p7, 1, 0 }
  0x25   : > { %p3402_p9 = pneg %p2828_p7 }
  0x28   : > { %s2822_s9 = scalar_lea.hbm %s3420_s1, %s2205_s27  ;;  %s2434_s28 = scalar_lea.hbm %s3420_s1, 8192 }
  0x29   : > { %s2429_s8 = scalar_lea.hbm %s2822_s9, 2048  ;;  %p2435_p12 = scmp.lt.u32.totalorder %s2822_s9, %s3420_s1 }
  0x2a   : > { %p2430_p8 = scmp.ne.s32.totalorder %s2822_s9, %s2429_s8  ;;  %p2436_p13 = scmp.lt.u32.totalorder %s2434_s28, %s2429_s8 }
  0x2b   : > { %p2438_p1 = scmp.lt.u32.totalorder %s2429_s8, %s2822_s9 }
  0x2c   : > { %p2432_p10 = pnand %p3402_p9, %p2430_p8  ;;  %p2437_p0 = por %p2436_p13, %p2435_p12 }
  0x2e   : > { %p2433_p11 = pneg %p2432_p10  ;;  %p2439_p3 = por %p2438_p1, %p2437_p0 }
  0x30   : > { %p2440_p4 = pnand %p2439_p3, %p2433_p11 }
  0x32   : > { %2443 = shalt.err (!%p2440_p4)
}
  0x33   : > { %s2444_s13 = scalar_lea.vmem %s2817_s3, 2048  ;;  %s2679_s16 = smov [#allocation7]  }
  0x34   : > { %p2445_p6 = scmp.ne.s32.totalorder %s2817_s3, %s2444_s13  ;;  %s2449_s17 = sshll.u32 %s2679_s16, 4  ;;  %s2450_s17 = int_to_ptr.vmem [resolvable:$false] %s2449_s17 }
  0x35   : > { %s2451_s19 = scalar_lea.vmem %s2450_s17, 4096  ;;  %p2452_p5 = scmp.lt.s32.totalorder %s2817_s3, %s2450_s17 }
  0x36   : > { %p2447_p8 = pnand %p2445_p6, %p3402_p9  ;;  %p2453_p12 = scmp.lt.s32.totalorder %s2451_s19, %s2444_s13 }
  0x38   : > { %p2448_p10 = pneg %p2447_p8  ;;  %p2454_p13 = por %p2453_p12, %p2452_p5 }
  0x3a   : > { %p2455_p0 = pnand %p2454_p13, %p2448_p10 }
  0x3c   : > { %2458 = shalt.err (!%p2455_p0)
}
  0x3d   : > { %s3392_s8 = smov 512   ;;  %s3393_s5 = smov 256  }
  0x3e   : > { %s3394_s27 = smov 16   ;;  %s2864_s28 = sadd.s32 4294967295, %s2677_s7  }
  0x3f   : > { %2318 = dma.hbm_to_vmem [thread:$0]  (!%p2828_p7), %s2822_s9, 2048, %s2817_s3, %s2832_s6, %s3392_s8, %s3393_s5, %s3394_s27  }
  0x40   : > { %s2196_s11 = sadd.s32 4294967294, %s2677_s7   ;;  %p93_p5 = scmp.ne.s32.totalorder %s2653_s25, %s2649_s24 }
  0x41   : > { %p3400_p11 = scmp.eq.s32.totalorder %s2864_s28, 0  ;;  %p173_p3 = scmp.ne.s32.totalorder %s2641_s22, %s2637_s21 }
  0x42   : > { %p231_p6 = scmp.eq.s32.totalorder %s2196_s11, 3  ;;  %p2197_p10 = scmp.ge.s32.totalorder %s2677_s7, 1 }
  0x43   : > { %p2875_p4 = por %p3400_p11, %p93_p5  ;;  %p2881_p8 = por %p173_p3, %p3400_p11 }
  0x44   : > { %p2886_p12 = por %p231_p6, %p173_p3  ;;  %p238_p13 = scmp.lt.s32.totalorder %s2677_s7, 5 }
  0x45   : > { %s3422_s12 = scalar_select %p2875_p4, 1, 0 }
  0x46   : > { %s3423_s3 = scalar_select %p2881_p8, 1, 0 }
  0x47   : > { %s3425_s24 = scalar_select %p2886_p12, 1, 0 }
  0x48   : > { %3424 = sst [smem:[#allocation24_spill]] %s3423_s3  ;;  %p2891_p0 = pnand %p2197_p10, %p238_p13 }
  0x49   : > { %3426 = sst [smem:[#allocation25_spill]] %s3425_s24  ;;  %s2683_s13 = smov [#allocation4]  }
  0x4a   : > { %s3427_s9 = scalar_select %p2891_p0, 1, 0 }
  0x4b   : > { %s252_s16 = sshll.u32 %s2683_s13, 4  ;;  %p2311_p5 = pneg %p2891_p0  ;;  %s2895_s16 = int_to_ptr.vmem [resolvable:$true] %s252_s16 }
  0x4c   : > { %s2206_s17 = sshll.u32 %s275_s14, 4  ;;  %s2208_s19 = sshll.u32 %s2669_s29, 2 }
  0x4d   : > { %p2904_p3 = pnand %p2311_p5, %p3400_p11  ;;  %s307_s8 = sadd.s32 %s2208_s19, %s2203_s18 }
  0x4e   : > { %s301_s5 = scalar_lea.vmem [#allocation9], %s2206_s17  ;;  %s2209_s1 = sshll.u32 %s307_s8, 7 }
  0x4f   : > { %s311_s27 = sshll.u32 %s301_s5, 4  ;;  %s2459_s24 = scalar_lea.hbm %s3380_s0, 1024  ;;  %s312_s27 = int_to_ptr.vmem [resolvable:$true] %s311_s27 }
  0x50   : > { %p2460_p6 = scmp.ne.s32.totalorder %s3380_s0, %s2459_s24  ;;  %p2461_p10 = pneg %p2904_p3 }
  0x51   : > { %p2466_p11 = scmp.lt.u32.totalorder %s2459_s24, %s3380_s0 }
  0x52   : > { %p2462_p13 = pnand %p2461_p10, %p2460_p6 }
  0x54   : > { %p2463_p5 = pneg %p2462_p13 }
  0x56   : > { %p2468_p2 = pnand %p2466_p11, %p2463_p5 }
  0x58   : > { %2471 = shalt.err (!%p2468_p2)
}
  0x59   : > { %s2472_s18 = scalar_lea.vmem %s2895_s16, 1024  ;;  %p2480_p8 = scmp.lt.s32.totalorder %s2895_s16, %s2895_s16 }
  0x5a   : > { %p2473_p1 = scmp.ne.s32.totalorder %s2895_s16, %s2472_s18  ;;  %p2481_p4 = scmp.lt.s32.totalorder %s2472_s18, %s2472_s18 }
  0x5c   : > { %p2475_p9 = pnand %p2473_p1, %p2461_p10  ;;  %p2482_p0 = por %p2481_p4, %p2480_p8 }
  0x5e   : > { %p2476_p12 = pneg %p2475_p9 }
  0x60   : > { %p2483_p7 = pnand %p2482_p0, %p2476_p12 }
  0x62   : > { %2486 = shalt.err (!%p2483_p7)
}
  0x63   : > { %s2684_s21 = smov 64   ;;  %s2685_s29 = smov 4  }
  0x64   : > { %2314 = dma.hbm_to_vmem [thread:$0]  (!%p2904_p3), %s3380_s0, 1024, %s2895_s16, [#allocation5], %s2684_s21, %s2684_s21, %s2685_s29  }
  0x65   : > { %s309_s24 = scalar_lea.hbm %s3382_s2, %s2209_s1  ;;  %p3429_p9 = scmp.ne.s32.totalorder %s3421_s10, 0 }
  0x66   : > { %s2487_s17 = scalar_lea.hbm %s309_s24, 256  ;;  %s2492_s14 = scalar_lea.hbm %s3382_s2, 1024 }
  0x67   : > { %p2488_p2 = scmp.ne.s32.totalorder %s309_s24, %s2487_s17  ;;  %p3430_p11 = pneg %p3429_p9 }
  0x68   : > { %p2493_p4 = scmp.lt.u32.totalorder %s309_s24, %s3382_s2  ;;  %p2494_p8 = scmp.lt.u32.totalorder %s2492_s14, %s2487_s17 }
  0x69   : > { %p2490_p7 = pnand %p2488_p2, %p3430_p11  ;;  %p2496_p0 = scmp.lt.u32.totalorder %s2487_s17, %s309_s24 }
  0x6a   : > { %p2495_p12 = por %p2494_p8, %p2493_p4 }
  0x6b   : > { %p2491_p1 = pneg %p2490_p7 }
  0x6c   : > { %p2497_p3 = por %p2496_p0, %p2495_p12 }
  0x6e   : > { %p2498_p6 = pnand %p2497_p3, %p2491_p1 }
  0x70   : > { %2501 = shalt.err (!%p2498_p6)
}
  0x71   : > { %s2502_s1 = scalar_lea.vmem %s312_s27, 256  ;;  %p3431_p13 = pmov %p3430_p11 }
  0x72   : > { %p2503_p10 = scmp.ne.s32.totalorder %s312_s27, %s2502_s1  ;;  %s2686_s16 = smov [#allocation9]  }
  0x73   : > { %s2507_s21 = sshll.u32 %s2686_s16, 4  ;;  %s2508_s21 = int_to_ptr.vmem [resolvable:$false] %s2507_s21 }
  0x74   : > { %p2505_p5 = pnand %p2503_p10, %p3431_p13  ;;  %s2509_s29 = scalar_lea.vmem %s2508_s21, 512 }
  0x75   : > { %p2510_p11 = scmp.lt.s32.totalorder %s312_s27, %s2508_s21  ;;  %p2511_p7 = scmp.lt.s32.totalorder %s2509_s29, %s2502_s1 }
  0x76   : > { %p2506_p2 = pneg %p2505_p5 }
  0x77   : > { %p2512_p4 = por %p2511_p7, %p2510_p11 }
  0x79   : > { %p2513_p8 = pnand %p2512_p4, %p2506_p2 }
  0x7b   : > { %2516 = shalt.err (!%p2513_p8)
}
  0x7c   : > { %2321 = dma.hbm_to_vmem [thread:$0]  (!%p3429_p9), %s309_s24, 256, %s312_s27, %s2832_s6  }
  0x7d   : > { %p225_p1 = scmp.eq.s32.totalorder %s2864_s28, 3  ;;  %s2284_s20 = sshll.u32 %s2673_s30, 8 }
  0x7e   : > { %s160_s8 = sadd.s32 1, %s2645_s23  ;;  %p167_p12 = scmp.ne.s32.totalorder %s2645_s23, %s2641_s22 }
  0x7f   : > { %p3432_p0 = scmp.eq.s32.totalorder %s2805_s15, 0  ;;  %p3433_p3 = scmp.eq.s32.totalorder %s2677_s7, 0 }
  0x80   : > { %p2961_p10 = por %p225_p1, %p167_p12  ;;  %s318_s3 = sand.u32 1, %s2645_s23  }
  0x81   : > { %s2957_s5 = scalar_select %p3432_p0, %s2645_s23, %s160_s8  }
  0x82   : > { %p169_p6 = por %p167_p12, %p3433_p3  ;;  %s2969_s13 = scalar_lea.hbm %s3384_s4, %s2284_s20 }
  0x83   : > { %s2210_s6 = sshll.u32 %s318_s3, 5  ;;  %p3435_p9 = scmp.lt.s32.totalorder %s2677_s7, 4 }
  0x84   : > { %s322_s27 = scalar_lea.vmem [#allocation10], %s2210_s6  ;;  %s2979_s14 = scalar_lea.sflag [#allocation11], %s318_s3 }
  0x85   : > { %p2973_p13 = pnand %p3435_p9, %p169_p6  ;;  %s329_s24 = sshll.u32 %s322_s27, 4  ;;  %s2977_s24 = int_to_ptr.vmem [resolvable:$true] %s329_s24 }
  0x86   : > { %s2517_s11 = scalar_lea.hbm %s2969_s13, 512  ;;  %s2522_s16 = scalar_lea.hbm %s3384_s4, 1024 }
  0x87   : > { %p2518_p5 = scmp.ne.s32.totalorder %s2969_s13, %s2517_s11  ;;  %p2519_p2 = pneg %p2973_p13 }
  0x88   : > { %p2523_p4 = scmp.lt.u32.totalorder %s2969_s13, %s3384_s4  ;;  %p2524_p8 = scmp.lt.u32.totalorder %s2522_s16, %s2517_s11 }
  0x89   : > { %p2520_p11 = pnand %p2519_p2, %p2518_p5  ;;  %p2526_p12 = scmp.lt.u32.totalorder %s2517_s11, %s2969_s13 }
  0x8a   : > { %p2525_p1 = por %p2524_p8, %p2523_p4 }
  0x8b   : > { %p2521_p7 = pneg %p2520_p11 }
  0x8c   : > { %p2527_p0 = por %p2526_p12, %p2525_p1 }
  0x8e   : > { %p2528_p3 = pnand %p2527_p0, %p2521_p7 }
  0x90   : > { %2531 = shalt.err (!%p2528_p3)
}
  0x91   : > { %s2532_s20 = scalar_lea.vmem %s2977_s24, 512  ;;  %s2687_s8 = smov [#allocation10]  }
  0x92   : > { %p2533_p6 = scmp.ne.s32.totalorder %s2977_s24, %s2532_s20  ;;  %s2537_s3 = sshll.u32 %s2687_s8, 4  ;;  %s2538_s3 = int_to_ptr.vmem [resolvable:$false] %s2537_s3 }
  0x93   : > { %s2539_s17 = scalar_lea.vmem %s2538_s3, 1024  ;;  %p2540_p11 = scmp.lt.s32.totalorder %s2977_s24, %s2538_s3 }
  0x94   : > { %p2535_p9 = pnand %p2533_p6, %p2519_p2  ;;  %p2541_p4 = scmp.lt.s32.totalorder %s2539_s17, %s2532_s20 }
  0x96   : > { %p2536_p5 = pneg %p2535_p9  ;;  %p2542_p8 = por %p2541_p4, %p2540_p11 }
  0x98   : > { %p2543_p1 = pnand %p2542_p8, %p2536_p5 }
  0x9a   : > { %2546 = shalt.err (!%p2543_p1)
}
  0x9b   : > { %s3437_s19 = smov 16   ;;  %s3438_s6 = smov 256  }
  0x9c   : > { %s3439_s27 = smov 512   ;;  %p3440_p2 = scmp.ne.s32.totalorder %s3427_s9, 0 }
  0x9d   : > { %2324 = dma.hbm_to_vmem [thread:$0]  (!%p2973_p13), %s2969_s13, 512, %s2977_s24, %s2979_s14, %s3439_s27, %s3438_s6, %s3437_s19  }
  0x9e   : > { %349 = sbr.rel (%p3440_p2) target bundleno = 779 (0x30b), region = 44  ;;  %p3441_p7 = scmp.eq.s32.totalorder (!%p3440_p2), %s2864_s28, 0 }
  0xa5   : > { %2620 = dma.done.wait (%p3441_p7), [#allocation5], 1024   ;;  %p3442_p12 = pmov %p3441_p7 }
  0xa6   : > { %s355_s15 = sand.u32 1, %s2864_s28   ;;  %s357_s11 = sand.u32 1, %s2653_s25  }
  0xa7   : > { %2622 = vsyncadd (%p3442_p12), [#allocation5], 4294966272  ;;  %s2215_s18 = sshll.u32 %s357_s11, 7  ;;  %s356_s1 = scalar_lea.sflag [#allocation8], %s355_s15 }
  0xa8   : > { %s3018_s16 = scalar_lea.vmem [#allocation7], %s2215_s18  ;;  %p3443_p0 = scmp.ne.s32.totalorder %s3422_s12, 0 }
  0xaa   : > { %2624 = dma.done.wait (%p3443_p0), %s356_s1, 2304  }
  0xab   : > { %2626 = vsyncadd (%p3443_p0), %s356_s1, 4294964992  ;;  %s3444_s9 = sld [smem:[#allocation24_spill]]  ;;  %s2216_s13 = sshll.u32 %s357_s11, 4 }
  0xac   : > { %s3025_s24 = sand.u32 1, %s2641_s22   ;;  %s3028_s21 = scalar_lea.vmem [#allocation9], %s2216_s13 }
  0xad   : > { %s2217_s14 = sshll.u32 %s3025_s24, 5  ;;  %s374_s28 = scalar_lea.sflag [#allocation11], %s3025_s24 }
  0xae   : > { %s3031_s29 = scalar_lea.vmem [#allocation10], %s2217_s14 }
  0xb1   : > { %p3445_p13 = scmp.ne.s32.totalorder %s3444_s9, 0 }
  0xb3   : > { %2628 = dma.done.wait (%p3445_p13), %s374_s28, 512  }
  0xb4   : > { %2630 = vsyncadd (%p3445_p13), %s374_s28, 4294966784  ;;  %s3446_s12 = sld [smem:[#allocation19_spill]]  ;;  %s2218_s20 = sshll.u32 %s3025_s24, 3 }
  0xb5   : > { %s3447_s19 = sld [smem:[#allocation28_spill]]  ;;  %s3042_s27 = scalar_lea.vmem [#allocation12], %s2218_s20 }
  0xb6   : > { %s3448_s15 = sld [smem:[#allocation18_spill]] }
  0xba   : > { %s2219_s8 = sshll.u32 %s3446_s12, 1 }
  0xbb   : > { %p433_p3 = scmp.lt.s32.totalorder %s2219_s8, 3 }
  0xbc   : > { %p2220_p6 = scmp.ne.s32.totalorder %s3448_s15, 0 }
  0xbd   : > { %s3475_s8 = smov (!%p433_p3, %s2219_s8), 3  ;;  %v445_v0 = vlaneseq (!%p2220_p6) }
  0xbe   : > { %s435_s6 = scalar_lea.vmem %s3447_s19, %s3475_s8  ;;  %442 = sbr.rel (%p2220_p6) target bundleno = 198 (0xc6), region = 64 }
  0xbf   : > { %v446_v1 = vshrl.u32 (!%p2220_p6), %v445_v0, 7  ;;  %v443_v2 = vld [vmem:[%s435_s6] sm:$0x3] (!%p2220_p6) }
  0xc1   : > { %v447_v3 = vsub.s32 (!%p2220_p6), 0, %v446_v1  ;;  %v451_v4 = vsub.s32 (!%p2220_p6), 1, %v446_v1 }
  0xc3   : > { %v448_v5 = vrot.slane (!%p2220_p6), %v443_v2, %v447_v3  ;;  %v452_v6 = vrot.slane (!%p2220_p6), %v443_v2, %v451_v4 }
  0xc5   : > { %455 = vst [vmem:[#allocation2] sm:$0xff] %v448_v5  ;;  %456 = vst [vmem:[#allocation2 + $0x8] sm:$0xff] %v452_v6 }
  0xc6 PF: > { %v3046_v7 = vld [vmem:[%s3018_s16 + $0x8] sm:$0xff]  ;;  %v3049_v8 = vld [vmem:[%s3018_s16 + $0x18] sm:$0xff]  ;;  %v3052_v9 = vld [vmem:[%s3018_s16] sm:$0xff]  ;;  %v2688_v15 = vmov 0   ;;  %s3449_s11 = sld [smem:[#allocation18_spill]]  ;;  %vm575_vm0 = vcmask 523264  }
  0xc7   : > { %v463_v10 = vand.u32 15, %v3046_v7  ;;  %v471_v11 = vshra.s32 %v3046_v7, 4  ;;  %v639_v12 = vand.u32 15, %v3049_v8  ;;  %v647_v13 = vshra.s32 %v3049_v8, 4  ;;  %v3059_v14 = vld [vmem:[%s3018_s16 + $0x10] sm:$0xff]  ;;  %611 = vmatprep.mubr.bf16.mxu0 %v2688_v15  ;;  %787 = vmatprep.mubr.bf16.mxu1 %v2688_v15 }
  0xc8   : > { %v462_v16 = vand.u32 15, %v3052_v9  ;;  %v470_v17 = vshra.s32 %v3052_v9, 4  ;;  %v638_v18 = vand.u32 15, %v3059_v14  ;;  %v646_v19 = vshra.s32 %v3059_v14, 4 }
  0xc9   : > { %v465_v20 = vcvt.s32.f32 %v463_v10  ;;  %v473_v21 = vand.u32 15, %v471_v11  ;;  %v641_v22 = vcvt.s32.f32 %v639_v12  ;;  %v649_v23 = vand.u32 15, %v647_v13 }
  0xca   : > { %v464_v24 = vcvt.s32.f32 %v462_v16  ;;  %v472_v25 = vand.u32 15, %v470_v17  ;;  %v640_v26 = vcvt.s32.f32 %v638_v18  ;;  %v648_v27 = vand.u32 15, %v646_v19 }
  0xcb   : > { %v467_v28 = vpack.c.bf16 %v465_v20, %v465_v20  ;;  %v475_v29 = vcvt.s32.f32 %v473_v21  ;;  %v643_v30 = vpack.c.bf16 %v641_v22, %v641_v22  ;;  %v651_v31 = vcvt.s32.f32 %v649_v23 }
  0xcc   : > { %v466_v32 = vpack.c.bf16 %v464_v24, %v464_v24  ;;  %v474_v33 = vcvt.s32.f32 %v472_v25  ;;  %v642_v34 = vpack.c.bf16 %v640_v26, %v640_v26  ;;  %v650_v35 = vcvt.s32.f32 %v648_v27  ;;  %s2285_s18 = sshll.u32 %s3449_s11, 5  ;;  %p2275_p9 = scmp.ne.s32.totalorder %s3449_s11, 1 }
  0xcd   : > { %469 = vst [vmem:[#allocation3 + $0x8] sm:$0xf] %v467_v28  ;;  %v477_v36 = vpack.c.bf16 %v475_v29, %v475_v29  ;;  %645 = vst [vmem:[#allocation3 + $0x48] sm:$0xf] %v643_v30  ;;  %v653_v37 = vpack.c.bf16 %v651_v31, %v651_v31  ;;  %v487_v38 = vshra.s32 %v3046_v7, 8  ;;  %v497_v39 = vshra.s32 %v3046_v7, 12 }
  0xce   : > { %468 = vst [vmem:[#allocation3] sm:$0xf] %v466_v32  ;;  %v476_v40 = vpack.c.bf16 %v474_v33, %v474_v33  ;;  %644 = vst [vmem:[#allocation3 + $0x40] sm:$0xf] %v642_v34  ;;  %v652_v41 = vpack.c.bf16 %v650_v35, %v650_v35  ;;  %v663_v42 = vshra.s32 %v3049_v8, 8  ;;  %v673_v43 = vshra.s32 %v3049_v8, 12 }
  0xcf   : > { %v481_v44 = vrot.slane %v477_v36, 4  ;;  %v657_v45 = vrot.slane %v653_v37, 4  ;;  %v489_v46 = vand.u32 15, %v487_v38  ;;  %v499_v47 = vand.u32 15, %v497_v39  ;;  %s3143_s1 = scalar_lea.vmem [#allocation4], %s2285_s18  ;;  %s3450_s13 = sld [smem:[#allocation27_spill]] (!%p2275_p9) }
  0xd0   : > { %v480_v48 = vrot.slane %v476_v40, 4  ;;  %v656_v49 = vrot.slane %v652_v41, 4  ;;  %v665_v50 = vand.u32 15, %v663_v42  ;;  %v675_v51 = vand.u32 15, %v673_v43 }
  0xd1   : > { %485 = vst [vmem:[#allocation3 + $0x8] sm:$0xf0] %v481_v44  ;;  %661 = vst [vmem:[#allocation3 + $0x48] sm:$0xf0] %v657_v45  ;;  %v491_v52 = vcvt.s32.f32 %v489_v46  ;;  %v501_v53 = vcvt.s32.f32 %v499_v47  ;;  %v486_v54 = vshra.s32 %v3052_v9, 8  ;;  %v496_v55 = vshra.s32 %v3052_v9, 12 }
  0xd2   : > { %484 = vst [vmem:[#allocation3] sm:$0xf0] %v480_v48  ;;  %660 = vst [vmem:[#allocation3 + $0x40] sm:$0xf0] %v656_v49  ;;  %v667_v56 = vcvt.s32.f32 %v665_v50  ;;  %v677_v57 = vcvt.s32.f32 %v675_v51  ;;  %v662_v58 = vshra.s32 %v3059_v14, 8  ;;  %v672_v59 = vshra.s32 %v3059_v14, 12 }
  0xd3   : > { %v493_v60 = vpack.c.bf16 %v491_v52, %v491_v52  ;;  %v503_v61 = vpack.c.bf16 %v501_v53, %v501_v53  ;;  %v488_v62 = vand.u32 15, %v486_v54  ;;  %v498_v63 = vand.u32 15, %v496_v55 }
  0xd4   : > { %v669_v0 = vpack.c.bf16 %v667_v56, %v667_v56  ;;  %v679_v1 = vpack.c.bf16 %v677_v57, %v677_v57  ;;  %v664_v2 = vand.u32 15, %v662_v58  ;;  %v674_v3 = vand.u32 15, %v672_v59 }
  0xd5   : > { %495 = vst [vmem:[#allocation3 + $0x18] sm:$0xf] %v493_v60  ;;  %v507_v4 = vrot.slane %v503_v61, 4  ;;  %v490_v5 = vcvt.s32.f32 %v488_v62  ;;  %v500_v6 = vcvt.s32.f32 %v498_v63  ;;  %v513_v10 = vshra.s32 %v3046_v7, 16 }
  0xd6   : > { %671 = vst [vmem:[#allocation3 + $0x58] sm:$0xf] %v669_v0  ;;  %v683_v11 = vrot.slane %v679_v1, 4  ;;  %v666_v12 = vcvt.s32.f32 %v664_v2  ;;  %v676_v13 = vcvt.s32.f32 %v674_v3  ;;  %v523_v16 = vshra.s32 %v3046_v7, 20 }
  0xd7   : > { %511 = vst [vmem:[#allocation3 + $0x18] sm:$0xf0] %v507_v4  ;;  %v492_v17 = vpack.c.bf16 %v490_v5, %v490_v5  ;;  %v502_v18 = vpack.c.bf16 %v500_v6, %v500_v6  ;;  %v515_v19 = vand.u32 15, %v513_v10  ;;  %v689_v20 = vshra.s32 %v3049_v8, 16 }
  0xd8   : > { %v568_v21 = vld [vmem:[#allocation3 + $0x8] sm:$0xff]  ;;  %687 = vst [vmem:[#allocation3 + $0x58] sm:$0xf0] %v683_v11  ;;  %v668_v23 = vpack.c.bf16 %v666_v12, %v666_v12  ;;  %v678_v24 = vpack.c.bf16 %v676_v13, %v676_v13  ;;  %v525_v25 = vand.u32 15, %v523_v16  ;;  %v699_v26 = vshra.s32 %v3049_v8, 20 }
  0xd9   : > { %v745_v22 = vld [vmem:[#allocation3 + $0x48] sm:$0xff]  ;;  %579 = vmatprep.subr.bf16.mxu0 %v568_v21  ;;  %v567_v27 = vld [vmem:[#allocation3] sm:$0xff]  ;;  %494 = vst [vmem:[#allocation3 + $0x10] sm:$0xf] %v492_v17  ;;  %v506_v29 = vrot.slane %v502_v18, 4  ;;  %v517_v30 = vcvt.s32.f32 %v515_v19  ;;  %v691_v31 = vand.u32 15, %v689_v20 }
  0xda   : > { %755 = vmatprep.subr.bf16.mxu1 %v745_v22  ;;  %v744_v28 = vld [vmem:[#allocation3 + $0x40] sm:$0xff]  ;;  %v512_v32 = vshra.s32 %v3052_v9, 16  ;;  %580 = vmatpush1.bf16.msra.mxu0 %v567_v27  ;;  %670 = vst [vmem:[#allocation3 + $0x50] sm:$0xf] %v668_v23  ;;  %v682_v33 = vrot.slane %v678_v24, 4  ;;  %v527_v34 = vcvt.s32.f32 %v525_v25  ;;  %v701_v35 = vand.u32 15, %v699_v26 }
  0xdb   : > { %756 = vmatpush1.bf16.msra.mxu1 %v744_v28  ;;  %v522_v36 = vshra.s32 %v3052_v9, 20  ;;  %510 = vst [vmem:[#allocation3 + $0x10] sm:$0xf0] %v506_v29  ;;  %v519_v37 = vpack.c.bf16 %v517_v30, %v517_v30  ;;  %v693_v38 = vcvt.s32.f32 %v691_v31  ;;  %v688_v40 = vshra.s32 %v3059_v14, 16  ;;  %v3091_v20 = vld [vmem:[%s3018_s16 + $0x28] sm:$0xff] }
  0xdc   : > { %v514_v39 = vand.u32 15, %v512_v32  ;;  %686 = vst [vmem:[#allocation3 + $0x50] sm:$0xf0] %v682_v33  ;;  %v529_v41 = vpack.c.bf16 %v527_v34, %v527_v34  ;;  %v703_v42 = vcvt.s32.f32 %v701_v35  ;;  %v698_v44 = vshra.s32 %v3059_v14, 20  ;;  %v3096_v28 = vld [vmem:[%s3018_s16 + $0x48] sm:$0xff] }
  0xdd   : > { %v524_v43 = vand.u32 15, %v522_v36  ;;  %521 = vst [vmem:[#allocation3 + $0x28] sm:$0xf] %v519_v37  ;;  %v695_v45 = vpack.c.bf16 %v693_v38, %v693_v38  ;;  %v690_v47 = vand.u32 15, %v688_v40  ;;  %v539_v48 = vshra.s32 %v3046_v7, 24  ;;  %v3101_v37 = vld [vmem:[%s3018_s16 + $0x38] sm:$0xff] }
  0xde   : > { %v516_v46 = vcvt.s32.f32 %v514_v39  ;;  %v570_v49 = vld [vmem:[#allocation3 + $0x18] sm:$0xff]  ;;  %v533_v50 = vrot.slane %v529_v41, 4  ;;  %v705_v51 = vpack.c.bf16 %v703_v42, %v703_v42  ;;  %v700_v53 = vand.u32 15, %v698_v44 }
  0xdf   : > { %v526_v52 = vcvt.s32.f32 %v524_v43  ;;  %581 = vmatprep.subr.bf16.mxu0 %v570_v49  ;;  %v747_v54 = vld [vmem:[#allocation3 + $0x58] sm:$0xff]  ;;  %697 = vst [vmem:[#allocation3 + $0x68] sm:$0xf] %v695_v45  ;;  %v692_v56 = vcvt.s32.f32 %v690_v47  ;;  %v541_v57 = vand.u32 15, %v539_v48  ;;  %v2223_v58 = vshrl.u32 %v3046_v7, 28 }
  0xe0   : > { %v518_v55 = vpack.c.bf16 %v516_v46, %v516_v46  ;;  %757 = vmatprep.subr.bf16.mxu1 %v747_v54  ;;  %537 = vst [vmem:[#allocation3 + $0x28] sm:$0xf0] %v533_v50  ;;  %v709_v59 = vrot.slane %v705_v51, 4  ;;  %v702_v61 = vcvt.s32.f32 %v700_v53  ;;  %v715_v62 = vshra.s32 %v3049_v8, 24  ;;  %v3105_v43 = vld [vmem:[%s3018_s16 + $0x58] sm:$0xff]  ;;  %v3112_v53 = vld [vmem:[%s3018_s16 + $0x20] sm:$0xff] }
  0xe1   : > { %v528_v60 = vpack.c.bf16 %v526_v52, %v526_v52  ;;  %v694_v63 = vpack.c.bf16 %v692_v56, %v692_v56  ;;  %v543_v0 = vcvt.s32.f32 %v541_v57  ;;  %v553_v1 = vcvt.s32.f32 %v2223_v58 }
  0xe2   : > { %520 = vst [vmem:[#allocation3 + $0x20] sm:$0xf] %v518_v55  ;;  %v2227_v2 = vshrl.u32 %v3049_v8, 28  ;;  %v569_v3 = vld [vmem:[#allocation3 + $0x10] sm:$0xff]  ;;  %713 = vst [vmem:[#allocation3 + $0x68] sm:$0xf0] %v709_v59  ;;  %v704_v5 = vpack.c.bf16 %v702_v61, %v702_v61 }
  0xe3   : > { %v532_v4 = vrot.slane %v528_v60, 4  ;;  %v717_v6 = vand.u32 15, %v715_v62  ;;  %v538_v7 = vshra.s32 %v3052_v9, 24  ;;  %582 = vmatpush1.bf16.msra.mxu0 %v569_v3  ;;  %v746_v10 = vld [vmem:[#allocation3 + $0x50] sm:$0xff]  ;;  %696 = vst [vmem:[#allocation3 + $0x60] sm:$0xf] %v694_v63  ;;  %v545_v11 = vpack.c.bf16 %v543_v0, %v543_v0 }
  0xe4   : > { %v555_v12 = vpack.c.bf16 %v553_v1, %v553_v1  ;;  %v729_v13 = vcvt.s32.f32 %v2227_v2  ;;  %v2222_v16 = vshrl.u32 %v3052_v9, 28  ;;  %758 = vmatpush1.bf16.msra.mxu1 %v746_v10  ;;  %v708_v8 = vrot.slane %v704_v5, 4 }
  0xe5   : > { %536 = vst [vmem:[#allocation3 + $0x20] sm:$0xf0] %v532_v4  ;;  %v719_v17 = vcvt.s32.f32 %v717_v6  ;;  %v540_v18 = vand.u32 15, %v538_v7  ;;  %v714_v19 = vshra.s32 %v3059_v14, 24  ;;  %547 = vst [vmem:[#allocation3 + $0x38] sm:$0xf] %v545_v11 }
  0xe6   : > { %v559_v21 = vrot.slane %v555_v12, 4  ;;  %v731_v22 = vpack.c.bf16 %v729_v13, %v729_v13  ;;  %v552_v23 = vcvt.s32.f32 %v2222_v16  ;;  %v2226_v24 = vshrl.u32 %v3059_v14, 28  ;;  %712 = vst [vmem:[#allocation3 + $0x60] sm:$0xf0] %v708_v8  ;;  %v3124_v4 = vld [vmem:[%s3018_s16 + $0x40] sm:$0xff] }
  0xe7   : > { %v721_v25 = vpack.c.bf16 %v719_v17, %v719_v17  ;;  %v542_v26 = vcvt.s32.f32 %v540_v18  ;;  %v716_v9 = vand.u32 15, %v714_v19  ;;  %v816_v27 = vand.u32 15, %v3091_v20  ;;  %v572_v29 = vld [vmem:[#allocation3 + $0x28] sm:$0xff]  ;;  %v3130_v17 = vld [vmem:[%s3018_s16 + $0x30] sm:$0xff] }
  0xe8   : > { %563 = vst [vmem:[#allocation3 + $0x38] sm:$0xf0] %v559_v21  ;;  %v735_v30 = vrot.slane %v731_v22, 4  ;;  %v554_v31 = vpack.c.bf16 %v552_v23, %v552_v23  ;;  %v728_v32 = vcvt.s32.f32 %v2226_v24  ;;  %v824_v33 = vshra.s32 %v3091_v20, 4  ;;  %583 = vmatprep.subr.bf16.mxu0 %v572_v29  ;;  %v566_v29 = vld [vmem:[%s3143_s1] sm:$0xf] }
  0xe9   : > { %723 = vst [vmem:[#allocation3 + $0x78] sm:$0xf] %v721_v25  ;;  %v544_v14 = vpack.c.bf16 %v542_v26, %v542_v26  ;;  %v718_v34 = vcvt.s32.f32 %v716_v9  ;;  %v818_v35 = vcvt.s32.f32 %v816_v27  ;;  %v1170_v36 = vand.u32 15, %v3096_v28  ;;  %v749_v38 = vld [vmem:[#allocation3 + $0x68] sm:$0xff]  ;;  %v3139_v27 = vld [vmem:[%s3018_s16 + $0x50] sm:$0xff] }
  0xea   : > { %739 = vst [vmem:[#allocation3 + $0x78] sm:$0xf0] %v735_v30  ;;  %v558_v39 = vrot.slane %v554_v31, 4  ;;  %v730_v40 = vpack.c.bf16 %v728_v32, %v728_v32  ;;  %v826_v41 = vand.u32 15, %v824_v33  ;;  %v1178_v42 = vshra.s32 %v3096_v28, 4  ;;  %759 = vmatprep.subr.bf16.mxu1 %v749_v38 }
  0xeb   : > { %546 = vst [vmem:[#allocation3 + $0x30] sm:$0xf] %v544_v14  ;;  %v720_v44 = vpack.c.bf16 %v718_v34, %v718_v34  ;;  %v820_v45 = vpack.c.bf16 %v818_v35, %v818_v35  ;;  %v3107_v46 = vcvt.s32.f32 %v1170_v36  ;;  %v993_v47 = vand.u32 15, %v3101_v37 }
  0xec   : > { %v571_v48 = vld [vmem:[#allocation3 + $0x20] sm:$0xff]  ;;  %562 = vst [vmem:[#allocation3 + $0x30] sm:$0xf0] %v558_v39  ;;  %v734_v49 = vrot.slane %v730_v40, 4  ;;  %v828_v50 = vcvt.s32.f32 %v826_v41  ;;  %v1180_v51 = vand.u32 15, %v1178_v42  ;;  %v1001_v52 = vshra.s32 %v3101_v37, 4 }
  0xed   : > { %584 = vmatpush1.bf16.msra.mxu0 %v571_v48  ;;  %722 = vst [vmem:[#allocation3 + $0x70] sm:$0xf] %v720_v44  ;;  %822 = vst [vmem:[#allocation3 + $0x8] sm:$0xf] %v820_v45  ;;  %v1174_v54 = vpack.c.bf16 %v3107_v46, %v3107_v46  ;;  %v995_v55 = vcvt.s32.f32 %v993_v47  ;;  %v1347_v56 = vand.u32 15, %v3105_v43  ;;  %v1355_v57 = vshra.s32 %v3105_v43, 4 }
  0xee   : > { %v748_v58 = vld [vmem:[#allocation3 + $0x60] sm:$0xff]  ;;  %738 = vst [vmem:[#allocation3 + $0x70] sm:$0xf0] %v734_v49  ;;  %v830_v59 = vpack.c.bf16 %v828_v50, %v828_v50  ;;  %v1182_v60 = vcvt.s32.f32 %v1180_v51  ;;  %v1003_v61 = vand.u32 15, %v1001_v52  ;;  %v815_v62 = vand.u32 15, %v3112_v53 }
  0xef   : > { %760 = vmatpush1.bf16.msra.mxu1 %v748_v58  ;;  %v574_v63 = vld [vmem:[#allocation3 + $0x38] sm:$0xff]  ;;  %v997_v0 = vpack.c.bf16 %v995_v55, %v995_v55  ;;  %v3120_v1 = vcvt.s32.f32 %v1347_v56  ;;  %v1357_v2 = vand.u32 15, %v1355_v57  ;;  %v823_v3 = vshra.s32 %v3112_v53, 4  ;;  %v2230_v39 = vld [vmem:[%s3143_s1 + $0x4] sm:$0xf] }
  0xf0   : > { %585 = vmatprep.subr.bf16.mxu0 %v574_v63  ;;  %v834_v5 = vrot.slane %v830_v59, 4  ;;  %v1184_v6 = vpack.c.bf16 %v1182_v60, %v1182_v60  ;;  %v1005_v7 = vcvt.s32.f32 %v1003_v61  ;;  %v817_v10 = vcvt.s32.f32 %v815_v62 }
  0xf1   : > { %v751_v11 = vld [vmem:[#allocation3 + $0x78] sm:$0xff]  ;;  %999 = vst [vmem:[#allocation3 + $0x48] sm:$0xf] %v997_v0  ;;  %v1351_v12 = vpack.c.bf16 %v3120_v1, %v3120_v1  ;;  %v1359_v13 = vcvt.s32.f32 %v1357_v2  ;;  %v825_v16 = vand.u32 15, %v823_v3  ;;  %v1169_v8 = vand.u32 15, %v3124_v4 }
  0xf2   : > { %761 = vmatprep.subr.bf16.mxu1 %v751_v11  ;;  %838 = vst [vmem:[#allocation3 + $0x8] sm:$0xf0] %v834_v5  ;;  %v1188_v18 = vrot.slane %v1184_v6, 4  ;;  %v1007_v19 = vpack.c.bf16 %v1005_v7, %v1005_v7  ;;  %v819_v21 = vpack.c.bf16 %v817_v10, %v817_v10  ;;  %v1177_v22 = vshra.s32 %v3124_v4, 4 }
  0xf3   : > { %v573_v23 = vld [vmem:[#allocation3 + $0x30] sm:$0xff]  ;;  %v3133_v24 = vpack.c.bf16 %v1359_v13, %v1359_v13  ;;  %v827_v25 = vcvt.s32.f32 %v825_v16  ;;  %v3135_v26 = vcvt.s32.f32 %v1169_v8  ;;  %v992_v9 = vand.u32 15, %v3130_v17 }
  0xf4   : > { %586 = vmatpush1.bf16.msra.mxu0 %v573_v23  ;;  %v1011_v30 = vrot.slane %v1007_v19, 4  ;;  %821 = vst [vmem:[#allocation3] sm:$0xf] %v819_v21  ;;  %v1179_v31 = vand.u32 15, %v1177_v22  ;;  %v1000_v32 = vshra.s32 %v3130_v17, 4  ;;  %v1346_v33 = vand.u32 15, %v3139_v27 }
  0xf5   : > { %v750_v14 = vld [vmem:[#allocation3 + $0x70] sm:$0xff]  ;;  %v1365_v34 = vrot.slane %v3133_v24, 4  ;;  %v829_v35 = vpack.c.bf16 %v827_v25, %v827_v25  ;;  %v1173_v36 = vpack.c.bf16 %v3135_v26, %v3135_v26  ;;  %v994_v38 = vcvt.s32.f32 %v992_v9 }
  0xf6   : > { %762 = vmatpush1.bf16.msra.mxu1 %v750_v14  ;;  %1015 = vst [vmem:[#allocation3 + $0x48] sm:$0xf0] %v1011_v30  ;;  %v1181_v40 = vcvt.s32.f32 %v1179_v31  ;;  %v1002_v41 = vand.u32 15, %v1000_v32  ;;  %v3152_v42 = vcvt.s32.f32 %v1346_v33  ;;  %v1354_v44 = vshra.s32 %v3139_v27, 4 }
  0xf7   : > { %2225 = vmatmul.mubr.msk.bf16.vlgmr.msra.gmra.mrb[0].mxu0 %vm575_vm0, %v566_v29  ;;  %v833_v45 = vrot.slane %v829_v35, 4  ;;  %v996_v47 = vpack.c.bf16 %v994_v38, %v994_v38  ;;  %v840_v48 = vshra.s32 %v3091_v20, 8  ;;  %v850_v49 = vshra.s32 %v3091_v20, 12 }
  0xf8   : > { %v1183_v50 = vpack.c.bf16 %v1181_v40, %v1181_v40  ;;  %v1004_v51 = vcvt.s32.f32 %v1002_v41  ;;  %v1350_v52 = vpack.c.bf16 %v3152_v42, %v3152_v42  ;;  %v1356_v55 = vand.u32 15, %v1354_v44  ;;  %964 = vmatprep.mubr.bf16.mxu0 %v2688_v15 }
  0xf9   : > { %2231 = vmatmul.mubr.msk.bf16.vlgmr.msra.gmra.mrb[0].mxu1 %vm575_vm0, %v2230_v39  ;;  %v922_v56 = vld [vmem:[#allocation3 + $0x8] sm:$0xff]  ;;  %837 = vst [vmem:[#allocation3] sm:$0xf0] %v833_v45  ;;  %998 = vst [vmem:[#allocation3 + $0x40] sm:$0xf] %v996_v47  ;;  %v842_v57 = vand.u32 15, %v840_v48 }
  0xfa   : > { %v852_v58 = vand.u32 15, %v850_v49  ;;  %v1194_v59 = vshra.s32 %v3096_v28, 8  ;;  %v1204_v60 = vshra.s32 %v3096_v28, 12  ;;  %932 = vmatprep.subr.bf16.mxu0 %v922_v56  ;;  %1176 = vst [vmem:[#allocation3 + $0x8] sm:$0xf] %v1174_v54  ;;  %v1187_v61 = vrot.slane %v1183_v50, 4  ;;  %1141 = vmatprep.mubr.bf16.mxu1 %v2688_v15 }
  0xfb   : > { %1192 = vst [vmem:[#allocation3 + $0x8] sm:$0xf0] %v1188_v18  ;;  %v1006_v62 = vpack.c.bf16 %v1004_v51, %v1004_v51  ;;  %v1358_v63 = vcvt.s32.f32 %v1356_v55  ;;  %v1017_v0 = vshra.s32 %v3101_v37, 8  ;;  %v844_v2 = vcvt.s32.f32 %v842_v57 }
  0xfc   : > { %v854_v3 = vcvt.s32.f32 %v852_v58  ;;  %v1196_v5 = vand.u32 15, %v1194_v59  ;;  %v1206_v6 = vand.u32 15, %v1204_v60  ;;  %v1027_v13 = vshra.s32 %v3101_v37, 12 }
  0xfd   : > { %v1010_v7 = vrot.slane %v1006_v62, 4  ;;  %v1360_v10 = vpack.c.bf16 %v1358_v63, %v1358_v63  ;;  %v1019_v11 = vand.u32 15, %v1017_v0  ;;  %v1099_v16 = vld [vmem:[#allocation3 + $0x48] sm:$0xff]  ;;  %v846_v46 = vpack.c.bf16 %v844_v2, %v844_v2 }
  0xfe   : > { %v856_v54 = vpack.c.bf16 %v854_v3, %v854_v3  ;;  %v1198_v8 = vcvt.s32.f32 %v1196_v5  ;;  %v1208_v18 = vcvt.s32.f32 %v1206_v6  ;;  %1109 = vmatprep.subr.bf16.mxu1 %v1099_v16  ;;  %1353 = vst [vmem:[#allocation3 + $0x48] sm:$0xf] %v1351_v12  ;;  %1369 = vst [vmem:[#allocation3 + $0x48] sm:$0xf0] %v1365_v34  ;;  %v1029_v22 = vand.u32 15, %v1027_v13 }
  0xff   : > { %1014 = vst [vmem:[#allocation3 + $0x40] sm:$0xf0] %v1010_v7  ;;  %v1364_v19 = vrot.slane %v1360_v10, 4  ;;  %v1021_v21 = vcvt.s32.f32 %v1019_v11  ;;  %v1371_v23 = vshra.s32 %v3105_v43, 8  ;;  %848 = vst [vmem:[#allocation3 + $0x18] sm:$0xf] %v846_v46 }
 0x100   : > { %v860_v24 = vrot.slane %v856_v54, 4  ;;  %v1200_v25 = vpack.c.bf16 %v1198_v8, %v1198_v8  ;;  %v1210_v9 = vpack.c.bf16 %v1208_v18, %v1208_v18  ;;  %v1381_v29 = vshra.s32 %v3105_v43, 12  ;;  %v921_v30 = vld [vmem:[#allocation3] sm:$0xff] }
 0x101   : > { %v1023_v31 = vpack.c.bf16 %v1021_v21, %v1021_v21  ;;  %v1031_v32 = vcvt.s32.f32 %v1029_v22  ;;  %v1373_v33 = vand.u32 15, %v1371_v23  ;;  %v839_v1 = vshra.s32 %v3112_v53, 8  ;;  %933 = vmatpush1.bf16.msra.mxu0 %v921_v30  ;;  %1175 = vst [vmem:[#allocation3] sm:$0xf] %v1173_v36  ;;  %1191 = vst [vmem:[#allocation3] sm:$0xf0] %v1187_v61 }
 0x102   : > { %864 = vst [vmem:[#allocation3 + $0x18] sm:$0xf0] %v860_v24  ;;  %v1214_v12 = vrot.slane %v1210_v9, 4  ;;  %v1383_v14 = vand.u32 15, %v1381_v29  ;;  %v849_v34 = vshra.s32 %v3112_v53, 12  ;;  %v1193_v35 = vshra.s32 %v3124_v4, 8 }
 0x103   : > { %1025 = vst [vmem:[#allocation3 + $0x58] sm:$0xf] %v1023_v31  ;;  %v1033_v38 = vpack.c.bf16 %v1031_v32, %v1031_v32  ;;  %v1375_v39 = vcvt.s32.f32 %v1373_v33  ;;  %v841_v40 = vand.u32 15, %v839_v1  ;;  %v1203_v41 = vshra.s32 %v3124_v4, 12 }
 0x104   : > { %v1385_v44 = vcvt.s32.f32 %v1383_v14  ;;  %v851_v45 = vand.u32 15, %v849_v34  ;;  %v1195_v47 = vand.u32 15, %v1193_v35  ;;  %v1016_v26 = vshra.s32 %v3130_v17, 8 }
 0x105   : > { %v1037_v36 = vrot.slane %v1033_v38, 4  ;;  %v1377_v48 = vpack.c.bf16 %v1375_v39, %v1375_v39  ;;  %v843_v49 = vcvt.s32.f32 %v841_v40  ;;  %v1205_v50 = vand.u32 15, %v1203_v41 }
 0x106   : > { %v1098_v51 = vld [vmem:[#allocation3 + $0x40] sm:$0xff]  ;;  %v1387_v55 = vpack.c.bf16 %v1385_v44, %v1385_v44  ;;  %v853_v56 = vcvt.s32.f32 %v851_v45  ;;  %v1197_v57 = vcvt.s32.f32 %v1195_v47  ;;  %v1018_v58 = vand.u32 15, %v1016_v26 }
 0x107   : > { %1110 = vmatpush1.bf16.msra.mxu1 %v1098_v51  ;;  %1352 = vst [vmem:[#allocation3 + $0x40] sm:$0xf] %v1350_v52  ;;  %1368 = vst [vmem:[#allocation3 + $0x40] sm:$0xf0] %v1364_v19  ;;  %v845_v59 = vpack.c.bf16 %v843_v49, %v843_v49  ;;  %v1207_v60 = vcvt.s32.f32 %v1205_v50  ;;  %v1026_v61 = vshra.s32 %v3130_v17, 12  ;;  %v1370_v62 = vshra.s32 %v3139_v27, 8 }
 0x108   : > { %1041 = vst [vmem:[#allocation3 + $0x58] sm:$0xf0] %v1037_v36  ;;  %v1391_v63 = vrot.slane %v1387_v55, 4  ;;  %v855_v0 = vpack.c.bf16 %v853_v56, %v853_v56  ;;  %v1199_v2 = vpack.c.bf16 %v1197_v57, %v1197_v57  ;;  %v1020_v3 = vcvt.s32.f32 %v1018_v58 }
 0x109   : > { %v924_v5 = vld [vmem:[#allocation3 + $0x18] sm:$0xff]  ;;  %847 = vst [vmem:[#allocation3 + $0x10] sm:$0xf] %v845_v59  ;;  %v1209_v6 = vpack.c.bf16 %v1207_v60, %v1207_v60  ;;  %v1028_v7 = vand.u32 15, %v1026_v61  ;;  %v1372_v10 = vand.u32 15, %v1370_v62  ;;  %v1380_v42 = vshra.s32 %v3139_v27, 12 }
 0x10a   : > { %934 = vmatprep.subr.bf16.mxu0 %v924_v5  ;;  %1202 = vst [vmem:[#allocation3 + $0x18] sm:$0xf] %v1200_v25  ;;  %1218 = vst [vmem:[#allocation3 + $0x18] sm:$0xf0] %v1214_v12  ;;  %v859_v52 = vrot.slane %v855_v0, 4  ;;  %v1022_v11 = vpack.c.bf16 %v1020_v3, %v1020_v3  ;;  %v866_v13 = vshra.s32 %v3091_v20, 16 }
 0x10b   : > { %v876_v16 = vshra.s32 %v3091_v20, 20  ;;  %v1213_v46 = vrot.slane %v1209_v6, 4  ;;  %v1030_v54 = vcvt.s32.f32 %v1028_v7  ;;  %v1374_v8 = vcvt.s32.f32 %v1372_v10 }
 0x10c   : > { %v1382_v18 = vand.u32 15, %v1380_v42  ;;  %863 = vst [vmem:[#allocation3 + $0x10] sm:$0xf0] %v859_v52  ;;  %1024 = vst [vmem:[#allocation3 + $0x50] sm:$0xf] %v1022_v11  ;;  %v868_v19 = vand.u32 15, %v866_v13 }
 0x10d   : > { %v878_v21 = vand.u32 15, %v876_v16  ;;  %v1220_v22 = vshra.s32 %v3096_v28, 16  ;;  %v1230_v23 = vshra.s32 %v3096_v28, 20  ;;  %v1032_v24 = vpack.c.bf16 %v1030_v54, %v1030_v54 }
 0x10e   : > { %v1376_v25 = vpack.c.bf16 %v1374_v8, %v1374_v8  ;;  %v1384_v9 = vcvt.s32.f32 %v1382_v18  ;;  %v1043_v29 = vshra.s32 %v3101_v37, 16  ;;  %v870_v31 = vcvt.s32.f32 %v868_v19 }
 0x10f   : > { %v1101_v30 = vld [vmem:[#allocation3 + $0x58] sm:$0xff]  ;;  %v880_v32 = vcvt.s32.f32 %v878_v21  ;;  %v1222_v33 = vand.u32 15, %v1220_v22  ;;  %v1232_v1 = vand.u32 15, %v1230_v23  ;;  %v1036_v12 = vrot.slane %v1032_v24, 4 }
 0x110   : > { %1111 = vmatprep.subr.bf16.mxu1 %v1101_v30  ;;  %1379 = vst [vmem:[#allocation3 + $0x58] sm:$0xf] %v1377_v48  ;;  %1395 = vst [vmem:[#allocation3 + $0x58] sm:$0xf0] %v1391_v63  ;;  %v1386_v14 = vpack.c.bf16 %v1384_v9, %v1384_v9  ;;  %v1045_v34 = vand.u32 15, %v1043_v29  ;;  %v1053_v35 = vshra.s32 %v3101_v37, 20  ;;  %v872_v38 = vpack.c.bf16 %v870_v31, %v870_v31 }
 0x111   : > { %v882_v39 = vpack.c.bf16 %v880_v32, %v880_v32  ;;  %v1224_v40 = vcvt.s32.f32 %v1222_v33  ;;  %v1234_v41 = vcvt.s32.f32 %v1232_v1  ;;  %1040 = vst [vmem:[#allocation3 + $0x50] sm:$0xf0] %v1036_v12  ;;  %v1397_v26 = vshra.s32 %v3105_v43, 16 }
 0x112   : > { %v1390_v44 = vrot.slane %v1386_v14, 4  ;;  %v1047_v45 = vcvt.s32.f32 %v1045_v34  ;;  %v1055_v47 = vand.u32 15, %v1053_v35  ;;  %874 = vst [vmem:[#allocation3 + $0x28] sm:$0xf] %v872_v38  ;;  %v1407_v50 = vshra.s32 %v3105_v43, 20 }
 0x113   : > { %v886_v36 = vrot.slane %v882_v39, 4  ;;  %v1226_v49 = vpack.c.bf16 %v1224_v40, %v1224_v40  ;;  %v1236_v48 = vpack.c.bf16 %v1234_v41, %v1234_v41  ;;  %v923_v51 = vld [vmem:[#allocation3 + $0x10] sm:$0xff]  ;;  %v1399_v57 = vand.u32 15, %v1397_v26 }
 0x114   : > { %v1049_v55 = vpack.c.bf16 %v1047_v45, %v1047_v45  ;;  %v1057_v56 = vcvt.s32.f32 %v1055_v47  ;;  %v865_v58 = vshra.s32 %v3112_v53, 16  ;;  %935 = vmatpush1.bf16.msra.mxu0 %v923_v51  ;;  %1201 = vst [vmem:[#allocation3 + $0x10] sm:$0xf] %v1199_v2  ;;  %1217 = vst [vmem:[#allocation3 + $0x10] sm:$0xf0] %v1213_v46  ;;  %v1409_v60 = vand.u32 15, %v1407_v50 }
 0x115   : > { %890 = vst [vmem:[#allocation3 + $0x28] sm:$0xf0] %v886_v36  ;;  %v1240_v59 = vrot.slane %v1236_v48, 4  ;;  %v875_v61 = vshra.s32 %v3112_v53, 20  ;;  %v1219_v62 = vshra.s32 %v3124_v4, 16  ;;  %v1401_v0 = vcvt.s32.f32 %v1399_v57 }
 0x116   : > { %1051 = vst [vmem:[#allocation3 + $0x68] sm:$0xf] %v1049_v55  ;;  %v1059_v63 = vpack.c.bf16 %v1057_v56, %v1057_v56  ;;  %v867_v3 = vand.u32 15, %v865_v58  ;;  %v1229_v5 = vshra.s32 %v3124_v4, 20  ;;  %v1411_v6 = vcvt.s32.f32 %v1409_v60 }
 0x117   : > { %v877_v7 = vand.u32 15, %v875_v61  ;;  %v1221_v10 = vand.u32 15, %v1219_v62  ;;  %v1042_v42 = vshra.s32 %v3130_v17, 16  ;;  %v1403_v52 = vpack.c.bf16 %v1401_v0, %v1401_v0 }
 0x118   : > { %v1063_v2 = vrot.slane %v1059_v63, 4  ;;  %v869_v11 = vcvt.s32.f32 %v867_v3  ;;  %v1231_v13 = vand.u32 15, %v1229_v5  ;;  %v1100_v16 = vld [vmem:[#allocation3 + $0x50] sm:$0xff]  ;;  %v1413_v46 = vpack.c.bf16 %v1411_v6, %v1411_v6 }
 0x119   : > { %v879_v54 = vcvt.s32.f32 %v877_v7  ;;  %v1223_v8 = vcvt.s32.f32 %v1221_v10  ;;  %v1044_v18 = vand.u32 15, %v1042_v42  ;;  %1112 = vmatpush1.bf16.msra.mxu1 %v1100_v16  ;;  %1378 = vst [vmem:[#allocation3 + $0x50] sm:$0xf] %v1376_v25  ;;  %1394 = vst [vmem:[#allocation3 + $0x50] sm:$0xf0] %v1390_v44  ;;  %v1052_v22 = vshra.s32 %v3130_v17, 20 }
 0x11a   : > { %1067 = vst [vmem:[#allocation3 + $0x68] sm:$0xf0] %v1063_v2  ;;  %v871_v19 = vpack.c.bf16 %v869_v11, %v869_v11  ;;  %v1233_v21 = vcvt.s32.f32 %v1231_v13  ;;  %v1396_v23 = vshra.s32 %v3139_v27, 16  ;;  %v1417_v24 = vrot.slane %v1413_v46, 4 }
 0x11b   : > { %v881_v9 = vpack.c.bf16 %v879_v54, %v879_v54  ;;  %v1225_v29 = vpack.c.bf16 %v1223_v8, %v1223_v8  ;;  %v1046_v30 = vcvt.s32.f32 %v1044_v18  ;;  %v1054_v33 = vand.u32 15, %v1052_v22 }
 0x11c   : > { %v926_v31 = vld [vmem:[#allocation3 + $0x28] sm:$0xff]  ;;  %873 = vst [vmem:[#allocation3 + $0x20] sm:$0xf] %v871_v19  ;;  %v1235_v32 = vpack.c.bf16 %v1233_v21, %v1233_v21  ;;  %v1398_v1 = vand.u32 15, %v1396_v23  ;;  %v1406_v12 = vshra.s32 %v3139_v27, 20  ;;  %v892_v34 = vshra.s32 %v3091_v20, 24 }
 0x11d   : > { %936 = vmatprep.subr.bf16.mxu0 %v926_v31  ;;  %1228 = vst [vmem:[#allocation3 + $0x28] sm:$0xf] %v1226_v49  ;;  %1244 = vst [vmem:[#allocation3 + $0x28] sm:$0xf0] %v1240_v59  ;;  %v885_v25 = vrot.slane %v881_v9, 4  ;;  %v1048_v14 = vpack.c.bf16 %v1046_v30, %v1046_v30  ;;  %v2234_v35 = vshrl.u32 %v3091_v20, 28  ;;  %v1056_v39 = vcvt.s32.f32 %v1054_v33 }
 0x11e   : > { %v1239_v38 = vrot.slane %v1235_v32, 4  ;;  %v1400_v40 = vcvt.s32.f32 %v1398_v1  ;;  %v1408_v41 = vand.u32 15, %v1406_v12  ;;  %v894_v44 = vand.u32 15, %v892_v34  ;;  %v3220_v34 = vld [vmem:[%s3018_s16 + $0x68] sm:$0xff] }
 0x11f   : > { %889 = vst [vmem:[#allocation3 + $0x20] sm:$0xf0] %v885_v25  ;;  %1050 = vst [vmem:[#allocation3 + $0x60] sm:$0xf] %v1048_v14  ;;  %v906_v45 = vcvt.s32.f32 %v2234_v35  ;;  %v1246_v47 = vshra.s32 %v3096_v28, 24  ;;  %v2248_v26 = vshrl.u32 %v3096_v28, 28  ;;  %v1058_v36 = vpack.c.bf16 %v1056_v39, %v1056_v39 }
 0x120   : > { %v1402_v49 = vpack.c.bf16 %v1400_v40, %v1400_v40  ;;  %v1410_v48 = vcvt.s32.f32 %v1408_v41  ;;  %v1069_v50 = vshra.s32 %v3101_v37, 24  ;;  %v896_v55 = vcvt.s32.f32 %v894_v44  ;;  %v3224_v44 = vld [vmem:[%s3018_s16 + $0x78] sm:$0xff] }
 0x121   : > { %v1103_v51 = vld [vmem:[#allocation3 + $0x68] sm:$0xff]  ;;  %v908_v20 = vpack.c.bf16 %v906_v45, %v906_v45  ;;  %v1248_v56 = vand.u32 15, %v1246_v47  ;;  %v1260_v57 = vcvt.s32.f32 %v2248_v26  ;;  %v1062_v58 = vrot.slane %v1058_v36, 4 }
 0x122   : > { %1113 = vmatprep.subr.bf16.mxu1 %v1103_v51  ;;  %1405 = vst [vmem:[#allocation3 + $0x68] sm:$0xf] %v1403_v52  ;;  %1421 = vst [vmem:[#allocation3 + $0x68] sm:$0xf0] %v1417_v24  ;;  %v1412_v59 = vpack.c.bf16 %v1410_v48, %v1410_v48  ;;  %v1071_v60 = vand.u32 15, %v1069_v50  ;;  %v2241_v61 = vshrl.u32 %v3101_v37, 28  ;;  %v898_v62 = vpack.c.bf16 %v896_v55, %v896_v55 }
 0x123   : > { %v912_v28 = vrot.slane %v908_v20, 4  ;;  %v1250_v63 = vcvt.s32.f32 %v1248_v56  ;;  %v1262_v0 = vpack.c.bf16 %v1260_v57, %v1260_v57  ;;  %1066 = vst [vmem:[#allocation3 + $0x60] sm:$0xf0] %v1062_v58  ;;  %v1423_v7 = vshra.s32 %v3105_v43, 24  ;;  %v3232_v57 = vld [vmem:[%s3018_s16 + $0x60] sm:$0xff] }
 0x124   : > { %v1416_v3 = vrot.slane %v1412_v59, 4  ;;  %v1073_v5 = vcvt.s32.f32 %v1071_v60  ;;  %v1083_v6 = vcvt.s32.f32 %v2241_v61  ;;  %900 = vst [vmem:[#allocation3 + $0x38] sm:$0xf] %v898_v62  ;;  %v2255_v2 = vshrl.u32 %v3105_v43, 28 }
 0x125   : > { %916 = vst [vmem:[#allocation3 + $0x38] sm:$0xf0] %v912_v28  ;;  %v1252_v10 = vpack.c.bf16 %v1250_v63, %v1250_v63  ;;  %v1266_v42 = vrot.slane %v1262_v0, 4  ;;  %v891_v52 = vshra.s32 %v3112_v53, 24  ;;  %v1425_v16 = vand.u32 15, %v1423_v7 }
 0x126   : > { %v925_v11 = vld [vmem:[#allocation3 + $0x20] sm:$0xff]  ;;  %v1075_v37 = vpack.c.bf16 %v1073_v5, %v1073_v5  ;;  %v1085_v13 = vpack.c.bf16 %v1083_v6, %v1083_v6  ;;  %v2233_v46 = vshrl.u32 %v3112_v53, 28  ;;  %v1437_v54 = vcvt.s32.f32 %v2255_v2  ;;  %v1276_v6 = vld [vmem:[#allocation3 + $0x8] sm:$0xff] }
 0x127   : > { %937 = vmatpush1.bf16.msra.mxu0 %v925_v11  ;;  %1227 = vst [vmem:[#allocation3 + $0x20] sm:$0xf] %v1225_v29  ;;  %1243 = vst [vmem:[#allocation3 + $0x20] sm:$0xf0] %v1239_v38  ;;  %v893_v8 = vand.u32 15, %v891_v52  ;;  %v1245_v18 = vshra.s32 %v3124_v4, 24  ;;  %v1427_v43 = vcvt.s32.f32 %v1425_v16 }
 0x128   : > { %v2247_v19 = vshrl.u32 %v3124_v4, 28  ;;  %1077 = vst [vmem:[#allocation3 + $0x78] sm:$0xf] %v1075_v37  ;;  %v1089_v21 = vrot.slane %v1085_v13, 4  ;;  %v905_v22 = vcvt.s32.f32 %v2233_v46  ;;  %v1068_v23 = vshra.s32 %v3130_v17, 24  ;;  %v1453_v16 = vld [vmem:[#allocation3 + $0x48] sm:$0xff] }
 0x129   : > { %v1439_v24 = vpack.c.bf16 %v1437_v54, %v1437_v54  ;;  %v895_v9 = vcvt.s32.f32 %v893_v8  ;;  %v1247_v30 = vand.u32 15, %v1245_v18  ;;  %v1429_v29 = vpack.c.bf16 %v1427_v43, %v1427_v43 }
 0x12a   : > { %v1259_v53 = vcvt.s32.f32 %v2247_v19  ;;  %1093 = vst [vmem:[#allocation3 + $0x78] sm:$0xf0] %v1089_v21  ;;  %v907_v31 = vpack.c.bf16 %v905_v22, %v905_v22  ;;  %v1070_v32 = vand.u32 15, %v1068_v23  ;;  %v2240_v33 = vshrl.u32 %v3130_v17, 28  ;;  %v1102_v1 = vld [vmem:[#allocation3 + $0x60] sm:$0xff] }
 0x12b   : > { %v1443_v4 = vrot.slane %v1439_v24, 4  ;;  %v897_v12 = vpack.c.bf16 %v895_v9, %v895_v9  ;;  %v1249_v25 = vcvt.s32.f32 %v1247_v30  ;;  %1114 = vmatpush1.bf16.msra.mxu1 %v1102_v1  ;;  %1404 = vst [vmem:[#allocation3 + $0x60] sm:$0xf] %v1402_v49  ;;  %1420 = vst [vmem:[#allocation3 + $0x60] sm:$0xf0] %v1416_v3  ;;  %v1422_v41 = vshra.s32 %v3139_v27, 24 }
 0x12c   : > { %v1261_v14 = vpack.c.bf16 %v1259_v53, %v1259_v53  ;;  %v928_v35 = vld [vmem:[#allocation3 + $0x38] sm:$0xff]  ;;  %v911_v38 = vrot.slane %v907_v31, 4  ;;  %v1072_v39 = vcvt.s32.f32 %v1070_v32  ;;  %v1082_v40 = vcvt.s32.f32 %v2240_v33  ;;  %v3236_v3 = vld [vmem:[%s3018_s16 + $0x70] sm:$0xff]  ;;  %v1275_v21 = vld [vmem:[#allocation3] sm:$0xff] }
 0x12d   : > { %938 = vmatprep.subr.bf16.mxu0 %v928_v35  ;;  %1254 = vst [vmem:[#allocation3 + $0x38] sm:$0xf] %v1252_v10  ;;  %1270 = vst [vmem:[#allocation3 + $0x38] sm:$0xf0] %v1266_v42  ;;  %v1251_v17 = vpack.c.bf16 %v1249_v25, %v1249_v25  ;;  %v2254_v47 = vshrl.u32 %v3139_v27, 28  ;;  %v1524_v26 = vand.u32 15, %v3220_v34 }
 0x12e   : > { %899 = vst [vmem:[#allocation3 + $0x30] sm:$0xf] %v897_v12  ;;  %v1265_v45 = vrot.slane %v1261_v14, 4  ;;  %915 = vst [vmem:[#allocation3 + $0x30] sm:$0xf0] %v911_v38  ;;  %v1074_v36 = vpack.c.bf16 %v1072_v39, %v1072_v39  ;;  %v1084_v49 = vpack.c.bf16 %v1082_v40, %v1082_v40  ;;  %v1424_v48 = vand.u32 15, %v1422_v41 }
 0x12f   : > { %v1532_v50 = vshra.s32 %v3220_v34, 4  ;;  %v1436_v51 = vcvt.s32.f32 %v2254_v47  ;;  %v1526_v55 = vcvt.s32.f32 %v1524_v26  ;;  %v1701_v20 = vand.u32 15, %v3224_v44  ;;  %v2237_v24 = vld [vmem:[%s3143_s1 + $0x8] sm:$0xf]  ;;  %v1452_v12 = vld [vmem:[#allocation3 + $0x40] sm:$0xff] }
 0x130   : > { %v1709_v56 = vshra.s32 %v3224_v44, 4  ;;  %1076 = vst [vmem:[#allocation3 + $0x70] sm:$0xf] %v1074_v36  ;;  %v1088_v58 = vrot.slane %v1084_v49, 4  ;;  %v1426_v27 = vcvt.s32.f32 %v1424_v48  ;;  %v1523_v60 = vand.u32 15, %v3232_v57  ;;  %v1278_v14 = vld [vmem:[#allocation3 + $0x18] sm:$0xff] }
 0x131   : > { %v1534_v59 = vand.u32 15, %v1532_v50  ;;  %v1105_v61 = vld [vmem:[#allocation3 + $0x78] sm:$0xff]  ;;  %v1438_v62 = vpack.c.bf16 %v1436_v51, %v1436_v51  ;;  %v1528_v28 = vpack.c.bf16 %v1526_v55, %v1526_v55  ;;  %v1703_v63 = vcvt.s32.f32 %v1701_v20  ;;  %v1277_v55 = vld [vmem:[#allocation3 + $0x10] sm:$0xff] }
 0x132   : > { %v1711_v0 = vand.u32 15, %v1709_v56  ;;  %1115 = vmatprep.subr.bf16.mxu1 %v1105_v61  ;;  %1431 = vst [vmem:[#allocation3 + $0x78] sm:$0xf] %v1429_v29  ;;  %1447 = vst [vmem:[#allocation3 + $0x78] sm:$0xf0] %v1443_v4  ;;  %v1428_v5 = vpack.c.bf16 %v1426_v27, %v1426_v27  ;;  %v1525_v10 = vcvt.s32.f32 %v1523_v60  ;;  %v1531_v42 = vshra.s32 %v3232_v57, 4 }
 0x133   : > { %1092 = vst [vmem:[#allocation3 + $0x70] sm:$0xf0] %v1088_v58  ;;  %v1536_v7 = vcvt.s32.f32 %v1534_v59  ;;  %v1442_v2 = vrot.slane %v1438_v62, 4  ;;  %1530 = vst [vmem:[#allocation3 + $0x8] sm:$0xf] %v1528_v28  ;;  %v1705_v52 = vpack.c.bf16 %v1703_v63, %v1703_v63  ;;  %v1700_v37 = vand.u32 15, %v3236_v3 }
 0x134   : > { %v1713_v11 = vcvt.s32.f32 %v1711_v0  ;;  %v1527_v46 = vpack.c.bf16 %v1525_v10, %v1525_v10  ;;  %v1533_v54 = vand.u32 15, %v1531_v42  ;;  %v1708_v8 = vshra.s32 %v3236_v3, 4  ;;  %v2244_v47 = vld [vmem:[%s3143_s1 + $0xc] sm:$0xf]  ;;  %v1280_v62 = vld [vmem:[#allocation3 + $0x28] sm:$0xff] }
 0x135   : > { %v1538_v13 = vpack.c.bf16 %v1536_v7, %v1536_v7  ;;  %v927_v18 = vld [vmem:[#allocation3 + $0x30] sm:$0xff]  ;;  %1707 = vst [vmem:[#allocation3 + $0x48] sm:$0xf] %v1705_v52  ;;  %v1702_v43 = vcvt.s32.f32 %v1700_v37  ;;  %v1548_v22 = vshra.s32 %v3220_v34, 8  ;;  %v1558_v23 = vshra.s32 %v3220_v34, 12  ;;  %v1455_v27 = vld [vmem:[#allocation3 + $0x58] sm:$0xff] }
 0x136   : > { %v1715_v19 = vpack.c.bf16 %v1713_v11, %v1713_v11  ;;  %939 = vmatpush1.bf16.msra.mxu0 %v927_v18  ;;  %1253 = vst [vmem:[#allocation3 + $0x30] sm:$0xf] %v1251_v17  ;;  %1269 = vst [vmem:[#allocation3 + $0x30] sm:$0xf0] %v1265_v45  ;;  %v1535_v30 = vcvt.s32.f32 %v1533_v54  ;;  %v1710_v53 = vand.u32 15, %v1708_v8  ;;  %v1725_v29 = vshra.s32 %v3224_v44, 8 }
 0x137   : > { %v1542_v9 = vrot.slane %v1538_v13, 4  ;;  %1529 = vst [vmem:[#allocation3] sm:$0xf] %v1527_v46  ;;  %1286 = vmatprep.subr.bf16.mxu0 %v1276_v6  ;;  %v1704_v32 = vpack.c.bf16 %v1702_v43, %v1702_v43  ;;  %v1550_v33 = vand.u32 15, %v1548_v22  ;;  %v1560_v1 = vand.u32 15, %v1558_v23  ;;  %v1454_v11 = vld [vmem:[#allocation3 + $0x50] sm:$0xff] }
 0x138   : > { %v1719_v31 = vrot.slane %v1715_v19, 4  ;;  %v1537_v4 = vpack.c.bf16 %v1535_v30, %v1535_v30  ;;  %v1712_v25 = vcvt.s32.f32 %v1710_v53  ;;  %v1727_v35 = vand.u32 15, %v1725_v29  ;;  %v1457_v19 = vld [vmem:[#allocation3 + $0x68] sm:$0xff] }
 0x139   : > { %1546 = vst [vmem:[#allocation3 + $0x8] sm:$0xf0] %v1542_v9  ;;  %v1735_v38 = vshra.s32 %v3224_v44, 12  ;;  %2238 = vmatmul.mubr.msk.bf16.vlgmr.msra.gmra.mrb[4].mxu0 %vm575_vm0, %v2237_v24  ;;  %1706 = vst [vmem:[#allocation3 + $0x40] sm:$0xf] %v1704_v32  ;;  %v1552_v40 = vcvt.s32.f32 %v1550_v33  ;;  %v1562_v41 = vcvt.s32.f32 %v1560_v1  ;;  %v1547_v17 = vshra.s32 %v3232_v57, 8 }
 0x13a   : > { %v1104_v39 = vld [vmem:[#allocation3 + $0x70] sm:$0xff]  ;;  %1723 = vst [vmem:[#allocation3 + $0x48] sm:$0xf0] %v1719_v31  ;;  %v1557_v45 = vshra.s32 %v3232_v57, 12  ;;  %1287 = vmatpush1.bf16.msra.mxu0 %v1275_v21  ;;  %v1541_v26 = vrot.slane %v1537_v4, 4  ;;  %v1714_v36 = vpack.c.bf16 %v1712_v25, %v1712_v25  ;;  %v1729_v49 = vcvt.s32.f32 %v1727_v35  ;;  %1318 = vmatprep.mubr.bf16.mxu0 %v2688_v15  ;;  %v1282_v21 = vld [vmem:[#allocation3 + $0x38] sm:$0xff] }
 0x13b   : > { %1116 = vmatpush1.bf16.msra.mxu1 %v1104_v39  ;;  %1430 = vst [vmem:[#allocation3 + $0x70] sm:$0xf] %v1428_v5  ;;  %1446 = vst [vmem:[#allocation3 + $0x70] sm:$0xf0] %v1442_v2  ;;  %v1737_v48 = vand.u32 15, %v1735_v38  ;;  %1288 = vmatprep.subr.bf16.mxu0 %v1278_v14  ;;  %v1554_v50 = vpack.c.bf16 %v1552_v40, %v1552_v40  ;;  %v1564_v51 = vpack.c.bf16 %v1562_v41, %v1562_v41  ;;  %v1456_v4 = vld [vmem:[#allocation3 + $0x60] sm:$0xff] }
 0x13c   : > { %1463 = vmatprep.subr.bf16.mxu1 %v1453_v16  ;;  %v1549_v20 = vand.u32 15, %v1547_v17  ;;  %v1559_v56 = vand.u32 15, %v1557_v45  ;;  %1545 = vst [vmem:[#allocation3] sm:$0xf0] %v1541_v26  ;;  %v1718_v58 = vrot.slane %v1714_v36, 4  ;;  %v1731_v59 = vpack.c.bf16 %v1729_v49, %v1729_v49  ;;  %v1279_v16 = vld [vmem:[#allocation3 + $0x20] sm:$0xff] }
 0x13d   : > { %v1739_v60 = vcvt.s32.f32 %v1737_v48  ;;  %v1724_v61 = vshra.s32 %v3236_v3, 8  ;;  %1556 = vst [vmem:[#allocation3 + $0x18] sm:$0xf] %v1554_v50  ;;  %v1568_v28 = vrot.slane %v1564_v51, 4  ;;  %v1734_v5 = vshra.s32 %v3236_v3, 12  ;;  %v1459_v39 = vld [vmem:[#allocation3 + $0x78] sm:$0xff] }
 0x13e   : > { %2245 = vmatmul.mubr.msk.bf16.vlgmr.msra.gmra.mrb[4].mxu1 %vm575_vm0, %v2244_v47  ;;  %v1551_v63 = vcvt.s32.f32 %v1549_v20  ;;  %v1561_v0 = vcvt.s32.f32 %v1559_v56  ;;  %1722 = vst [vmem:[#allocation3 + $0x40] sm:$0xf0] %v1718_v58  ;;  %1733 = vst [vmem:[#allocation3 + $0x58] sm:$0xf] %v1731_v59  ;;  %1289 = vmatpush1.bf16.msra.mxu0 %v1277_v55  ;;  %v1574_v10 = vshra.s32 %v3220_v34, 16  ;;  %v1584_v42 = vshra.s32 %v3220_v34, 20 }
 0x13f   : > { %1464 = vmatpush1.bf16.msra.mxu1 %v1452_v12  ;;  %v1741_v6 = vpack.c.bf16 %v1739_v60, %v1739_v60  ;;  %v1726_v7 = vand.u32 15, %v1724_v61  ;;  %1572 = vst [vmem:[#allocation3 + $0x18] sm:$0xf0] %v1568_v28  ;;  %v1736_v37 = vand.u32 15, %v1734_v5  ;;  %1290 = vmatprep.subr.bf16.mxu0 %v1280_v62  ;;  %v1751_v13 = vshra.s32 %v3224_v44, 16  ;;  %v1281_v12 = vld [vmem:[#allocation3 + $0x30] sm:$0xff] }
 0x140   : > { %1465 = vmatprep.subr.bf16.mxu1 %v1455_v27  ;;  %v1553_v2 = vpack.c.bf16 %v1551_v63, %v1551_v63  ;;  %v1563_v52 = vpack.c.bf16 %v1561_v0, %v1561_v0  ;;  %v1576_v8 = vand.u32 15, %v1574_v10  ;;  %v1586_v18 = vand.u32 15, %v1584_v42  ;;  %1495 = vmatprep.mubr.bf16.mxu1 %v2688_v15  ;;  %v1630_v40 = vld [vmem:[#allocation3 + $0x8] sm:$0xff]  ;;  %v2251_v50 = vld [vmem:[%s3143_s1 + $0x10] sm:$0xf] }
 0x141   : > { %v1745_v46 = vrot.slane %v1741_v6, 4  ;;  %v1728_v54 = vcvt.s32.f32 %v1726_v7  ;;  %v1738_v22 = vcvt.s32.f32 %v1736_v37  ;;  %v1753_v23 = vand.u32 15, %v1751_v13  ;;  %v1807_v28 = vld [vmem:[#allocation3 + $0x48] sm:$0xff] }
 0x142   : > { %1555 = vst [vmem:[#allocation3 + $0x10] sm:$0xf] %v1553_v2  ;;  %v1567_v43 = vrot.slane %v1563_v52, 4  ;;  %v1761_v24 = vshra.s32 %v3224_v44, 20  ;;  %v1578_v30 = vcvt.s32.f32 %v1576_v8  ;;  %v1588_v53 = vcvt.s32.f32 %v1586_v18  ;;  %1291 = vmatpush1.bf16.msra.mxu0 %v1279_v16  ;;  %v1458_v58 = vld [vmem:[#allocation3 + $0x70] sm:$0xff] }
 0x143   : > { %1749 = vst [vmem:[#allocation3 + $0x58] sm:$0xf0] %v1745_v46  ;;  %1466 = vmatpush1.bf16.msra.mxu1 %v1454_v11  ;;  %v1730_v9 = vpack.c.bf16 %v1728_v54, %v1728_v54  ;;  %v1573_v29 = vshra.s32 %v3232_v57, 16  ;;  %v1740_v31 = vpack.c.bf16 %v1738_v22, %v1738_v22  ;;  %v1755_v32 = vcvt.s32.f32 %v1753_v23  ;;  %1292 = vmatprep.subr.bf16.mxu0 %v1282_v21  ;;  %v1629_v27 = vld [vmem:[#allocation3] sm:$0xff] }
 0x144   : > { %1571 = vst [vmem:[#allocation3 + $0x10] sm:$0xf0] %v1567_v43  ;;  %1467 = vmatprep.subr.bf16.mxu1 %v1457_v19  ;;  %v1763_v33 = vand.u32 15, %v1761_v24  ;;  %v1583_v1 = vshra.s32 %v3232_v57, 20  ;;  %v1580_v25 = vpack.c.bf16 %v1578_v30, %v1578_v30  ;;  %v1590_v14 = vpack.c.bf16 %v1588_v53, %v1588_v53  ;;  %v2258_v52 = vld [vmem:[%s3143_s1 + $0x14] sm:$0xf] }
 0x145   : > { %1732 = vst [vmem:[#allocation3 + $0x50] sm:$0xf] %v1730_v9  ;;  %v1575_v35 = vand.u32 15, %v1573_v29  ;;  %v1750_v38 = vshra.s32 %v3236_v3, 16  ;;  %v1744_v41 = vrot.slane %v1740_v31, 4  ;;  %v1757_v17 = vpack.c.bf16 %v1755_v32, %v1755_v32  ;;  %v1806_v46 = vld [vmem:[#allocation3 + $0x40] sm:$0xff] }
 0x146   : > { %v1765_v45 = vcvt.s32.f32 %v1763_v33  ;;  %v1585_v47 = vand.u32 15, %v1583_v1  ;;  %1582 = vst [vmem:[#allocation3 + $0x28] sm:$0xf] %v1580_v25  ;;  %v1594_v26 = vrot.slane %v1590_v14, 4  ;;  %v1760_v48 = vshra.s32 %v3236_v3, 20  ;;  %1293 = vmatpush1.bf16.msra.mxu0 %v1281_v12  ;;  %v1632_v63 = vld [vmem:[#allocation3 + $0x18] sm:$0xff] }
 0x147   : > { %v1577_v36 = vcvt.s32.f32 %v1575_v35  ;;  %1468 = vmatpush1.bf16.msra.mxu1 %v1456_v4  ;;  %v1752_v49 = vand.u32 15, %v1750_v38  ;;  %1748 = vst [vmem:[#allocation3 + $0x50] sm:$0xf0] %v1744_v41  ;;  %1759 = vst [vmem:[#allocation3 + $0x68] sm:$0xf] %v1757_v17  ;;  %v1600_v20 = vshra.s32 %v3220_v34, 24  ;;  %1640 = vmatprep.subr.bf16.mxu0 %v1630_v40 }
 0x148   : > { %v1767_v51 = vpack.c.bf16 %v1765_v45, %v1765_v45  ;;  %v1587_v55 = vcvt.s32.f32 %v1585_v47  ;;  %v2262_v56 = vshrl.u32 %v3220_v34, 28  ;;  %1469 = vmatprep.subr.bf16.mxu1 %v1459_v39  ;;  %1598 = vst [vmem:[#allocation3 + $0x28] sm:$0xf0] %v1594_v26  ;;  %v1762_v61 = vand.u32 15, %v1760_v48  ;;  %v2272_v48 = vld [vmem:[%s3143_s1 + $0x1c] sm:$0xf] }
 0x149   : > { %v1579_v59 = vpack.c.bf16 %v1577_v36, %v1577_v36  ;;  %v1754_v60 = vcvt.s32.f32 %v1752_v49  ;;  %v1777_v62 = vshra.s32 %v3224_v44, 24  ;;  %v1602_v6 = vand.u32 15, %v1600_v20  ;;  %2252 = vmatmul.mubr.msk.bf16.vlgmr.msra.gmra.mrb[8].mxu0 %vm575_vm0, %v2251_v50  ;;  %v2265_v36 = vld [vmem:[%s3143_s1 + $0x18] sm:$0xf] }
 0x14a   : > { %v1771_v0 = vrot.slane %v1767_v51, 4  ;;  %v1589_v5 = vpack.c.bf16 %v1587_v55, %v1587_v55  ;;  %v1614_v7 = vcvt.s32.f32 %v2262_v56  ;;  %v1764_v10 = vcvt.s32.f32 %v1762_v61  ;;  %1641 = vmatpush1.bf16.msra.mxu0 %v1629_v27  ;;  %1672 = vmatprep.mubr.bf16.mxu0 %v2688_v15  ;;  %v620_v20 = vld [vmem:[%s3028_s21] ss:$8 sm:$0x3] }
 0x14b   : > { %1581 = vst [vmem:[#allocation3 + $0x20] sm:$0xf] %v1579_v59  ;;  %v1756_v34 = vpack.c.bf16 %v1754_v60, %v1754_v60  ;;  %v1779_v42 = vand.u32 15, %v1777_v62  ;;  %v2269_v2 = vshrl.u32 %v3224_v44, 28  ;;  %1470 = vmatpush1.bf16.msra.mxu1 %v1458_v58  ;;  %v1604_v37 = vcvt.s32.f32 %v1602_v6  ;;  %1642 = vmatprep.subr.bf16.mxu0 %v1632_v63  ;;  %v1631_v54 = vld [vmem:[#allocation3 + $0x10] sm:$0xff]  ;;  %v1809_v44 = vld [vmem:[#allocation3 + $0x58] sm:$0xff] }
 0x14c   : > { %1775 = vst [vmem:[#allocation3 + $0x68] sm:$0xf0] %v1771_v0  ;;  %v1593_v11 = vrot.slane %v1589_v5, 4  ;;  %v1616_v13 = vpack.c.bf16 %v1614_v7, %v1614_v7  ;;  %v1599_v16 = vshra.s32 %v3232_v57, 24  ;;  %1817 = vmatprep.subr.bf16.mxu1 %v1807_v28  ;;  %v1766_v8 = vpack.c.bf16 %v1764_v10, %v1764_v10  ;;  %v458_v61 = vld [vmem:[#allocation2] sm:$0xff]  ;;  %v459_v0 = vld [vmem:[#allocation2 + $0x8] sm:$0xff] }
 0x14d   : > { %1758 = vst [vmem:[#allocation3 + $0x60] sm:$0xf] %v1756_v34  ;;  %v1781_v18 = vcvt.s32.f32 %v1779_v42  ;;  %v1791_v19 = vcvt.s32.f32 %v2269_v2  ;;  %v2261_v21 = vshrl.u32 %v3232_v57, 28  ;;  %v1606_v43 = vpack.c.bf16 %v1604_v37, %v1604_v37  ;;  %v2232_v58 = vld [vmem:[%s3028_s21 + $0x1] ss:$8 sm:$0x3] }
 0x14e   : > { %1597 = vst [vmem:[#allocation3 + $0x20] sm:$0xf0] %v1593_v11  ;;  %v1620_v22 = vrot.slane %v1616_v13, 4  ;;  %v1601_v23 = vand.u32 15, %v1599_v16  ;;  %v1776_v24 = vshra.s32 %v3236_v3, 24  ;;  %2259 = vmatmul.mubr.msk.bf16.vlgmr.msra.gmra.mrb[8].mxu1 %vm575_vm0, %v2258_v52  ;;  %v1770_v9 = vrot.slane %v1766_v8, 4  ;;  %1643 = vmatpush1.bf16.msra.mxu0 %v1631_v54 }
 0x14f   : > { %v1783_v30 = vpack.c.bf16 %v1781_v18, %v1781_v18  ;;  %v1793_v53 = vpack.c.bf16 %v1791_v19, %v1791_v19  ;;  %v1613_v29 = vcvt.s32.f32 %v2261_v21  ;;  %1818 = vmatpush1.bf16.msra.mxu1 %v1806_v46  ;;  %1608 = vst [vmem:[#allocation3 + $0x38] sm:$0xf] %v1606_v43  ;;  %v2268_v32 = vshrl.u32 %v3236_v3, 28  ;;  %v1808_v33 = vld [vmem:[#allocation3 + $0x50] sm:$0xff]  ;;  %v1634_v1 = vld [vmem:[#allocation3 + $0x28] sm:$0xff]  ;;  %1849 = vmatprep.mubr.bf16.mxu1 %v2688_v15 }
 0x150   : > { %1624 = vst [vmem:[#allocation3 + $0x38] sm:$0xf0] %v1620_v22  ;;  %v1603_v57 = vcvt.s32.f32 %v1601_v23  ;;  %v1778_v31 = vand.u32 15, %v1776_v24  ;;  %1819 = vmatprep.subr.bf16.mxu1 %v1809_v44  ;;  %1774 = vst [vmem:[#allocation3 + $0x60] sm:$0xf0] %v1770_v9  ;;  %1644 = vmatprep.subr.bf16.mxu0 %v1634_v1  ;;  %v622_v50 = vlaneseq  ;;  %vm1886_vm1 = vcmask (!%p2275_p9), 130048  }
 0x151   : > { %1785 = vst [vmem:[#allocation3 + $0x78] sm:$0xf] %v1783_v30  ;;  %v1797_v4 = vrot.slane %v1793_v53, 4  ;;  %v1615_v12 = vpack.c.bf16 %v1613_v29, %v1613_v29  ;;  %v1790_v35 = vcvt.s32.f32 %v2268_v32  ;;  %v2239_v8 = vld [vmem:[%s3028_s21 + $0x2] ss:$8 sm:$0x3] }
 0x152   : > { %v1605_v25 = vpack.c.bf16 %v1603_v57, %v1603_v57  ;;  %v1780_v14 = vcvt.s32.f32 %v1778_v31  ;;  %v623_v51 = vshrl.u32 %v622_v50, 7  ;;  %v2246_v19 = vld [vmem:[%s3028_s21 + $0x3] ss:$8 sm:$0x3] }
 0x153   : > { %1801 = vst [vmem:[#allocation3 + $0x78] sm:$0xf0] %v1797_v4  ;;  %v1619_v38 = vrot.slane %v1615_v12, 4  ;;  %1820 = vmatpush1.bf16.msra.mxu1 %v1808_v33  ;;  %v1811_v39 = vld [vmem:[#allocation3 + $0x68] sm:$0xff]  ;;  %v1792_v3 = vpack.c.bf16 %v1790_v35, %v1790_v35 }
 0x154   : > { %1607 = vst [vmem:[#allocation3 + $0x30] sm:$0xf] %v1605_v25  ;;  %v1782_v40 = vpack.c.bf16 %v1780_v14, %v1780_v14  ;;  %1821 = vmatprep.subr.bf16.mxu1 %v1811_v39  ;;  %v3281_v55 = vsub.s32 0, %v623_v51  ;;  %v3284_v56 = vsub.s32 1, %v623_v51 }
 0x155   : > { %1623 = vst [vmem:[#allocation3 + $0x30] sm:$0xf0] %v1619_v38  ;;  %v1633_v41 = vld [vmem:[#allocation3 + $0x20] sm:$0xff]  ;;  %v1796_v15 = vrot.slane %v1792_v3, 4 }
 0x156   : > { %1784 = vst [vmem:[#allocation3 + $0x70] sm:$0xf] %v1782_v40  ;;  %1645 = vmatpush1.bf16.msra.mxu0 %v1633_v41  ;;  %v625_v27 = vrot.slane %v620_v20, %v3281_v55  ;;  %v629_v59 = vrot.slane %v620_v20, %v3284_v56  ;;  %v802_v60 = vrot.slane %v2232_v58, %v3281_v55  ;;  %v2253_v35 = vld [vmem:[%s3028_s21 + $0x4] ss:$8 sm:$0x3] }
 0x157   : > { %v1636_v17 = vld [vmem:[#allocation3 + $0x38] sm:$0xff]  ;;  %1800 = vst [vmem:[#allocation3 + $0x70] sm:$0xf0] %v1796_v15  ;;  %v1810_v45 = vld [vmem:[#allocation3 + $0x60] sm:$0xff]  ;;  %v806_v28 = vrot.slane %v2232_v58, %v3284_v56  ;;  %v979_v18 = vrot.slane %v2239_v8, %v3281_v55  ;;  %v983_v21 = vrot.slane %v2239_v8, %v3284_v56  ;;  %v1156_v22 = vrot.slane %v2246_v19, %v3281_v55 }
 0x158   : > { %1646 = vmatprep.subr.bf16.mxu0 %v1636_v17  ;;  %1822 = vmatpush1.bf16.msra.mxu1 %v1810_v45  ;;  %v1160_v9 = vrot.slane %v2246_v19, %v3284_v56  ;;  %v1333_v38 = vrot.slane %v2253_v35, %v3281_v55  ;;  %v2260_v39 = vld [vmem:[%s3028_s21 + $0x5] ss:$8 sm:$0x3]  ;;  %v1337_v40 = vrot.slane %v2253_v35, %v3284_v56 }
 0x159   : > { %v1510_v15 = vrot.slane %v2260_v39, %v3281_v55 }
 0x15a   : > { %v1813_v47 = vld [vmem:[#allocation3 + $0x78] sm:$0xff] }
 0x15b   : > { %1823 = vmatprep.subr.bf16.mxu1 %v1813_v47  ;;  %v1514_v47 = vrot.slane %v2260_v39, %v3284_v56 }
 0x15c   : > { %v1635_v26 = vld [vmem:[#allocation3 + $0x30] sm:$0xff] }
 0x15d   : > { %1647 = vmatpush1.bf16.msra.mxu0 %v1635_v26 }
 0x15e   : > { %v1812_v49 = vld [vmem:[#allocation3 + $0x70] sm:$0xff] }
 0x15f   : > { %1824 = vmatpush1.bf16.msra.mxu1 %v1812_v49 }
 0x160   : > { %2266 = vmatmul.mubr.msk.bf16.vlgmr.msra.gmra.mrb[12].mxu0 %vm575_vm0, %v2265_v36 }
 0x162   : > { %2273 = vmatmul.mubr.msk.bf16.vlgmr.msra.gmra.mrb[12].mxu1 %vm575_vm0, %v2272_v48 }
 0x1ca   : > { %v613_v62 = vpop.f32.mrb[0].mxu0 }
 0x1cb   : > { %v632_v63 = vmul.f32 %v625_v27, %v613_v62  ;;  %v615_v5 = vpop.f32.mrb[1].mxu0  ;;  %v2267_v62 = vld [vmem:[%s3028_s21 + $0x6] ss:$8 sm:$0x3] }
 0x1cc   : > { %v789_v6 = vpop.f32.mrb[0].mxu1  ;;  %v633_v7 = vmul.f32 %v629_v59, %v615_v5  ;;  %v617_v34 = vpop.f32.mrb[2].mxu0 }
 0x1cd   : > { %v634_v10 = vadd.f32 %v632_v63, %v458_v61  ;;  %v809_v42 = vmul.f32 %v802_v60, %v789_v6  ;;  %v791_v2 = vpop.f32.mrb[1].mxu1  ;;  %v618_v52 = vpop.f32.mrb[3].mxu0  ;;  %v2274_v63 = vld [vmem:[%s3028_s21 + $0x7] ss:$8 sm:$0x3] }
 0x1ce   : > { %v635_v11 = vadd.f32 %v633_v7, %v459_v0  ;;  %v810_v37 = vmul.f32 %v806_v28, %v791_v2  ;;  %v793_v13 = vpop.f32.mrb[2].mxu1  ;;  %v1687_v28 = vrot.slane %v2267_v62, %v3281_v55  ;;  %v1691_v0 = vrot.slane %v2267_v62, %v3284_v56 }
 0x1cf   : > { %v811_v16 = vadd.f32 %v809_v42, %v634_v10  ;;  %v794_v46 = vpop.f32.mrb[3].mxu1  ;;  %v1864_v6 = vrot.slane %v2274_v63, %v3281_v55  ;;  %v1868_v10 = vrot.slane %v2274_v63, %v3284_v56  ;;  %v1883_v55 = vld [vmem:[%s3031_s29 + $0x8] sm:$0xff] (!%p2275_p9)  ;;  %v1885_v56 = vld [vmem:[%s3031_s29 + $0x18] sm:$0xff] (!%p2275_p9) }
 0x1d0   : > { %v812_v54 = vadd.f32 %v810_v37, %v635_v11 }
 0x20c   : > { %v966_v44 = vpop.f32.mrb[4].mxu0 }
 0x20d   : > { %v986_v43 = vmul.f32 %v979_v18, %v966_v44  ;;  %v968_v23 = vpop.f32.mrb[5].mxu0  ;;  %v1882_v44 = vld [vmem:[%s3031_s29] sm:$0xff] (!%p2275_p9) }
 0x20e   : > { %v987_v24 = vmul.f32 %v983_v21, %v968_v23  ;;  %v970_v30 = vpop.f32.mrb[6].mxu0  ;;  %v2689_v23 = vmov (!%p2275_p9), 0.0  }
 0x20f   : > { %v988_v53 = vadd.f32 %v986_v43, %v811_v16  ;;  %v971_v29 = vpop.f32.mrb[7].mxu0  ;;  %v2295_v43 = vpack.c.bf16 (!%p2275_p9), %v1885_v56, %v1883_v55  ;;  %1954 = vmatprep.mubr.f32.mxu0 (!%p2275_p9), %v2689_v23 }
 0x210   : > { %v989_v31 = vadd.f32 %v987_v24, %v812_v54 }
 0x211   : > { %v1143_v57 = vpop.f32.mrb[4].mxu1  ;;  %2296 = vmatprep.subr.bf16.mxu0 (!%p2275_p9), %v2295_v43 }
 0x212   : > { %v1163_v32 = vmul.f32 %v1156_v22, %v1143_v57  ;;  %v1145_v33 = vpop.f32.mrb[5].mxu1  ;;  %v1884_v22 = vld [vmem:[%s3031_s29 + $0x10] sm:$0xff] (!%p2275_p9) }
 0x213   : > { %v1164_v1 = vmul.f32 %v1160_v9, %v1145_v33  ;;  %v1147_v4 = vpop.f32.mrb[6].mxu1  ;;  %v2297_v24 = vpack.c.bf16 (!%p2275_p9), %v1884_v22, %v1882_v44  ;;  %v1881_v9 = vld [vmem:[%s3450_s13] sm:$0xff] (!%p2275_p9) }
 0x214   : > { %v1165_v12 = vadd.f32 %v1163_v32, %v988_v53  ;;  %v1148_v25 = vpop.f32.mrb[7].mxu1 }
 0x215   : > { %v1166_v14 = vadd.f32 %v1164_v1, %v989_v31  ;;  %2298 = vmatpush1.bf16.msra.mxu0 (!%p2275_p9), %v2297_v24 }
 0x218   : > { %2276 = vmatmul.mubr.msk.f32.vlgmr.msra.gmra.mrb[0].mxu0 (!%p2275_p9), %vm1886_vm1, %v1881_v9 }
 0x21c   : > { %v1320_v3 = vpop.f32.mrb[8].mxu0 }
 0x21d   : > { %v1340_v41 = vmul.f32 %v1333_v38, %v1320_v3  ;;  %v1322_v17 = vpop.f32.mrb[9].mxu0 }
 0x21e   : > { %v1341_v45 = vmul.f32 %v1337_v40, %v1322_v17  ;;  %v1324_v26 = vpop.f32.mrb[10].mxu0 }
 0x21f   : > { %v1342_v36 = vadd.f32 %v1340_v41, %v1165_v12  ;;  %v1325_v49 = vpop.f32.mrb[11].mxu0 }
 0x220   : > { %v1343_v50 = vadd.f32 %v1341_v45, %v1166_v14 }
 0x221   : > { %v1497_v48 = vpop.f32.mrb[8].mxu1 }
 0x222   : > { %v1517_v51 = vmul.f32 %v1510_v15, %v1497_v48  ;;  %v1499_v20 = vpop.f32.mrb[9].mxu1 }
 0x223   : > { %v1518_v58 = vmul.f32 %v1514_v47, %v1499_v20  ;;  %v1501_v27 = vpop.f32.mrb[10].mxu1 }
 0x224   : > { %v1519_v59 = vadd.f32 %v1517_v51, %v1342_v36  ;;  %v1502_v60 = vpop.f32.mrb[11].mxu1 }
 0x225   : > { %v1520_v61 = vadd.f32 %v1518_v58, %v1343_v50 }
 0x233   : > { %v1674_v5 = vpop.f32.mrb[12].mxu0 }
 0x234   : > { %v1694_v7 = vmul.f32 %v1687_v28, %v1674_v5  ;;  %v1676_v34 = vpop.f32.mrb[13].mxu0 }
 0x235   : > { %v1695_v42 = vmul.f32 %v1691_v0, %v1676_v34  ;;  %v1678_v2 = vpop.f32.mrb[14].mxu0  ;;  %v1851_v11 = vpop.f32.mrb[12].mxu1  ;;  %1880 = sbr.rel (%p2275_p9) target bundleno = 754 (0x2f2), region = 68 }
 0x236   : > { %v1696_v52 = vadd.f32 %v1694_v7, %v1519_v59  ;;  %v1679_v37 = vpop.f32.mrb[15].mxu0  ;;  %v1871_v13 = vmul.f32 %v1864_v6, %v1851_v11  ;;  %v1853_v46 = vpop.f32.mrb[13].mxu1 }
 0x237   : > { %v1697_v16 = vadd.f32 %v1695_v42, %v1520_v61  ;;  %v1872_v54 = vmul.f32 %v1868_v10, %v1853_v46  ;;  %v1855_v8 = vpop.f32.mrb[14].mxu1 }
 0x238   : > { %v1873_v18 = vadd.f32 %v1871_v13, %v1696_v52  ;;  %v1856_v19 = vpop.f32.mrb[15].mxu1 }
 0x239   : > { %v1874_v21 = vadd.f32 %v1872_v54, %v1697_v16 }
 0x23a   : > { %1875 = vst [vmem:[#allocation2] sm:$0xff] %v1873_v18 }
 0x23b   : > { %1876 = vst [vmem:[#allocation2 + $0x8] sm:$0xff] %v1874_v21 }
 0x241   : > { %v1961_v30 = vld [vmem:[#allocation2] sm:$0xff] }
 0x242   : > { %v1962_v53 = vld [vmem:[#allocation2 + $0x8] sm:$0xff] }
 0x2eb   : > { %v1956_v29 = vpop.f32.mrb[0].mxu0 }
 0x2ec   : > { %v1963_v57 = vsub.f32 %v1961_v30, %v1956_v29  ;;  %v1958_v31 = vpop.f32.mrb[1].mxu0 }
 0x2ed   : > { %v1964_v32 = vsub.f32 %v1962_v53, %v1958_v31 }
 0x2ef   : > { %v2293_v33 = vpack.c.bf16 %v1964_v32, %v1963_v57 }
 0x2f1   : > { %1973 = vst [vmem:[%s3042_s27] sm:$0xff] %v2293_v33 }
 0x2f2 PF: > { %s3451_s14 = sld [smem:[#allocation19_spill]]  ;;  %s3452_s12 = sld [smem:[#allocation29_spill]] }
 0x2f3   : > { %s1991_s8 = sshll.u32 %s3042_s27, 4  ;;  %s1975_s3 = scalar_lea.sflag [#allocation6], %s3025_s24  ;;  %s1992_s8 = int_to_ptr.vmem [resolvable:$true] %s1991_s8 }
 0x2f4   : > { %s2547_s17 = scalar_lea.vmem %s1992_s8, 128  ;;  %s2690_s19 = smov [#allocation12]  }
 0x2f5   : > { %p2548_p5 = scmp.ne.s32.totalorder %s1992_s8, %s2547_s17  ;;  %s2551_s6 = sshll.u32 %s2690_s19, 4  ;;  %s2552_s6 = int_to_ptr.vmem [resolvable:$false] %s2551_s6 }
 0x2f6   : > { %s2553_s15 = scalar_lea.vmem %s2552_s6, 256  ;;  %p2554_p8 = scmp.lt.s32.totalorder %s1992_s8, %s2552_s6 }
 0x2f7   : > { %p2549_p11 = pnand %p2548_p5, %p2961_p10  ;;  %p2555_p1 = scmp.lt.s32.totalorder %s2553_s15, %s2547_s17 }
 0x2f8   : > { %s2294_s21 = sshll.u32 %s3451_s14, 7 }
 0x2f9   : > { %s3322_s20 = scalar_lea.hbm %s3452_s12, %s2294_s21  ;;  %p2550_p4 = pneg %p2549_p11 }
 0x2fa   : > { %p2556_p2 = por %p2555_p1, %p2554_p8 }
 0x2fc   : > { %p2557_p7 = pnand %p2556_p2, %p2550_p4 }
 0x2fe   : > { %2560 = shalt.err (!%p2557_p7)
}
 0x2ff   : > { %s2561_s24 = scalar_lea.hbm %s3322_s20, 128  ;;  %s2565_s18 = scalar_lea.hbm %s3452_s12, 256 }
 0x300   : > { %p2562_p12 = scmp.ne.s32.totalorder %s3322_s20, %s2561_s24  ;;  %p2566_p3 = scmp.lt.u32.totalorder %s3322_s20, %s3452_s12 }
 0x301   : > { %p2567_p6 = scmp.lt.u32.totalorder %s2565_s18, %s2561_s24  ;;  %p2569_p5 = scmp.lt.u32.totalorder %s2561_s24, %s3322_s20 }
 0x302   : > { %p2563_p0 = pnand %p2562_p12, %p2961_p10 }
 0x303   : > { %p2568_p9 = por %p2567_p6, %p2566_p3 }
 0x304   : > { %p2564_p13 = pneg %p2563_p0 }
 0x305   : > { %p2570_p11 = por %p2569_p5, %p2568_p9 }
 0x307   : > { %p2571_p4 = pnand %p2570_p11, %p2564_p13 }
 0x309   : > { %2574 = shalt.err (!%p2571_p4)
}
 0x30a   : > { %2309 = dma.vmem_to_hbm [thread:$0]  (%p2961_p10), %s1992_s8, 128, %s3322_s20, %s1975_s3  }
 0x30b PF: > { %s3453_s9 = sld [smem:[#allocation17_spill]]  ;;  %s3454_s13 = sld [smem:[#allocation25_spill]] }
 0x30c   : > { %p2332_p8 = scmp.ge.s32.totalorder %s2677_s7, 2 }
 0x311   : > { %s2003_s14 = sand.u32 1, %s3453_s9   ;;  %p3455_p1 = scmp.ne.s32.totalorder %s3454_s13, 0 }
 0x312   : > { %s2004_s21 = scalar_lea.sflag [#allocation6], %s2003_s14 }
 0x313   : > { %p2326_p2 = pnand %p2332_p8, %p3455_p1 }
 0x315   : > { %2632 = dma.done.wait (!%p2326_p2), %s2004_s21, 128  }
 0x316   : > { %2634 = vsyncadd (!%p2326_p2), %s2004_s21, 4294967168  ;;  %s26_s7 = sadd.s32 1, %s2677_s7   ;;  %s3456_s10 = sld [smem:[#allocation23_spill]] }
 0x317   : > { %p23_p7 = scmp.ge.s32.totalorder %s26_s7, 6   ;;  %s3457_s27 = sld [smem:[#allocation20_spill]] }
 0x318   : > { %s3458_s29 = sld [smem:[#allocation21_spill]]  ;;  %s3459_s20 = sld [smem:[#allocation22_spill]] }
 0x319   : > { %s3460_s21 = smov %s2641_s22  ;;  %s3461_s22 = smov %s2645_s23 }
 0x31a   : > { %s3462_s23 = smov %s2957_s5  ;;  %s3463_s24 = smov %s2653_s25 }
 0x31b   : > { %s3464_s25 = smov %s2657_s26  ;;  %s3466_s28 = smov %s2673_s30 }
 0x31c   : > { %s3465_s26 = smov %s3456_s10  ;;  %25 = sbr.rel (!%p23_p7) target bundleno = 17 (0x11), region = 148 }
 0x31e   : > { %s3467_s30 = smov %s3459_s20 }
 0x323   :  { %2009 = vsyncpa [#allocation5], 1 }
 0x324   :  { %2011 = vsyncpa [#allocation5 + $0x1], 1 }
 0x325   :  { %2012 = vsyncpa [#allocation8], 1 }
 0x326   :  { %2014 = vsyncpa [#allocation8 + $0x1], 1 }
 0x327   :  { %2015 = vsyncpa [#allocation11], 1 }
 0x328   :  { %2017 = vsyncpa [#allocation11 + $0x1], 1 }
 0x329   :  { %2018 = vsyncpa [#allocation6], 1 }
 0x32a   :  { %2020 = vsyncpa [#allocation6 + $0x1], 1 }

</bundles_post_ra>
